<compile_context>
chip_gen: v5e
topology: v5e:2x2
jax: 0.10.0
libtpu: 0.0.40
codegen_flags: <defaults>
</compile_context>

<pallas_src>
import functools

import jax
import jax.numpy as jnp
from jax.experimental import pallas as pl
from jax.experimental.pallas import tpu as pltpu

NEG_INF = float("-inf")


def _cascade_increments(pool_sizes):
    """Incremental 'same' max-pool sizes whose composition reproduces each pool size.

    For (5, 9, 13) -> (5, 5, 5): pool9 = pool5∘pool5, pool13 = pool5∘pool5∘pool5 (SPPF trick,
    exactly equal for stride-1 same-padded max pools).
    """
    sizes = tuple(int(k) for k in pool_sizes)
    assert all(k % 2 == 1 for k in sizes), "pool sizes must be odd"
    assert all(b > a for a, b in zip(sizes, sizes[1:])), "pool sizes must be ascending"
    inc = (sizes[0],) + tuple(b - a + 1 for a, b in zip(sizes, sizes[1:]))
    assert all(k % 2 == 1 for k in inc)
    return inc


def _max_along_w(x, r, out_width):
    """Radius-r max filter along axis 1 (W) of an (H, W_cur, C) tile.

    `x` is already -inf padded along W, so this is just 2r+1 static slices + jnp.maximum
    (VPU only, no masks). The result keeps positions [r, r + out_width) (width shrinks by r
    on each side); those positions carry exact values of the -inf-extended max filter.
    """
    out = x[:, 0:out_width, :]
    for d in range(1, 2 * r + 1):
        out = jnp.maximum(out, x[:, d:d + out_width, :])
    return out


def _max_along_h(x, r):
    """'Same' radius-r max filter along the leading (H) axis with -inf padding."""
    H = x.shape[0]
    neg = jnp.full((r,) + x.shape[1:], NEG_INF, dtype=x.dtype)
    xp = jnp.concatenate([neg, x, neg], axis=0)   # leading-dim concat: whole-tile stacking
    out = x
    for d in range(2 * r + 1):
        if d == r:
            continue  # center term is x itself
        out = jnp.maximum(out, xp[d:d + H])
    return out


def _make_spp_kernel(pool_sizes, W, pad):
    inc = _cascade_increments(pool_sizes)
    n_pool = len(inc)

    def kernel(x_ref, out_ref):
        # x_ref:   (H, W + 2*pad, Cb)  -- -inf padded along W, channels on the lane axis.
        # out_ref: (n_pool + 1, H, W, Cb)
        cur = x_ref[...]
        remaining = pad
        feats = []                                # (pooled feature, remaining pad per side)
        for k in inc:                             # SPPF cascade: pool5 -> pool9 -> pool13
            r = k // 2
            remaining -= r
            cur = _max_along_w(cur, r, W + 2 * remaining)
            cur = _max_along_h(cur, r)
            feats.append((cur, remaining))
        # torch.cat order: [largest pool, ..., smallest pool, identity]
        for slot, (f, off) in enumerate(reversed(feats)):
            out_ref[slot] = f[:, off:off + W, :] if off else f
        out_ref[n_pool] = x_ref[:, pad:pad + W, :]

    return kernel


def _pick_channel_block(C, H, W_pad, W, itemsize, n_branch, budget_bytes=4 << 20):
    """Largest channel block (multiple of 128 dividing C, or all of C) within a VMEM budget.

    Budget is deliberately small (4 MiB per step incl. double buffering + temporaries) so the
    same tiling is safe on v5e/v6e (128 MiB VMEM) and v7x (64 MiB).
    """
    if C % 128 != 0:
        return C  # the block's last dim must be a multiple of 128 or the full extent
    def step_bytes(cb):
        io = 2 * (H * W_pad * cb + n_branch * H * W * cb)   # double-buffered in/out blocks
        tmp = 3 * H * W_pad * cb                            # rough in-kernel temporaries
        return (io + tmp) * itemsize
    best = 128
    for cb in range(128, C + 1, 128):
        if C % cb == 0 and step_bytes(cb) <= budget_bytes:
            best = cb
    return best


@functools.partial(jax.jit, static_argnames=("pool_sizes",))
def spatial_pyramid_pooling(x, pool_sizes=(5, 9, 13)):
    """x: (N, C, H, W) float -> (N, (len(pool_sizes)+1)*C, H, W), matching the PyTorch SPP."""
    N, C, H, W = x.shape
    n_branch = len(pool_sizes) + 1
    pad = max(pool_sizes) // 2

    # Channels onto the lane axis; -inf pad along W so the kernel only needs slices + max.
    x_hwc = jnp.transpose(x, (0, 2, 3, 1))                                  # (N, H, W, C)
    x_p = jnp.pad(x_hwc, ((0, 0), (0, 0), (pad, pad), (0, 0)),
                  constant_values=NEG_INF)                                  # (N, H, W+2p, C)
    Wp = W + 2 * pad

    Cb = _pick_channel_block(C, H, Wp, W, x.dtype.itemsize, n_branch)
    grid = (N, C // Cb)

    out = pl.pallas_call(
        _make_spp_kernel(tuple(pool_sizes), W, pad),
        out_shape=jax.ShapeDtypeStruct((N, n_branch, H, W, C), x.dtype),
        grid=grid,
        in_specs=[pl.BlockSpec((None, H, Wp, Cb), lambda n, c: (n, 0, 0, c))],
        out_specs=pl.BlockSpec((None, n_branch, H, W, Cb),
                               lambda n, c: (n, 0, 0, 0, c)),
        compiler_params=pltpu.CompilerParams(
            dimension_semantics=("parallel", "parallel"),
            vmem_limit_bytes=32 * 1024 * 1024,
        ),
    )(x_p)

    # (N, B, H, W, C) -> (N, B, C, H, W) -> (N, B*C, H, W); matches torch.cat(dim=1) order
    # [pool13, pool9, pool5, x].
    return jnp.transpose(out, (0, 1, 4, 2, 3)).reshape(N, n_branch * C, H, W)


# ---------------- pure-JAX reference (for correctness check) ----------------
def _ref_maxpool_same(x, k):
    p = k // 2
    N, C, H, W = x.shape
    xp = jnp.pad(x, ((0, 0), (0, 0), (p, p), (p, p)), constant_values=-jnp.inf)
    out = jnp.full_like(x, -jnp.inf)
    for di in range(k):
        for dj in range(k):
            out = jnp.maximum(out, xp[:, :, di:di + H, dj:dj + W])
    return out


def _ref_spp(x, pool_sizes=(5, 9, 13)):
    feats = [_ref_maxpool_same(x, k) for k in reversed(pool_sizes)]
    return jnp.concatenate(feats + [x], axis=1)


if __name__ == "__main__":
    key = jax.random.PRNGKey(0)
    x = jax.random.normal(key, (2, 4, 16, 16), dtype=jnp.float32)

    out = spatial_pyramid_pooling(x)
    out = jax.block_until_ready(out)

    ref = _ref_spp(x)
    assert out.shape == (2, 4 * 4, 16, 16), out.shape
    assert out.dtype == x.dtype
    assert jnp.allclose(out, ref), "Pallas SPP mismatch vs reference"

    print("KERNEL_OK")
</pallas_src>

<mosaic_0001>
module attributes {stable_mosaic.version = 11 : i64} {
  func.func @kernel(%arg0: i32, %arg1: i32, %arg2: memref<1x16x28x4xf32, #tpu.memory_space<vmem>>, %arg3: memref<1x4x16x16x4xf32, #tpu.memory_space<vmem>>) attributes {dimension_semantics = [#tpu.dimension_semantics<parallel>, #tpu.dimension_semantics<parallel>], iteration_bounds = array<i64: 2, 1>, scalar_prefetch = 0 : i64, scratch_operands = 0 : i64, tpu.core_type = #tpu.core_type<tc>, window_params = [{transform_indices = @transform_0, window_bounds = array<i64: 1, 16, 28, 4>}, {transform_indices = @transform_1, window_bounds = array<i64: 1, 4, 16, 16, 4>}]} {
    %c0 = arith.constant 0 : index
    %c0_0 = arith.constant 0 : index
    %c0_1 = arith.constant 0 : index
    %c0_2 = arith.constant 0 : index
    %0 = vector.load %arg2[%c0, %c0_0, %c0_1, %c0_2] : memref<1x16x28x4xf32, #tpu.memory_space<vmem>>, vector<1x16x28x4xf32>
    %1 = vector.shape_cast %0 : vector<1x16x28x4xf32> to vector<16x28x4xf32>
    %2 = vector.extract_strided_slice %1 {offsets = [0, 0, 0], sizes = [16, 24, 4], strides = [1, 1, 1]} : vector<16x28x4xf32> to vector<16x24x4xf32>
    %3 = vector.extract_strided_slice %1 {offsets = [0, 1, 0], sizes = [16, 24, 4], strides = [1, 1, 1]} : vector<16x28x4xf32> to vector<16x24x4xf32>
    %4 = arith.maximumf %2, %3 : vector<16x24x4xf32>
    %5 = vector.extract_strided_slice %1 {offsets = [0, 2, 0], sizes = [16, 24, 4], strides = [1, 1, 1]} : vector<16x28x4xf32> to vector<16x24x4xf32>
    %6 = arith.maximumf %4, %5 : vector<16x24x4xf32>
    %7 = vector.extract_strided_slice %1 {offsets = [0, 3, 0], sizes = [16, 24, 4], strides = [1, 1, 1]} : vector<16x28x4xf32> to vector<16x24x4xf32>
    %8 = arith.maximumf %6, %7 : vector<16x24x4xf32>
    %9 = vector.extract_strided_slice %1 {offsets = [0, 4, 0], sizes = [16, 24, 4], strides = [1, 1, 1]} : vector<16x28x4xf32> to vector<16x24x4xf32>
    %10 = arith.maximumf %8, %9 : vector<16x24x4xf32>
    %cst = arith.constant 0xFF800000 : f32
    %11 = vector.broadcast %cst : f32 to vector<2x24x4xf32>
    %12 = tpu.concatenate %11, %10, %11 in 0 : vector<2x24x4xf32>, vector<16x24x4xf32>, vector<2x24x4xf32> -> vector<20x24x4xf32>
    %13 = vector.extract_strided_slice %12 {offsets = [0, 0, 0], sizes = [16, 24, 4], strides = [1, 1, 1]} : vector<20x24x4xf32> to vector<16x24x4xf32>
    %14 = arith.maximumf %10, %13 : vector<16x24x4xf32>
    %15 = vector.extract_strided_slice %12 {offsets = [1, 0, 0], sizes = [16, 24, 4], strides = [1, 1, 1]} : vector<20x24x4xf32> to vector<16x24x4xf32>
    %16 = arith.maximumf %14, %15 : vector<16x24x4xf32>
    %17 = vector.extract_strided_slice %12 {offsets = [3, 0, 0], sizes = [16, 24, 4], strides = [1, 1, 1]} : vector<20x24x4xf32> to vector<16x24x4xf32>
    %18 = arith.maximumf %16, %17 : vector<16x24x4xf32>
    %19 = vector.extract_strided_slice %12 {offsets = [4, 0, 0], sizes = [16, 24, 4], strides = [1, 1, 1]} : vector<20x24x4xf32> to vector<16x24x4xf32>
    %20 = arith.maximumf %18, %19 : vector<16x24x4xf32>
    %21 = vector.extract_strided_slice %20 {offsets = [0, 0, 0], sizes = [16, 20, 4], strides = [1, 1, 1]} : vector<16x24x4xf32> to vector<16x20x4xf32>
    %22 = vector.extract_strided_slice %20 {offsets = [0, 1, 0], sizes = [16, 20, 4], strides = [1, 1, 1]} : vector<16x24x4xf32> to vector<16x20x4xf32>
    %23 = arith.maximumf %21, %22 : vector<16x20x4xf32>
    %24 = vector.extract_strided_slice %20 {offsets = [0, 2, 0], sizes = [16, 20, 4], strides = [1, 1, 1]} : vector<16x24x4xf32> to vector<16x20x4xf32>
    %25 = arith.maximumf %23, %24 : vector<16x20x4xf32>
    %26 = vector.extract_strided_slice %20 {offsets = [0, 3, 0], sizes = [16, 20, 4], strides = [1, 1, 1]} : vector<16x24x4xf32> to vector<16x20x4xf32>
    %27 = arith.maximumf %25, %26 : vector<16x20x4xf32>
    %28 = vector.extract_strided_slice %20 {offsets = [0, 4, 0], sizes = [16, 20, 4], strides = [1, 1, 1]} : vector<16x24x4xf32> to vector<16x20x4xf32>
    %29 = arith.maximumf %27, %28 : vector<16x20x4xf32>
    %cst_3 = arith.constant 0xFF800000 : f32
    %30 = vector.broadcast %cst_3 : f32 to vector<2x20x4xf32>
    %31 = tpu.concatenate %30, %29, %30 in 0 : vector<2x20x4xf32>, vector<16x20x4xf32>, vector<2x20x4xf32> -> vector<20x20x4xf32>
    %32 = vector.extract_strided_slice %31 {offsets = [0, 0, 0], sizes = [16, 20, 4], strides = [1, 1, 1]} : vector<20x20x4xf32> to vector<16x20x4xf32>
    %33 = arith.maximumf %29, %32 : vector<16x20x4xf32>
    %34 = vector.extract_strided_slice %31 {offsets = [1, 0, 0], sizes = [16, 20, 4], strides = [1, 1, 1]} : vector<20x20x4xf32> to vector<16x20x4xf32>
    %35 = arith.maximumf %33, %34 : vector<16x20x4xf32>
    %36 = vector.extract_strided_slice %31 {offsets = [3, 0, 0], sizes = [16, 20, 4], strides = [1, 1, 1]} : vector<20x20x4xf32> to vector<16x20x4xf32>
    %37 = arith.maximumf %35, %36 : vector<16x20x4xf32>
    %38 = vector.extract_strided_slice %31 {offsets = [4, 0, 0], sizes = [16, 20, 4], strides = [1, 1, 1]} : vector<20x20x4xf32> to vector<16x20x4xf32>
    %39 = arith.maximumf %37, %38 : vector<16x20x4xf32>
    %40 = vector.extract_strided_slice %39 {offsets = [0, 0, 0], sizes = [16, 16, 4], strides = [1, 1, 1]} : vector<16x20x4xf32> to vector<16x16x4xf32>
    %41 = vector.extract_strided_slice %39 {offsets = [0, 1, 0], sizes = [16, 16, 4], strides = [1, 1, 1]} : vector<16x20x4xf32> to vector<16x16x4xf32>
    %42 = arith.maximumf %40, %41 : vector<16x16x4xf32>
    %43 = vector.extract_strided_slice %39 {offsets = [0, 2, 0], sizes = [16, 16, 4], strides = [1, 1, 1]} : vector<16x20x4xf32> to vector<16x16x4xf32>
    %44 = arith.maximumf %42, %43 : vector<16x16x4xf32>
    %45 = vector.extract_strided_slice %39 {offsets = [0, 3, 0], sizes = [16, 16, 4], strides = [1, 1, 1]} : vector<16x20x4xf32> to vector<16x16x4xf32>
    %46 = arith.maximumf %44, %45 : vector<16x16x4xf32>
    %47 = vector.extract_strided_slice %39 {offsets = [0, 4, 0], sizes = [16, 16, 4], strides = [1, 1, 1]} : vector<16x20x4xf32> to vector<16x16x4xf32>
    %48 = arith.maximumf %46, %47 : vector<16x16x4xf32>
    %cst_4 = arith.constant 0xFF800000 : f32
    %49 = vector.broadcast %cst_4 : f32 to vector<2x16x4xf32>
    %50 = tpu.concatenate %49, %48, %49 in 0 : vector<2x16x4xf32>, vector<16x16x4xf32>, vector<2x16x4xf32> -> vector<20x16x4xf32>
    %51 = vector.extract_strided_slice %50 {offsets = [0, 0, 0], sizes = [16, 16, 4], strides = [1, 1, 1]} : vector<20x16x4xf32> to vector<16x16x4xf32>
    %52 = arith.maximumf %48, %51 : vector<16x16x4xf32>
    %53 = vector.extract_strided_slice %50 {offsets = [1, 0, 0], sizes = [16, 16, 4], strides = [1, 1, 1]} : vector<20x16x4xf32> to vector<16x16x4xf32>
    %54 = arith.maximumf %52, %53 : vector<16x16x4xf32>
    %55 = vector.extract_strided_slice %50 {offsets = [3, 0, 0], sizes = [16, 16, 4], strides = [1, 1, 1]} : vector<20x16x4xf32> to vector<16x16x4xf32>
    %56 = arith.maximumf %54, %55 : vector<16x16x4xf32>
    %57 = vector.extract_strided_slice %50 {offsets = [4, 0, 0], sizes = [16, 16, 4], strides = [1, 1, 1]} : vector<20x16x4xf32> to vector<16x16x4xf32>
    %58 = arith.maximumf %56, %57 : vector<16x16x4xf32>
    %c0_5 = arith.constant 0 : index
    %c0_6 = arith.constant 0 : index
    %c0_7 = arith.constant 0 : index
    %c0_8 = arith.constant 0 : index
    %c0_9 = arith.constant 0 : index
    %59 = vector.load %arg3[%c0_5, %c0_6, %c0_7, %c0_8, %c0_9] : memref<1x4x16x16x4xf32, #tpu.memory_space<vmem>>, vector<1x1x16x16x4xf32>
    %60 = vector.shape_cast %59 : vector<1x1x16x16x4xf32> to vector<16x16x4xf32>
    %61 = vector.shape_cast %58 : vector<16x16x4xf32> to vector<1x1x16x16x4xf32>
    tpu.vector_store %arg3[%c0_5, %c0_6, %c0_7, %c0_8, %c0_9], %61 {strides = array<i32>} : memref<1x4x16x16x4xf32, #tpu.memory_space<vmem>>, vector<1x1x16x16x4xf32>,
    %62 = vector.extract_strided_slice %39 {offsets = [0, 2, 0], sizes = [16, 16, 4], strides = [1, 1, 1]} : vector<16x20x4xf32> to vector<16x16x4xf32>
    %c0_10 = arith.constant 0 : index
    %c1 = arith.constant 1 : index
    %c0_11 = arith.constant 0 : index
    %c0_12 = arith.constant 0 : index
    %c0_13 = arith.constant 0 : index
    %63 = vector.load %arg3[%c0_10, %c1, %c0_11, %c0_12, %c0_13] : memref<1x4x16x16x4xf32, #tpu.memory_space<vmem>>, vector<1x1x16x16x4xf32>
    %64 = vector.shape_cast %63 : vector<1x1x16x16x4xf32> to vector<16x16x4xf32>
    %65 = vector.shape_cast %62 : vector<16x16x4xf32> to vector<1x1x16x16x4xf32>
    tpu.vector_store %arg3[%c0_10, %c1, %c0_11, %c0_12, %c0_13], %65 {strides = array<i32>} : memref<1x4x16x16x4xf32, #tpu.memory_space<vmem>>, vector<1x1x16x16x4xf32>,
    %66 = vector.extract_strided_slice %20 {offsets = [0, 4, 0], sizes = [16, 16, 4], strides = [1, 1, 1]} : vector<16x24x4xf32> to vector<16x16x4xf32>
    %c0_14 = arith.constant 0 : index
    %c2 = arith.constant 2 : index
    %c0_15 = arith.constant 0 : index
    %c0_16 = arith.constant 0 : index
    %c0_17 = arith.constant 0 : index
    %67 = vector.load %arg3[%c0_14, %c2, %c0_15, %c0_16, %c0_17] : memref<1x4x16x16x4xf32, #tpu.memory_space<vmem>>, vector<1x1x16x16x4xf32>
    %68 = vector.shape_cast %67 : vector<1x1x16x16x4xf32> to vector<16x16x4xf32>
    %69 = vector.shape_cast %66 : vector<16x16x4xf32> to vector<1x1x16x16x4xf32>
    tpu.vector_store %arg3[%c0_14, %c2, %c0_15, %c0_16, %c0_17], %69 {strides = array<i32>} : memref<1x4x16x16x4xf32, #tpu.memory_space<vmem>>, vector<1x1x16x16x4xf32>,
    %c0_18 = arith.constant 0 : index
    %c0_19 = arith.constant 0 : index
    %c6 = arith.constant 6 : index
    %c0_20 = arith.constant 0 : index
    %70 = vector.load %arg2[%c0_18, %c0_19, %c6, %c0_20] : memref<1x16x28x4xf32, #tpu.memory_space<vmem>>, vector<1x16x16x4xf32>
    %71 = vector.shape_cast %70 : vector<1x16x16x4xf32> to vector<16x16x4xf32>
    %c0_21 = arith.constant 0 : index
    %c3 = arith.constant 3 : index
    %c0_22 = arith.constant 0 : index
    %c0_23 = arith.constant 0 : index
    %c0_24 = arith.constant 0 : index
    %72 = vector.load %arg3[%c0_21, %c3, %c0_22, %c0_23, %c0_24] : memref<1x4x16x16x4xf32, #tpu.memory_space<vmem>>, vector<1x1x16x16x4xf32>
    %73 = vector.shape_cast %72 : vector<1x1x16x16x4xf32> to vector<16x16x4xf32>
    %74 = vector.shape_cast %71 : vector<16x16x4xf32> to vector<1x1x16x16x4xf32>
    tpu.vector_store %arg3[%c0_21, %c3, %c0_22, %c0_23, %c0_24], %74 {strides = array<i32>} : memref<1x4x16x16x4xf32, #tpu.memory_space<vmem>>, vector<1x1x16x16x4xf32>,
    return
  }
  func.func @transform_0(%arg0: i32, %arg1: i32) -> (i32, i32, i32, i32) {
    %c0_i32 = arith.constant 0 : i32
    %c0_i32_0 = arith.constant 0 : i32
    %c0_i32_1 = arith.constant 0 : i32
    return %arg0, %c0_i32, %c0_i32_0, %arg1 : i32, i32, i32, i32
  }
  func.func @transform_1(%arg0: i32, %arg1: i32) -> (i32, i32, i32, i32, i32) {
    %c0_i32 = arith.constant 0 : i32
    %c0_i32_0 = arith.constant 0 : i32
    %c0_i32_1 = arith.constant 0 : i32
    %c0_i32_2 = arith.constant 0 : i32
    return %arg0, %c0_i32, %c0_i32_0, %c0_i32_1, %arg1 : i32, i32, i32, i32, i32
  }
}

</mosaic_0001>

<bundles_post_ra>
// kernel: spatial_pyramid_pooling.1
= control target key start
LH: loop header
LB: loop body
LE: loop exit
PB: predicated region body
PF: predicated region fallthrough
CT: control target
= control target key end

     0   :  { %s3418_s6 = smov 0   ;;  %s3420_s7 = smov 0   ;;  %s6779_s0 = inlined_call_operand.vmem [shape: f32[2,16,28,4], index: 0, kind: input, shape index: {}]   ;;  %s6780_s1 = inlined_call_operand.vmem [shape: f32[2,4,16,16,4], index: 1, kind: output, shape index: {}]  }
   0x1   :  { %s3422_s8 = smov 0  }
   0x2 LB: > { %s23_s9 = sadd.s32 1, %s3402_s7  ;;  %p3223_p0 = scmp.ge.s32.totalorder %s3406_s8, 1  ;;  %s3406_s8 = sphi %s3422_s8, %s11_s8   ;;  %s3402_s7 = sphi %s3420_s7, %s7298_s7   ;;  %s3398_s6 = sphi %s3418_s6, %s7297_s6  }
   0x3   : > { %p25_p1 = scmp.ge.s32.totalorder %s23_s9, 2  ;;  %p106_p2 = scmp.lt.s32.totalorder %s3406_s8, 3 }
   0x5   : > { %s7300_s9 = smov (%p25_p1, %s23_s9), 0  ;;  %p107_p3 = pnand %p3223_p0, %p106_p2 }
   0x7   : > { %110 = sbr.rel (%p107_p3) target bundleno = 611 (0x263), region = 24 }
   0xc   : > { %p132_p4 = scmp.lt.s32.totalorder %s3398_s6, 1  ;;  %vm276_vm0 = vcmask 1046528   ;;  %vm485_vm1 = vcmask 1045504   ;;  %vm694_vm2 = vcmask 1044480   ;;  %vm903_vm3 = vcmask 1043456  }
   0xd   : > { %vm2936_vm4 = vcmask 31744   ;;  %vm2970_vm5 = vcmask 31746   ;;  %vm2973_vm6 = vcmask 25600   ;;  %vm3021_vm7 = vcmask 31748  }
   0xe   : > { %s7302_s6 = smov (!%p132_p4, %s3398_s6), 1  ;;  %vm3024_vm8 = vcmask 27648  }
   0xf   : > { %s3358_s10 = sshll.u32 %s7302_s6, 9  ;;  %s3359_s14 = sshll.u32 %s7302_s6, 10 }
  0x10   : > { %s3442_s13 = scalar_lea.vmem %s6779_s0, %s3358_s10  ;;  %s4339_s17 = scalar_lea.vmem %s6780_s1, %s3359_s14 }
  0x11   : > { %v3445_v0 = vld [vmem:[%s3442_s13] sm:$0xff]  ;;  %v3448_v1 = vld [vmem:[%s3442_s13 + $0x8] sm:$0xff]  ;;  %v3451_v2 = vld [vmem:[%s3442_s13 + $0x10] sm:$0xff] }
  0x12   : > { %v3454_v3 = vld [vmem:[%s3442_s13 + $0x18] sm:$0xf]  ;;  %v3457_v4 = vld [vmem:[%s3442_s13 + $0x20] sm:$0xff]  ;;  %v3460_v5 = vld [vmem:[%s3442_s13 + $0x28] sm:$0xff]  ;;  %v277_v6 = vrot.slane %v3445_v0, 1  ;;  %v278_v7 = vrot.slane %v3448_v1, 1 }
  0x13   : > { %6966 = vst [vmem:[#allocation2_spill] sm:$0xff] %v3454_v3  ;;  %v3465_v8 = vld [vmem:[%s3442_s13 + $0x30] sm:$0xff]  ;;  %v3468_v9 = vld [vmem:[%s3442_s13 + $0x38] sm:$0xf]  ;;  %v3471_v10 = vld [vmem:[%s3442_s13 + $0x40] sm:$0xff]  ;;  %v280_v11 = vrot.slane %v3451_v2, 1 }
  0x14   : > { %6967 = vst [vmem:[#allocation3_spill] sm:$0xff] %v3468_v9  ;;  %v282_v12 = vrot.slane %v3454_v3, 1  ;;  %v3476_v13 = vld [vmem:[%s3442_s13 + $0x48] sm:$0xff]  ;;  %v3479_v14 = vld [vmem:[%s3442_s13 + $0x50] sm:$0xff]  ;;  %v3482_v15 = vld [vmem:[%s3442_s13 + $0x58] sm:$0xf]  ;;  %v3485_v16 = vsel %vm276_vm0, %v277_v6, %v278_v7 }
  0x15   : > { %6968 = vst [vmem:[#allocation4_spill] sm:$0xff] %v3479_v14  ;;  %v284_v17 = vrot.slane %v3457_v4, 1  ;;  %v285_v18 = vrot.slane %v3460_v5, 1  ;;  %v3490_v19 = vld [vmem:[%s3442_s13 + $0x60] sm:$0xff]  ;;  %v3493_v20 = vld [vmem:[%s3442_s13 + $0x68] sm:$0xff]  ;;  %v3496_v21 = vsel %vm276_vm0, %v278_v7, %v280_v11  ;;  %v287_v23 = vrot.slane %v3465_v8, 1 }
  0x16   : > { %6969 = vst [vmem:[#allocation5_spill] sm:$0xff] %v3482_v15  ;;  %v3499_v22 = vsel %vm276_vm0, %v280_v11, %v282_v12  ;;  %v289_v24 = vrot.slane %v3468_v9, 1  ;;  %v3504_v25 = vld [vmem:[%s3442_s13 + $0x70] sm:$0xff]  ;;  %v3507_v26 = vld [vmem:[%s3442_s13 + $0x78] sm:$0xf]  ;;  %v291_v28 = vrot.slane %v3471_v10, 1 }
  0x17   : > { %6970 = vst [vmem:[#allocation6_spill] sm:$0xff] %v3490_v19  ;;  %v3510_v27 = vsel %vm276_vm0, %v284_v17, %v285_v18  ;;  %v292_v29 = vrot.slane %v3476_v13, 1  ;;  %v3517_v31 = vld [vmem:[%s3442_s13 + $0x80] sm:$0xff]  ;;  %v3520_v32 = vld [vmem:[%s3442_s13 + $0x88] sm:$0xff]  ;;  %v3523_v33 = vld [vmem:[%s3442_s13 + $0x90] sm:$0xff]  ;;  %v3526_v34 = vsel %vm276_vm0, %v285_v18, %v287_v23  ;;  %v294_v36 = vrot.slane %v3479_v14, 1 }
  0x18   : > { %6971 = vst [vmem:[#allocation7_spill] sm:$0xff] %v3493_v20  ;;  %v3529_v35 = vsel %vm276_vm0, %v287_v23, %v289_v24  ;;  %v296_v37 = vrot.slane %v3482_v15, 1  ;;  %v3534_v38 = vld [vmem:[%s3442_s13 + $0x98] sm:$0xf]  ;;  %v3537_v39 = vld [vmem:[%s3442_s13 + $0xa0] sm:$0xff]  ;;  %v298_v41 = vrot.slane %v3490_v19, 1 }
  0x19   : > { %6972 = vst [vmem:[#allocation8_spill] sm:$0xff] %v3504_v25  ;;  %v3540_v40 = vsel %vm276_vm0, %v291_v28, %v292_v29  ;;  %v299_v42 = vrot.slane %v3493_v20, 1  ;;  %v3547_v44 = vld [vmem:[%s3442_s13 + $0xa8] sm:$0xff]  ;;  %v3550_v45 = vld [vmem:[%s3442_s13 + $0xb0] sm:$0xff]  ;;  %v3553_v46 = vld [vmem:[%s3442_s13 + $0xb8] sm:$0xf]  ;;  %v3556_v47 = vsel %vm276_vm0, %v292_v29, %v294_v36 }
  0x1a   : > { %6973 = vst [vmem:[#allocation9_spill] sm:$0xff] %v3507_v26  ;;  %v3559_v48 = vsel %vm276_vm0, %v294_v36, %v296_v37  ;;  %v301_v49 = vrot.slane %v3504_v25, 1  ;;  %v303_v50 = vrot.slane %v3507_v26, 1  ;;  %v3564_v51 = vld [vmem:[%s3442_s13 + $0xc0] sm:$0xff]  ;;  %v3567_v52 = vld [vmem:[%s3442_s13 + $0xc8] sm:$0xff]  ;;  %v305_v54 = vrot.slane %v3517_v31, 1 }
  0x1b   : > { %6974 = vst [vmem:[#allocation10_spill] sm:$0xff] %v3517_v31  ;;  %v3570_v53 = vsel %vm276_vm0, %v298_v41, %v299_v42  ;;  %v306_v55 = vrot.slane %v3520_v32, 1  ;;  %v308_v56 = vrot.slane %v3523_v33, 1  ;;  %v3576_v57 = vld [vmem:[%s3442_s13 + $0xd0] sm:$0xff]  ;;  %v3579_v58 = vld [vmem:[%s3442_s13 + $0xd8] sm:$0xf] }
  0x1c   : > { %6975 = vst [vmem:[#allocation11_spill] sm:$0xff] %v3520_v32  ;;  %v3582_v59 = vsel %vm276_vm0, %v299_v42, %v301_v49  ;;  %v3585_v60 = vsel %vm276_vm0, %v301_v49, %v303_v50  ;;  %v310_v61 = vrot.slane %v3534_v38, 1  ;;  %v312_v62 = vrot.slane %v3537_v39, 1 }
  0x1d   : > { %6976 = vst [vmem:[#allocation12_spill] sm:$0xff] %v3523_v33  ;;  %v3590_v63 = vsel %vm276_vm0, %v305_v54, %v306_v55  ;;  %v3593_v6 = vsel %vm276_vm0, %v306_v55, %v308_v56  ;;  %v313_v7 = vrot.slane %v3547_v44, 1  ;;  %v315_v11 = vrot.slane %v3550_v45, 1 }
  0x1e   : > { %6977 = vst [vmem:[#allocation13_spill] sm:$0xff] %v3534_v38  ;;  %v3598_v12 = vsel %vm276_vm0, %v308_v56, %v310_v61  ;;  %v317_v17 = vrot.slane %v3553_v46, 1  ;;  %v319_v18 = vrot.slane %v3564_v51, 1  ;;  %v320_v23 = vrot.slane %v3567_v52, 1 }
  0x1f   : > { %6978 = vst [vmem:[#allocation14_spill] sm:$0xff] %v3537_v39  ;;  %v3604_v24 = vsel %vm276_vm0, %v312_v62, %v313_v7  ;;  %v3607_v28 = vsel %vm276_vm0, %v313_v7, %v315_v11  ;;  %v322_v29 = vrot.slane %v3576_v57, 1  ;;  %v324_v36 = vrot.slane %v3579_v58, 1 }
  0x20   : > { %6979 = vst [vmem:[#allocation15_spill] sm:$0xff] %v3547_v44  ;;  %v3612_v37 = vsel %vm276_vm0, %v315_v11, %v317_v17  ;;  %v3615_v41 = vsel %vm276_vm0, %v319_v18, %v320_v23  ;;  %v487_v62 = vrot.slane %v3448_v1, 2  ;;  %v489_v7 = vrot.slane %v3451_v2, 2 }
  0x21   : > { %6980 = vst [vmem:[#allocation16_spill] sm:$0xff] %v3550_v45  ;;  %v3622_v50 = vsel %vm276_vm0, %v320_v23, %v322_v29  ;;  %v3625_v54 = vsel %vm276_vm0, %v322_v29, %v324_v36  ;;  %v486_v36 = vrot.slane %v3445_v0, 2  ;;  %v491_v11 = vrot.slane %v3454_v3, 2 }
  0x22   : > { %6981 = vst [vmem:[#allocation17_spill] sm:$0xff] %v3553_v46  ;;  %v493_v61 = vrot.slane %v3457_v4, 2  ;;  %v494_v17 = vrot.slane %v3460_v5, 2  ;;  %v496_v18 = vrot.slane %v3465_v8, 2  ;;  %v498_v56 = vrot.slane %v3468_v9, 2 }
  0x23   : > { %6982 = vst [vmem:[#allocation18_spill] sm:$0xff] %v3567_v52  ;;  %v500_v23 = vrot.slane %v3471_v10, 2  ;;  %v488_v29 = vsel %vm485_vm1, %v486_v36, %v487_v62  ;;  %v490_v55 = vsel %vm485_vm1, %v487_v62, %v489_v7  ;;  %v492_v49 = vsel %vm485_vm1, %v489_v7, %v491_v11 }
  0x24   : > { %6983 = vst [vmem:[#allocation19_spill] sm:$0xff] %v3579_v58  ;;  %v501_v42 = vrot.slane %v3476_v13, 2  ;;  %v495_v43 = vsel %vm485_vm1, %v493_v61, %v494_v17  ;;  %v497_v30 = vsel %vm485_vm1, %v494_v17, %v496_v18  ;;  %v499_v3 = vsel %vm485_vm1, %v496_v18, %v498_v56 }
  0x25   : > { %6984 = vst [vmem:[#allocation20_spill] sm:$0xff] %v3598_v12  ;;  %v507_v36 = vrot.slane %v3490_v19, 2  ;;  %v508_v62 = vrot.slane %v3493_v20, 2  ;;  %v510_v11 = vrot.slane %v3504_v25, 2  ;;  %v512_v61 = vrot.slane %v3507_v26, 2 }
  0x26   : > { %6985 = vst [vmem:[#allocation21_spill] sm:$0xff] %v3604_v24  ;;  %v502_v9 = vsel %vm485_vm1, %v500_v23, %v501_v42  ;;  %v514_v17 = vrot.slane %v3517_v31, 2  ;;  %v515_v23 = vrot.slane %v3520_v32, 2  ;;  %v526_v12 = vrot.slane %v3553_v46, 2 }
  0x27   : > { %6986 = vst [vmem:[#allocation22_spill] sm:$0xff] %v3607_v28  ;;  %v509_v18 = vsel %vm485_vm1, %v507_v36, %v508_v62  ;;  %v521_v28 = vrot.slane %v3537_v39, 2  ;;  %v6992_v46 = vmax.f32 %v3448_v1, %v3496_v21 }
  0x28   : > { %6987 = vst [vmem:[#allocation23_spill] sm:$0xff] %v3612_v37  ;;  %v513_v37 = vsel %vm485_vm1, %v510_v11, %v512_v61  ;;  %v516_v26 = vsel %vm485_vm1, %v514_v17, %v515_v23  ;;  %v531_v17 = vrot.slane %v3576_v57, 2 }
  0x29   : > { %6988 = vst [vmem:[#allocation24_spill] sm:$0xff] %v3615_v41  ;;  %v511_v41 = vsel %vm485_vm1, %v508_v62, %v510_v11  ;;  %v528_v62 = vrot.slane %v3564_v51, 2  ;;  %v529_v11 = vrot.slane %v3567_v52, 2  ;;  %v3716_v52 = vmax.f32 %v6992_v46, %v490_v55 }
  0x2a   : > { %6989 = vst [vmem:[#allocation25_spill] sm:$0xff] %v3622_v50  ;;  %v505_v50 = vrot.slane %v3482_v15, 2  ;;  %v517_v15 = vrot.slane %v3523_v33, 2  ;;  %v6996_v46 = vmax.f32 %v3465_v8, %v3529_v35  ;;  %v7000_v35 = vmax.f32 %v3490_v19, %v3570_v53 }
  0x2b   : > { %6990 = vst [vmem:[#allocation26_spill] sm:$0xff] %v3625_v54  ;;  %v503_v54 = vrot.slane %v3479_v14, 2  ;;  %v7004_v53 = vmax.f32 %v3520_v32, %v3593_v6 }
  0x2c   : > { %v518_v24 = vsel %vm485_vm1, %v515_v23, %v517_v15  ;;  %v533_v23 = vrot.slane %v3579_v58, 2  ;;  %v6993_v58 = vmax.f32 %v3451_v2, %v3499_v22  ;;  %v3738_v55 = vmax.f32 %v6996_v46, %v499_v3  ;;  %v7021_v46 = vld [vmem:[#allocation18_spill] sm:$0xff] }
  0x2d   : > { %v504_v7 = vsel %vm485_vm1, %v501_v42, %v503_v54  ;;  %v506_v56 = vsel %vm485_vm1, %v503_v54, %v505_v50  ;;  %v519_v42 = vrot.slane %v3534_v38, 2  ;;  %v522_v50 = vrot.slane %v3547_v44, 2 }
  0x2e   : > { %v524_v54 = vrot.slane %v3550_v45, 2  ;;  %v530_v45 = vsel %vm485_vm1, %v528_v62, %v529_v11  ;;  %v6997_v22 = vmax.f32 %v3471_v10, %v3540_v40  ;;  %v3758_v3 = vmax.f32 %v7000_v35, %v509_v18  ;;  %v7005_v18 = vld [vmem:[#allocation20_spill] sm:$0xff]  ;;  %v7007_v62 = vld [vmem:[#allocation21_spill] sm:$0xff] }
  0x2f   : > { %v520_v36 = vsel %vm485_vm1, %v517_v15, %v519_v42  ;;  %v523_v61 = vsel %vm485_vm1, %v521_v28, %v522_v50  ;;  %v6991_v15 = vmax.f32 %v3445_v0, %v3485_v16  ;;  %v532_v28 = vsel %vm485_vm1, %v529_v11, %v531_v17  ;;  %v7010_v11 = vld [vmem:[#allocation15_spill] sm:$0xff] }
  0x30   : > { %v525_v38 = vsel %vm485_vm1, %v522_v50, %v524_v54  ;;  %v527_v44 = vsel %vm485_vm1, %v524_v54, %v526_v12  ;;  %v534_v50 = vsel %vm485_vm1, %v531_v17, %v533_v23  ;;  %v3723_v12 = vmax.f32 %v6993_v58, %v492_v49  ;;  %v7011_v17 = vld [vmem:[#allocation22_spill] sm:$0xff]  ;;  %v7014_v23 = vld [vmem:[#allocation16_spill] sm:$0xff] }
  0x31   : > { %v3711_v42 = vmax.f32 %v6991_v15, %v488_v29  ;;  %v6994_v54 = vmax.f32 %v3457_v4, %v3510_v27  ;;  %v6995_v29 = vmax.f32 %v3460_v5, %v3526_v34  ;;  %v3743_v58 = vmax.f32 %v6997_v22, %v502_v9  ;;  %v7015_v15 = vld [vmem:[#allocation23_spill] sm:$0xff]  ;;  %v7022_v22 = vld [vmem:[#allocation25_spill] sm:$0xff] }
  0x32   : > { %v6998_v27 = vmax.f32 %v3476_v13, %v3556_v47  ;;  %v6999_v34 = vmax.f32 %v3479_v14, %v3559_v48  ;;  %v7001_v40 = vmax.f32 %v3493_v20, %v3582_v59  ;;  %v7002_v47 = vmax.f32 %v3504_v25, %v3585_v60 }
  0x33   : > { %v3728_v16 = vmax.f32 %v6994_v54, %v495_v43  ;;  %v3733_v21 = vmax.f32 %v6995_v29, %v497_v30  ;;  %v7003_v48 = vmax.f32 %v3517_v31, %v3590_v63  ;;  %v7006_v59 = vmax.f32 %v3523_v33, %v7005_v18  ;;  %v7018_v54 = vld [vmem:[#allocation24_spill] sm:$0xff] }
  0x34   : > { %v3748_v43 = vmax.f32 %v6998_v27, %v504_v7  ;;  %v3753_v30 = vmax.f32 %v6999_v34, %v506_v56  ;;  %v3763_v9 = vmax.f32 %v7001_v40, %v511_v41  ;;  %v3768_v49 = vmax.f32 %v7002_v47, %v513_v37  ;;  %v7025_v34 = vld [vmem:[#allocation26_spill] sm:$0xff] }
  0x35   : > { %v3773_v7 = vmax.f32 %v7003_v48, %v516_v26  ;;  %v3778_v56 = vmax.f32 %v7004_v53, %v518_v24  ;;  %v3783_v41 = vmax.f32 %v7006_v59, %v520_v36  ;;  %v7008_v60 = vmax.f32 %v3537_v39, %v7007_v62  ;;  %v7028_v48 = vld [vmem:[#allocation2_spill] sm:$0xff] }
  0x36   : > { %v7012_v63 = vmax.f32 %v7010_v11, %v7011_v17  ;;  %v7016_v6 = vmax.f32 %v7014_v23, %v7015_v15  ;;  %v7019_v29 = vmax.f32 %v3564_v51, %v7018_v54  ;;  %v7023_v27 = vmax.f32 %v7021_v46, %v7022_v22 }
  0x37   : > { %v3788_v37 = vmax.f32 %v7008_v60, %v523_v61  ;;  %v7026_v35 = vmax.f32 %v3576_v57, %v7025_v34  ;;  %v695_v40 = vrot.slane %v3445_v0, 3  ;;  %v698_v47 = vrot.slane %v3451_v2, 3 }
  0x38   : > { %v3793_v26 = vmax.f32 %v7012_v63, %v525_v38  ;;  %v3798_v24 = vmax.f32 %v7016_v6, %v527_v44  ;;  %v3803_v36 = vmax.f32 %v7019_v29, %v530_v45  ;;  %v3808_v61 = vmax.f32 %v7023_v27, %v532_v28  ;;  %v7030_v27 = vld [vmem:[#allocation5_spill] sm:$0xff] }
  0x39   : > { %7009 = vst [vmem:[#allocation20_spill] sm:$0xff] %v3788_v37  ;;  %v3813_v38 = vmax.f32 %v7026_v35, %v534_v50  ;;  %v696_v44 = vrot.slane %v3448_v1, 3  ;;  %v700_v45 = vrot.slane %v7028_v48, 3  ;;  %v702_v53 = vrot.slane %v3457_v4, 3  ;;  %v7029_v50 = vld [vmem:[#allocation3_spill] sm:$0xff]  ;;  %v7053_v37 = vld [vmem:[#allocation17_spill] sm:$0xff] }
  0x3a   : > { %7013 = vst [vmem:[#allocation21_spill] sm:$0xff] %v3793_v26  ;;  %v703_v18 = vrot.slane %v3460_v5, 3  ;;  %v705_v59 = vrot.slane %v3465_v8, 3  ;;  %v707_v62 = vrot.slane %v7029_v50, 3  ;;  %v709_v60 = vrot.slane %v3471_v10, 3  ;;  %v7050_v26 = vld [vmem:[#allocation14_spill] sm:$0xff] }
  0x3b   : > { %7017 = vst [vmem:[#allocation22_spill] sm:$0xff] %v3798_v24  ;;  %v3822_v28 = vsel %vm694_vm2, %v695_v40, %v696_v44  ;;  %v3828_v17 = vsel %vm694_vm2, %v696_v44, %v698_v47  ;;  %v3831_v63 = vsel %vm694_vm2, %v698_v47, %v700_v45  ;;  %v710_v6 = vrot.slane %v3476_v13, 3  ;;  %v7047_v24 = vld [vmem:[#allocation10_spill] sm:$0xff] }
  0x3c   : > { %7020 = vst [vmem:[#allocation23_spill] sm:$0xff] %v3803_v36  ;;  %v3834_v15 = vsel %vm694_vm2, %v702_v53, %v703_v18  ;;  %v3838_v54 = vsel %vm694_vm2, %v703_v18, %v705_v59  ;;  %v3841_v29 = vsel %vm694_vm2, %v705_v59, %v707_v62  ;;  %v712_v22 = vrot.slane %v3479_v14, 3  ;;  %v7031_v18 = vld [vmem:[#allocation9_spill] sm:$0xff]  ;;  %v7045_v36 = vld [vmem:[#allocation8_spill] sm:$0xff] }
  0x3d   : > { %7024 = vst [vmem:[#allocation24_spill] sm:$0xff] %v3808_v61  ;;  %v714_v34 = vrot.slane %v7030_v27, 3  ;;  %v3846_v35 = vsel %vm694_vm2, %v709_v60, %v710_v6  ;;  %v716_v40 = vrot.slane %v3490_v19, 3  ;;  %v717_v44 = vrot.slane %v3493_v20, 3  ;;  %v7032_v19 = vld [vmem:[#allocation13_spill] sm:$0xff]  ;;  %v7043_v61 = vld [vmem:[#allocation6_spill] sm:$0xff] }
  0x3e   : > { %7027 = vst [vmem:[#allocation25_spill] sm:$0xff] %v3813_v38  ;;  %v719_v47 = vrot.slane %v3504_v25, 3  ;;  %v3852_v45 = vsel %vm694_vm2, %v710_v6, %v712_v22  ;;  %v721_v59 = vrot.slane %v7031_v18, 3  ;;  %v723_v62 = vrot.slane %v3517_v31, 3  ;;  %v7042_v38 = vld [vmem:[#allocation5_spill] sm:$0xff] }
  0x3f   : > { %v3855_v53 = vsel %vm694_vm2, %v712_v22, %v714_v34  ;;  %v3860_v27 = vsel %vm694_vm2, %v716_v40, %v717_v44  ;;  %v724_v20 = vrot.slane %v3520_v32, 3  ;;  %v726_v25 = vrot.slane %v3523_v33, 3  ;;  %v7033_v32 = vld [vmem:[#allocation17_spill] sm:$0xff] }
  0x40   : > { %v3863_v60 = vsel %vm694_vm2, %v717_v44, %v719_v47  ;;  %v3868_v6 = vsel %vm694_vm2, %v719_v47, %v721_v59  ;;  %v728_v22 = vrot.slane %v7032_v19, 3  ;;  %v730_v34 = vrot.slane %v3537_v39, 3  ;;  %v7037_v39 = vld [vmem:[#allocation19_spill] sm:$0xff] }
  0x41   : > { %v731_v18 = vrot.slane %v7010_v11, 3  ;;  %v3874_v31 = vsel %vm694_vm2, %v723_v62, %v724_v20  ;;  %v3877_v40 = vsel %vm694_vm2, %v724_v20, %v726_v25  ;;  %v733_v44 = vrot.slane %v7014_v23, 3 }
  0x42   : > { %v735_v14 = vrot.slane %v7033_v32, 3  ;;  %v3882_v33 = vsel %vm694_vm2, %v726_v25, %v728_v22  ;;  %v737_v59 = vrot.slane %v3564_v51, 3  ;;  %v738_v11 = vrot.slane %v7021_v46, 3 }
  0x43   : > { %v3885_v47 = vsel %vm694_vm2, %v730_v34, %v731_v18  ;;  %v3890_v62 = vsel %vm694_vm2, %v731_v18, %v733_v44  ;;  %v740_v23 = vrot.slane %v3576_v57, 3  ;;  %v742_v32 = vrot.slane %v7037_v39, 3 }
  0x44   : > { %7034 = vst [vmem:[#allocation26_spill] sm:$0xff] %v3885_v47  ;;  %v3893_v20 = vsel %vm694_vm2, %v733_v44, %v735_v14  ;;  %v3898_v25 = vsel %vm694_vm2, %v737_v59, %v738_v11  ;;  %v904_v18 = vrot.slane %v3445_v0, 4  ;;  %v907_v44 = vrot.slane %v3451_v2, 4  ;;  %v7051_v47 = vld [vmem:[#allocation15_spill] sm:$0xff] }
  0x45   : > { %7035 = vst [vmem:[#allocation2_spill] sm:$0xff] %v3890_v62  ;;  %v3907_v46 = vsel %vm694_vm2, %v738_v11, %v740_v23  ;;  %v3910_v14 = vsel %vm694_vm2, %v740_v23, %v742_v32  ;;  %v905_v11 = vrot.slane %v3448_v1, 4  ;;  %v909_v32 = vrot.slane %v7028_v48, 4  ;;  %v7049_v62 = vld [vmem:[#allocation12_spill] sm:$0xff] }
  0x46   : > { %7036 = vst [vmem:[#allocation3_spill] sm:$0xff] %v3893_v20  ;;  %v911_v23 = vrot.slane %v3457_v4, 4  ;;  %v912_v20 = vrot.slane %v3460_v5, 4  ;;  %v914_v59 = vrot.slane %v3465_v8, 4  ;;  %v916_v34 = vrot.slane %v7029_v50, 4 }
  0x47   : > { %7038 = vst [vmem:[#allocation13_spill] sm:$0xff] %v3898_v25  ;;  %v906_v22 = vsel %vm903_vm3, %v904_v18, %v905_v11  ;;  %v918_v0 = vrot.slane %v3471_v10, 4  ;;  %v910_v1 = vsel %vm903_vm3, %v907_v44, %v909_v32  ;;  %v919_v4 = vrot.slane %v3476_v13, 4  ;;  %v7044_v25 = vld [vmem:[#allocation7_spill] sm:$0xff]  ;;  %v7046_v32 = vld [vmem:[#allocation9_spill] sm:$0xff] }
  0x48   : > { %7039 = vst [vmem:[#allocation19_spill] sm:$0xff] %v3907_v46  ;;  %v908_v46 = vsel %vm903_vm3, %v905_v11, %v907_v44  ;;  %v913_v2 = vsel %vm903_vm3, %v911_v23, %v912_v20  ;;  %v915_v48 = vsel %vm903_vm3, %v912_v20, %v914_v59  ;;  %v917_v5 = vsel %vm903_vm3, %v914_v59, %v916_v34  ;;  %v7048_v59 = vld [vmem:[#allocation11_spill] sm:$0xff] }
  0x49   : > { %7040 = vst [vmem:[#allocation27_spill] sm:$0xff] %v3910_v14  ;;  %v7041_v14 = vld [vmem:[#allocation4_spill] sm:$0xff]  ;;  %v923_v18 = vrot.slane %v7042_v38, 4  ;;  %v925_v11 = vrot.slane %v7043_v61, 4  ;;  %v920_v50 = vsel %vm903_vm3, %v918_v0, %v919_v4  ;;  %v926_v10 = vrot.slane %v7044_v25, 4 }
  0x4a   : > { %v921_v8 = vrot.slane %v7041_v14, 4  ;;  %v928_v44 = vrot.slane %v7045_v36, 4  ;;  %v930_v23 = vrot.slane %v7046_v32, 4  ;;  %v932_v34 = vrot.slane %v7047_v24, 4 }
  0x4b   : > { %v933_v14 = vrot.slane %v7048_v59, 4  ;;  %v927_v38 = vsel %vm903_vm3, %v925_v11, %v926_v10  ;;  %v935_v25 = vrot.slane %v7049_v62, 4  ;;  %v937_v32 = vrot.slane %v7032_v19, 4 }
  0x4c   : > { %v922_v20 = vsel %vm903_vm3, %v919_v4, %v921_v8  ;;  %v924_v13 = vsel %vm903_vm3, %v921_v8, %v923_v18  ;;  %v929_v61 = vsel %vm903_vm3, %v926_v10, %v928_v44  ;;  %v931_v0 = vsel %vm903_vm3, %v928_v44, %v930_v23  ;;  %v7052_v18 = vld [vmem:[#allocation16_spill] sm:$0xff]  ;;  %v7054_v23 = vld [vmem:[#allocation18_spill] sm:$0xff] }
  0x4d   : > { %v934_v36 = vsel %vm903_vm3, %v932_v34, %v933_v14  ;;  %v939_v4 = vrot.slane %v7050_v26, 4  ;;  %v940_v8 = vrot.slane %v7051_v47, 4  ;;  %v936_v24 = vsel %vm903_vm3, %v933_v14, %v935_v25 }
  0x4e   : > { %v942_v59 = vrot.slane %v7052_v18, 4  ;;  %v944_v11 = vrot.slane %v7053_v37, 4  ;;  %v946_v10 = vrot.slane %v3564_v51, 4  ;;  %v938_v44 = vsel %vm903_vm3, %v935_v25, %v937_v32 }
  0x4f   : > { %v941_v62 = vsel %vm903_vm3, %v939_v4, %v940_v8  ;;  %v947_v34 = vrot.slane %v7054_v23, 4  ;;  %v949_v19 = vrot.slane %v3576_v57, 4  ;;  %v951_v14 = vrot.slane %v7037_v39, 4 }
  0x50   : > { %v943_v26 = vsel %vm903_vm3, %v940_v8, %v942_v59  ;;  %v945_v47 = vsel %vm903_vm3, %v942_v59, %v944_v11  ;;  %v7055_v18 = vmax.f32 %v3711_v42, %v3822_v28  ;;  %v7056_v32 = vmax.f32 %v3716_v52, %v3828_v17 }
  0x51   : > { %v948_v51 = vsel %vm903_vm3, %v946_v10, %v947_v34  ;;  %v950_v25 = vsel %vm903_vm3, %v947_v34, %v949_v19  ;;  %v7057_v57 = vmax.f32 %v3723_v12, %v3831_v63  ;;  %v952_v59 = vsel %vm903_vm3, %v949_v19, %v951_v14 }
  0x52   : > { %v1064_v37 = vmax.f32 %v7055_v18, %v906_v22  ;;  %v1065_v4 = vmax.f32 %v7056_v32, %v908_v46  ;;  %v7058_v39 = vmax.f32 %v3728_v16, %v3834_v15  ;;  %v7059_v42 = vmax.f32 %v3733_v21, %v3838_v54 }
  0x53   : > { %v1066_v8 = vmax.f32 %v7057_v57, %v910_v1  ;;  %v7060_v22 = vmax.f32 %v3738_v55, %v3841_v29  ;;  %v7061_v52 = vmax.f32 %v3743_v58, %v3846_v35  ;;  %v7062_v12 = vmax.f32 %v3748_v43, %v3852_v45  ;;  %v7070_v45 = vld [vmem:[#allocation20_spill] sm:$0xff]  ;;  %v7074_v1 = vld [vmem:[#allocation2_spill] sm:$0xff] }
  0x54   : > { %v1067_v11 = vmax.f32 %v7058_v39, %v913_v2  ;;  %v1068_v28 = vmax.f32 %v7059_v42, %v915_v48  ;;  %v7063_v16 = vmax.f32 %v3753_v30, %v3855_v53  ;;  %v7064_v21 = vmax.f32 %v3758_v3, %v3860_v27  ;;  %v7071_v53 = vld [vmem:[#allocation26_spill] sm:$0xff]  ;;  %v7077_v48 = vld [vmem:[#allocation3_spill] sm:$0xff] }
  0x55   : > { %v1069_v10 = vmax.f32 %v7060_v22, %v917_v5  ;;  %v1070_v46 = vmax.f32 %v7061_v52, %v920_v50  ;;  %v1071_v17 = vmax.f32 %v7062_v12, %v922_v20  ;;  %v7065_v55 = vmax.f32 %v3763_v9, %v3863_v60  ;;  %v7076_v2 = vld [vmem:[#allocation22_spill] sm:$0xff]  ;;  %v7079_v5 = vld [vmem:[#allocation23_spill] sm:$0xff]  ;;  %v7080_v50 = vld [vmem:[#allocation13_spill] sm:$0xff] }
  0x56   : > { %v1072_v63 = vmax.f32 %v7063_v16, %v924_v13  ;;  %v4027_v15 = vmax.f32 %v7064_v21, %v927_v38  ;;  %v7066_v58 = vmax.f32 %v3768_v49, %v3868_v6  ;;  %v7067_v43 = vmax.f32 %v3773_v7, %v3874_v31  ;;  %v7073_v6 = vld [vmem:[#allocation21_spill] sm:$0xff]  ;;  %v7082_v20 = vld [vmem:[#allocation24_spill] sm:$0xff]  ;;  %v7083_v13 = vld [vmem:[#allocation19_spill] sm:$0xff] }
  0x57   : > { %v4032_v54 = vmax.f32 %v7065_v55, %v929_v61  ;;  %v7068_v3 = vmax.f32 %v3778_v56, %v3877_v40  ;;  %v7069_v9 = vmax.f32 %v3783_v41, %v3882_v33  ;;  %v7072_v49 = vmax.f32 %v7070_v45, %v7071_v53 }
  0x58   : > { %v4037_v29 = vmax.f32 %v7066_v58, %v931_v0  ;;  %v4042_v30 = vmax.f32 %v7067_v43, %v934_v36  ;;  %v7075_v31 = vmax.f32 %v7073_v6, %v7074_v1  ;;  %v7078_v56 = vmax.f32 %v7076_v2, %v7077_v48  ;;  %v7085_v0 = vld [vmem:[#allocation25_spill] sm:$0xff]  ;;  %v7086_v36 = vld [vmem:[#allocation27_spill] sm:$0xff] }
  0x59   : > { %v4047_v27 = vmax.f32 %v7068_v3, %v936_v24  ;;  %v4052_v35 = vmax.f32 %v7069_v9, %v938_v44  ;;  %v4057_v60 = vmax.f32 %v7072_v49, %v941_v62  ;;  %v7081_v33 = vmax.f32 %v7079_v5, %v7080_v50 }
  0x5a   : > { %v4062_v7 = vmax.f32 %v7075_v31, %v943_v26  ;;  %v4067_v40 = vmax.f32 %v7078_v56, %v945_v47  ;;  %v7084_v38 = vmax.f32 %v7082_v20, %v7083_v13  ;;  %v7087_v24 = vmax.f32 %v7085_v0, %v7086_v36 }
  0x5b   : > { %v4072_v41 = vmax.f32 %v7081_v33, %v948_v51  ;;  %v1112_v62 = vmax.f32 %v1070_v46, %v1064_v37  ;;  %v1113_v23 = vmax.f32 %v1071_v17, %v1065_v4  ;;  %v1114_v34 = vmax.f32 %v1072_v63, %v1066_v8 }
  0x5c   : > { %v4077_v61 = vmax.f32 %v7084_v38, %v950_v25  ;;  %v4082_v44 = vmax.f32 %v7087_v24, %v952_v59  ;;  %v1115_v19 = vmax.f32 %v4027_v15, %v1067_v11  ;;  %v1116_v26 = vmax.f32 %v4032_v54, %v1068_v28 }
  0x5d   : > { %v1117_v47 = vmax.f32 %v4037_v29, %v1069_v10  ;;  %v1118_v14 = vmax.f32 %v4042_v30, %v1070_v46  ;;  %v1119_v18 = vmax.f32 %v4047_v27, %v1071_v17  ;;  %v1120_v51 = vmax.f32 %v4052_v35, %v1072_v63 }
  0x5e   : > { %v1154_v25 = vmax.f32 %v1067_v11, %v1064_v37  ;;  %v1155_v32 = vmax.f32 %v1068_v28, %v1065_v4  ;;  %v1156_v57 = vmax.f32 %v1069_v10, %v1066_v8  ;;  %v1157_v59 = vmax.f32 %v1112_v62, %v1067_v11 }
  0x5f   : > { %v1158_v39 = vmax.f32 %v1113_v23, %v1068_v28  ;;  %v1159_v42 = vmax.f32 %v1114_v34, %v1069_v10  ;;  %v1160_v22 = vmax.f32 %v1115_v19, %v1070_v46  ;;  %v1161_v52 = vmax.f32 %v1116_v26, %v1071_v17 }
  0x60   : > { %v1162_v12 = vmax.f32 %v1117_v47, %v1072_v63  ;;  %v1163_v16 = vmax.f32 %v1118_v14, %v4027_v15  ;;  %v1164_v21 = vmax.f32 %v1119_v18, %v4032_v54  ;;  %v1165_v55 = vmax.f32 %v1120_v51, %v4037_v29 }
  0x61   : > { %v4093_v58 = vmax.f32 %v1154_v25, %v1070_v46  ;;  %v4095_v43 = vmax.f32 %v1155_v32, %v1071_v17  ;;  %v4097_v3 = vmax.f32 %v1156_v57, %v1072_v63  ;;  %v1202_v37 = vmax.f32 %v1157_v59, %v4027_v15 }
  0x62   : > { %v1203_v4 = vmax.f32 %v1158_v39, %v4032_v54  ;;  %v1204_v8 = vmax.f32 %v1159_v42, %v4037_v29  ;;  %v1205_v11 = vmax.f32 %v1160_v22, %v4042_v30  ;;  %v1206_v28 = vmax.f32 %v1161_v52, %v4047_v27 }
  0x63   : > { %7088 = vst [vmem:[#allocation4_spill] sm:$0xff] %v4093_v58  ;;  %v1207_v10 = vmax.f32 %v1162_v12, %v4052_v35  ;;  %v1208_v9 = vmax.f32 %v1163_v16, %v4057_v60  ;;  %v1209_v46 = vmax.f32 %v1164_v21, %v4062_v7  ;;  %v1210_v17 = vmax.f32 %v1165_v55, %v4067_v40 }
  0x64   : > { %7089 = vst [vmem:[#allocation5_spill] sm:$0xff] %v4097_v3  ;;  %v4110_v63 = vmax.f32 %v4093_v58, %v4027_v15  ;;  %v4114_v45 = vmax.f32 %v4095_v43, %v4032_v54  ;;  %v4118_v53 = vmax.f32 %v4097_v3, %v4037_v29  ;;  %v4121_v49 = vmax.f32 %v1202_v37, %v4042_v30 }
  0x65   : > { %v4124_v6 = vmax.f32 %v1203_v4, %v4047_v27  ;;  %v4127_v1 = vmax.f32 %v1204_v8, %v4052_v35  ;;  %v4130_v31 = vmax.f32 %v1205_v11, %v4057_v60  ;;  %v4133_v2 = vmax.f32 %v1206_v28, %v4062_v7  ;;  %3277 = vst.msk [vmem:[%s4339_s17 + $0x204] sm:$0xff] %vm2936_vm4, %v4095_v43 }
  0x66   : > { %7090 = vst [vmem:[#allocation6_spill] sm:$0xff] %v4110_v63  ;;  %v4136_v48 = vmax.f32 %v1207_v10, %v4067_v40  ;;  %v4139_v56 = vmax.f32 %v1208_v9, %v4072_v41  ;;  %v4142_v5 = vmax.f32 %v1209_v46, %v4077_v61  ;;  %v4145_v50 = vmax.f32 %v1210_v17, %v4082_v44 }
  0x67   : > { %7091 = vst [vmem:[#allocation7_spill] sm:$0xff] %v4118_v53  ;;  %v1328_v33 = vrot.slane %v4093_v58, 1  ;;  %v1329_v20 = vrot.slane %v4095_v43, 1  ;;  %v1331_v13 = vrot.slane %v4097_v3, 1  ;;  %v1333_v38 = vrot.slane %v4110_v63, 1 }
  0x68   : > { %7092 = vst [vmem:[#allocation8_spill] sm:$0xff] %v4121_v49  ;;  %v1334_v0 = vrot.slane %v4114_v45, 1  ;;  %v1336_v36 = vrot.slane %v4118_v53, 1  ;;  %v1338_v24 = vrot.slane %v4121_v49, 1  ;;  %v1339_v62 = vrot.slane %v4124_v6, 1 }
  0x69   : > { %7093 = vst [vmem:[#allocation9_spill] sm:$0xff] %v4127_v1  ;;  %v1330_v23 = vsel %vm276_vm0, %v1328_v33, %v1329_v20  ;;  %v1332_v34 = vsel %vm276_vm0, %v1329_v20, %v1331_v13  ;;  %v1341_v19 = vrot.slane %v4127_v1, 1  ;;  %v1343_v26 = vrot.slane %v4130_v31, 1 }
  0x6a   : > { %7094 = vst [vmem:[#allocation10_spill] sm:$0xff] %v4130_v31  ;;  %v1335_v47 = vsel %vm276_vm0, %v1333_v38, %v1334_v0  ;;  %v1337_v14 = vsel %vm276_vm0, %v1334_v0, %v1336_v36  ;;  %v1340_v18 = vsel %vm276_vm0, %v1338_v24, %v1339_v62  ;;  %v1344_v51 = vrot.slane %v4133_v2, 1 }
  0x6b   : > { %7095 = vst [vmem:[#allocation11_spill] sm:$0xff] %v4136_v48  ;;  %v1342_v25 = vsel %vm276_vm0, %v1339_v62, %v1341_v19  ;;  %v1346_v32 = vrot.slane %v4136_v48, 1  ;;  %v1348_v57 = vrot.slane %v4139_v56, 1  ;;  %v1349_v59 = vrot.slane %v4142_v5, 1 }
  0x6c   : > { %7096 = vst [vmem:[#allocation12_spill] sm:$0xff] %v4139_v56  ;;  %v1345_v39 = vsel %vm276_vm0, %v1343_v26, %v1344_v51  ;;  %v1351_v42 = vrot.slane %v4145_v50, 1  ;;  %v1456_v22 = vmax.f32 %v4093_v58, %v1330_v23  ;;  %v1457_v52 = vmax.f32 %v4095_v43, %v1332_v34 }
  0x6d   : > { %7097 = vst [vmem:[#allocation14_spill] sm:$0xff] %v4145_v50  ;;  %v1347_v12 = vsel %vm276_vm0, %v1344_v51, %v1346_v32  ;;  %v1350_v16 = vsel %vm276_vm0, %v1348_v57, %v1349_v59  ;;  %v1459_v21 = vmax.f32 %v4110_v63, %v1335_v47  ;;  %v1460_v55 = vmax.f32 %v4114_v45, %v1337_v14 }
  0x6e   : > { %v1352_v37 = vsel %vm276_vm0, %v1349_v59, %v1351_v42  ;;  %v1462_v4 = vmax.f32 %v4121_v49, %v1340_v18  ;;  %v1463_v8 = vmax.f32 %v4124_v6, %v1342_v25  ;;  %v1465_v11 = vmax.f32 %v4130_v31, %v1345_v39  ;;  %3280 = vst.msk [vmem:[%s4339_s17 + $0x214] sm:$0xff] %vm2936_vm4, %v4114_v45 }
  0x6f   : > { %v1466_v28 = vmax.f32 %v4133_v2, %v1347_v12  ;;  %v1468_v10 = vmax.f32 %v4139_v56, %v1350_v16  ;;  %v1469_v9 = vmax.f32 %v4142_v5, %v1352_v37  ;;  %v1504_v46 = vrot.slane %v4093_v58, 2  ;;  %3283 = vst.msk [vmem:[%s4339_s17 + $0x224] sm:$0xff] %vm2936_vm4, %v4124_v6 }
  0x70   : > { %v1505_v17 = vrot.slane %v4095_v43, 2  ;;  %v1507_v33 = vrot.slane %v4097_v3, 2  ;;  %v1509_v20 = vrot.slane %v4110_v63, 2  ;;  %v1510_v38 = vrot.slane %v4114_v45, 2  ;;  %3286 = vst.msk [vmem:[%s4339_s17 + $0x234] sm:$0xff] %vm2936_vm4, %v4133_v2 }
  0x71   : > { %v6832_v0 = vrot.slane %v4118_v53, 2  ;;  %v1514_v24 = vrot.slane %v4121_v49, 2  ;;  %v1515_v62 = vrot.slane %v4124_v6, 2  ;;  %v6831_v23 = vrot.slane %v4127_v1, 2  ;;  %3289 = vst.msk [vmem:[%s4339_s17 + $0x244] sm:$0xff] %vm2936_vm4, %v4142_v5 }
  0x72   : > { %v1506_v34 = vsel %vm485_vm1, %v1504_v46, %v1505_v17  ;;  %v1508_v26 = vsel %vm485_vm1, %v1505_v17, %v1507_v33  ;;  %v1511_v47 = vsel %vm485_vm1, %v1509_v20, %v1510_v38  ;;  %v1519_v14 = vrot.slane %v4130_v31, 2 }
  0x73   : > { %v1513_v18 = vsel %vm485_vm1, %v1510_v38, %v6832_v0  ;;  %v1516_v51 = vsel %vm485_vm1, %v1514_v24, %v1515_v62  ;;  %v1518_v25 = vsel %vm485_vm1, %v1515_v62, %v6831_v23  ;;  %v1520_v57 = vrot.slane %v4133_v2, 2 }
  0x74   : > { %v6842_v59 = vrot.slane %v4136_v48, 2  ;;  %v1524_v39 = vrot.slane %v4139_v56, 2  ;;  %v1525_v12 = vrot.slane %v4142_v5, 2  ;;  %v6836_v16 = vrot.slane %v4145_v50, 2 }
  0x75   : > { %v1521_v37 = vsel %vm485_vm1, %v1519_v14, %v1520_v57  ;;  %v4220_v46 = vmax.f32 %v1456_v22, %v1506_v34  ;;  %v4222_v17 = vmax.f32 %v1457_v52, %v1508_v26  ;;  %v4224_v20 = vmax.f32 %v1459_v21, %v1511_v47 }
  0x76   : > { %v1523_v38 = vsel %vm485_vm1, %v1520_v57, %v6842_v59  ;;  %v1526_v24 = vsel %vm485_vm1, %v1524_v39, %v1525_v12  ;;  %v1528_v62 = vsel %vm485_vm1, %v1525_v12, %v6836_v16  ;;  %v4233_v23 = vmax.f32 %v1460_v55, %v1513_v18 }
  0x77   : > { %v4235_v0 = vmax.f32 %v1462_v4, %v1516_v51  ;;  %v4237_v22 = vmax.f32 %v1463_v8, %v1518_v25  ;;  %v4239_v52 = vmax.f32 %v1465_v11, %v1521_v37  ;;  %v4241_v21 = vmax.f32 %v1466_v28, %v1523_v38 }
  0x78   : > { %v4243_v34 = vmax.f32 %v1468_v10, %v1526_v24  ;;  %v4245_v26 = vmax.f32 %v1469_v9, %v1528_v62  ;;  %v1680_v47 = vrot.slane %v4093_v58, 3  ;;  %v1681_v14 = vrot.slane %v4095_v43, 3 }
  0x79   : > { %v6835_v57 = vrot.slane %v4097_v3, 3  ;;  %v1685_v55 = vrot.slane %v4110_v63, 3  ;;  %v1686_v4 = vrot.slane %v4114_v45, 3  ;;  %v6834_v8 = vrot.slane %v4118_v53, 3 }
  0x7a   : > { %v1682_v11 = vsel %vm694_vm2, %v1680_v47, %v1681_v14  ;;  %v1690_v28 = vrot.slane %v4121_v49, 3  ;;  %v1691_v10 = vrot.slane %v4124_v6, 3  ;;  %v6833_v9 = vrot.slane %v4127_v1, 3 }
  0x7b   : > { %v1684_v18 = vsel %vm694_vm2, %v1681_v14, %v6835_v57  ;;  %v1687_v51 = vsel %vm694_vm2, %v1685_v55, %v1686_v4  ;;  %v1689_v25 = vsel %vm694_vm2, %v1686_v4, %v6834_v8  ;;  %v1695_v39 = vrot.slane %v4130_v31, 3 }
  0x7c   : > { %v1692_v12 = vsel %vm694_vm2, %v1690_v28, %v1691_v10  ;;  %v1694_v37 = vsel %vm694_vm2, %v1691_v10, %v6833_v9  ;;  %v1696_v38 = vrot.slane %v4133_v2, 3  ;;  %v6841_v24 = vrot.slane %v4136_v48, 3 }
  0x7d   : > { %v1700_v62 = vrot.slane %v4139_v56, 3  ;;  %v1701_v47 = vrot.slane %v4142_v5, 3  ;;  %v6839_v14 = vrot.slane %v4145_v50, 3  ;;  %v1808_v55 = vmax.f32 %v4220_v46, %v1682_v11 }
  0x7e   : > { %v1697_v4 = vsel %vm694_vm2, %v1695_v39, %v1696_v38  ;;  %v1699_v28 = vsel %vm694_vm2, %v1696_v38, %v6841_v24  ;;  %v1809_v10 = vmax.f32 %v4222_v17, %v1684_v18  ;;  %v1811_v9 = vmax.f32 %v4224_v20, %v1687_v51 }
  0x7f   : > { %v1702_v8 = vsel %vm694_vm2, %v1700_v62, %v1701_v47  ;;  %v1704_v57 = vsel %vm694_vm2, %v1701_v47, %v6839_v14  ;;  %v1812_v16 = vmax.f32 %v4233_v23, %v1689_v25  ;;  %v1814_v46 = vmax.f32 %v4235_v0, %v1692_v12 }
  0x80   : > { %v1815_v11 = vmax.f32 %v4237_v22, %v1694_v37  ;;  %v1817_v39 = vmax.f32 %v4239_v52, %v1697_v4  ;;  %v1818_v38 = vmax.f32 %v4241_v21, %v1699_v28  ;;  %v1820_v17 = vmax.f32 %v4243_v34, %v1702_v8 }
  0x81   : > { %v1821_v20 = vmax.f32 %v4245_v26, %v1704_v57  ;;  %v1856_v18 = vrot.slane %v4093_v58, 4  ;;  %v1857_v51 = vrot.slane %v4095_v43, 4  ;;  %v6838_v62 = vrot.slane %v4097_v3, 4 }
  0x82   : > { %v1861_v23 = vrot.slane %v4110_v63, 4  ;;  %v1862_v0 = vrot.slane %v4114_v45, 4  ;;  %v6837_v22 = vrot.slane %v4118_v53, 4  ;;  %v1866_v52 = vrot.slane %v4121_v49, 4 }
  0x83   : > { %v1858_v21 = vsel %vm903_vm3, %v1856_v18, %v1857_v51  ;;  %v1860_v34 = vsel %vm903_vm3, %v1857_v51, %v6838_v62  ;;  %v1867_v26 = vrot.slane %v4124_v6, 4  ;;  %v6840_v57 = vrot.slane %v4127_v1, 4 }
  0x84   : > { %v1863_v8 = vsel %vm903_vm3, %v1861_v23, %v1862_v0  ;;  %v1865_v25 = vsel %vm903_vm3, %v1862_v0, %v6837_v22  ;;  %v1871_v12 = vrot.slane %v4130_v31, 4  ;;  %v1872_v37 = vrot.slane %v4133_v2, 4 }
  0x85   : > { %v1868_v47 = vsel %vm903_vm3, %v1866_v52, %v1867_v26  ;;  %v1870_v4 = vsel %vm903_vm3, %v1867_v26, %v6840_v57  ;;  %v1874_v28 = vrot.slane %v4136_v48, 4  ;;  %v1876_v18 = vrot.slane %v4139_v56, 4 }
  0x86   : > { %v1873_v51 = vsel %vm903_vm3, %v1871_v12, %v1872_v37  ;;  %v1877_v23 = vrot.slane %v4142_v5, 4  ;;  %v1879_v0 = vrot.slane %v4145_v50, 4  ;;  %v1984_v22 = vmax.f32 %v1808_v55, %v1858_v21 }
  0x87   : > { %v1875_v52 = vsel %vm903_vm3, %v1872_v37, %v1874_v28  ;;  %v1985_v62 = vmax.f32 %v1809_v10, %v1860_v34  ;;  %v4324_v14 = vmax.f32 %v1811_v9, %v1863_v8  ;;  %v4326_v26 = vmax.f32 %v1812_v16, %v1865_v25 }
  0x88   : > { %v1878_v57 = vsel %vm903_vm3, %v1876_v18, %v1877_v23  ;;  %v1880_v12 = vsel %vm903_vm3, %v1877_v23, %v1879_v0  ;;  %v4332_v24 = vmax.f32 %v1814_v46, %v1868_v47  ;;  %v4334_v59 = vmax.f32 %v1815_v11, %v1870_v4 }
  0x89   : > { %v4341_v55 = vmax.f32 %v1817_v39, %v1873_v51  ;;  %v4343_v16 = vmax.f32 %v1818_v38, %v1875_v52  ;;  %v4345_v9 = vmax.f32 %v1820_v17, %v1878_v57  ;;  %v4347_v10 = vmax.f32 %v1821_v20, %v1880_v12 }
  0x8a   : > { %v2032_v46 = vmax.f32 %v4332_v24, %v1984_v22  ;;  %v2033_v11 = vmax.f32 %v4334_v59, %v1985_v62  ;;  %v2074_v21 = vmax.f32 %v4324_v14, %v1984_v22  ;;  %v2075_v34 = vmax.f32 %v4326_v26, %v1985_v62 }
  0x8b   : > { %v1458_v39 = vmax.f32 %v4097_v3, %v1331_v13  ;;  %v1461_v38 = vmax.f32 %v4118_v53, %v1336_v36  ;;  %v4362_v17 = vmax.f32 %v4127_v1, %v1341_v19  ;;  %v4381_v13 = vmax.f32 %v4136_v48, %v1346_v32 }
  0x8c   : > { %v2077_v20 = vmax.f32 %v2032_v46, %v4324_v14  ;;  %v2078_v22 = vmax.f32 %v2033_v11, %v4326_v26  ;;  %v4367_v62 = vmax.f32 %v2074_v21, %v4332_v24  ;;  %v4370_v57 = vmax.f32 %v2075_v34, %v4334_v59 }
  0x8d   : > { %v4386_v36 = vmax.f32 %v4145_v50, %v1351_v42  ;;  %v4390_v19 = vmax.f32 %v1458_v39, %v1507_v33  ;;  %v7099_v8 = vrot.slane %v4118_v53, 2 }
  0x8e   : > { %7098 = vst [vmem:[#allocation15_spill] sm:$0xff] %v4367_v62  ;;  %v2122_v45 = vmax.f32 %v2077_v20, %v4341_v55  ;;  %v2123_v25 = vmax.f32 %v2078_v22, %v4343_v16  ;;  %v4400_v32 = vmax.f32 %v4367_v62, %v4341_v55  ;;  %v4404_v42 = vmax.f32 %v4370_v57, %v4343_v16 }
  0x8f   : > { %v4394_v43 = vmax.f32 %v1461_v38, %v7099_v8  ;;  %3229 = vst.msk [vmem:[%s4339_s17 + $0x106] sm:$0xff] %vm2936_vm4, %v4370_v57  ;;  %v2248_v33 = vrot.slane %v4367_v62, 1  ;;  %v6854_v37 = vrot.slane %v4370_v57, 1  ;;  %v2392_v47 = vrot.slane %v4367_v62, 2 }
  0x90   : > { %7100 = vst [vmem:[#allocation16_spill] sm:$0xff] %v4400_v32  ;;  %v6853_v4 = vrot.slane %v4370_v57, 2  ;;  %v4417_v18 = vmax.f32 %v2122_v45, %v4345_v9  ;;  %v4420_v51 = vmax.f32 %v2123_v25, %v4347_v10  ;;  %v2253_v23 = vrot.slane %v4400_v32, 1 }
  0x91   : > { %v6846_v52 = vrot.slane %v4404_v42, 1  ;;  %3232 = vst.msk [vmem:[%s4339_s17 + $0x116] sm:$0xff] %vm2936_vm4, %v4404_v42  ;;  %v2250_v12 = vsel %vm276_vm0, %v2248_v33, %v6854_v37  ;;  %v2397_v46 = vrot.slane %v4400_v32, 2  ;;  %v6844_v11 = vrot.slane %v4404_v42, 2 }
  0x92   : > { %7101 = vst [vmem:[#allocation17_spill] sm:$0xff] %v4417_v18  ;;  %v2394_v6 = vsel %vm485_vm1, %v2392_v47, %v6853_v4  ;;  %v2258_v34 = vrot.slane %v4417_v18, 1  ;;  %v6843_v39 = vrot.slane %v4420_v51, 1  ;;  %v2360_v38 = vmax.f32 %v4367_v62, %v2250_v12 }
  0x93   : > { %v2255_v21 = vsel %vm276_vm0, %v2253_v23, %v6846_v52  ;;  %3235 = vst.msk [vmem:[%s4339_s17 + $0x126] sm:$0xff] %vm2936_vm4, %v4420_v51  ;;  %v2399_v22 = vsel %vm485_vm1, %v2397_v46, %v6844_v11  ;;  %v2402_v2 = vrot.slane %v4417_v18, 2  ;;  %v6845_v8 = vrot.slane %v4420_v51, 2 }
  0x94   : > { %v2362_v20 = vmax.f32 %v4400_v32, %v2255_v21  ;;  %v2260_v45 = vsel %vm276_vm0, %v2258_v34, %v6843_v39  ;;  %v2504_v25 = vmax.f32 %v2360_v38, %v2394_v6  ;;  %v2536_v33 = vrot.slane %v4367_v62, 3 }
  0x95   : > { %v6852_v47 = vrot.slane %v4370_v57, 3  ;;  %v2364_v23 = vmax.f32 %v4417_v18, %v2260_v45  ;;  %v2404_v12 = vsel %vm485_vm1, %v2402_v2, %v6845_v8  ;;  %v2541_v21 = vrot.slane %v4400_v32, 3 }
  0x96   : > { %v2506_v46 = vmax.f32 %v2362_v20, %v2399_v22  ;;  %v6849_v6 = vrot.slane %v4404_v42, 3  ;;  %v2546_v34 = vrot.slane %v4417_v18, 3  ;;  %v6847_v38 = vrot.slane %v4420_v51, 3 }
  0x97   : > { %v2538_v5 = vsel %vm694_vm2, %v2536_v33, %v6852_v47  ;;  %v2508_v39 = vmax.f32 %v2364_v23, %v2404_v12  ;;  %v2680_v11 = vrot.slane %v4367_v62, 4  ;;  %v6848_v2 = vrot.slane %v4370_v57, 4 }
  0x98   : > { %v2648_v45 = vmax.f32 %v2504_v25, %v2538_v5  ;;  %v2543_v20 = vsel %vm694_vm2, %v2541_v21, %v6849_v6  ;;  %v2548_v22 = vsel %vm694_vm2, %v2546_v34, %v6847_v38  ;;  %v2685_v33 = vrot.slane %v4400_v32, 4  ;;  %v4487_v5 = vld [vmem:[%s3442_s13 + $0xe0] sm:$0xff] }
  0x99   : > { %v6851_v8 = vrot.slane %v4404_v42, 4  ;;  %v2650_v52 = vmax.f32 %v2506_v46, %v2543_v20  ;;  %v2652_v23 = vmax.f32 %v2508_v39, %v2548_v22  ;;  %v2682_v25 = vsel %vm903_vm3, %v2680_v11, %v6848_v2 }
  0x9a   : > { %v2690_v12 = vrot.slane %v4417_v18, 4  ;;  %v6850_v34 = vrot.slane %v4420_v51, 4  ;;  %v4493_v38 = vmax.f32 %v2648_v45, %v2682_v25  ;;  %v7103_v46 = vrot.slane %v4127_v1, 2  ;;  %v4510_v25 = vld [vmem:[%s3442_s13 + $0xe8] sm:$0xff] }
  0x9b   : > { %v2687_v21 = vsel %vm903_vm3, %v2685_v33, %v6851_v8  ;;  %v7105_v11 = vrot.slane %v4136_v48, 2  ;;  %v7106_v2 = vrot.slane %v4145_v50, 2  ;;  %v7107_v33 = vrot.slane %v4097_v3, 3 }
  0x9c   : > { %7102 = vst [vmem:[#allocation18_spill] sm:$0xff] %v4493_v38  ;;  %v1640_v39 = vmax.f32 %v4362_v17, %v7103_v46  ;;  %v4498_v20 = vmax.f32 %v2650_v52, %v2687_v21  ;;  %v2692_v17 = vsel %vm903_vm3, %v2690_v12, %v6850_v34  ;;  %v7108_v52 = vrot.slane %v4118_v53, 3 }
  0x9d   : > { %v1643_v22 = vmax.f32 %v4381_v13, %v7105_v11  ;;  %v1646_v6 = vmax.f32 %v4386_v36, %v7106_v2  ;;  %v1810_v45 = vmax.f32 %v4390_v19, %v7107_v33  ;;  %v7109_v13 = vrot.slane %v4127_v1, 3  ;;  %v4521_v11 = vld [vmem:[%s3442_s13 + $0xf0] sm:$0xff] }
  0x9e   : > { %7104 = vst [vmem:[#allocation20_spill] sm:$0xff] %v4498_v20  ;;  %v1813_v21 = vmax.f32 %v4394_v43, %v7108_v52  ;;  %v326_v36 = vrot.slane %v4487_v5, 1  ;;  %v4524_v2 = vmax.f32 %v2652_v23, %v2692_v17  ;;  %v2852_v19 = vmax.f32 %v4498_v20, %v4493_v38  ;;  %v4533_v43 = vld [vmem:[%s3442_s13 + $0xf8] sm:$0xf] }
  0x9f   : > { %v1816_v46 = vmax.f32 %v1640_v39, %v7109_v13  ;;  %v7111_v33 = vrot.slane %v4136_v48, 3  ;;  %v7112_v34 = vrot.slane %v4145_v50, 3  ;;  %v7113_v39 = vrot.slane %v4097_v3, 4 }
  0xa0   : > { %7110 = vst [vmem:[#allocation26_spill] sm:$0xff] %v4524_v2  ;;  %v7114_v13 = vrot.slane %v4118_v53, 4  ;;  %v7115_v23 = vrot.slane %v4127_v1, 4  ;;  %v327_v4 = vrot.slane %v4510_v25, 1  ;;  %v7121_v3 = vrot.slane %v4370_v57, 2 }
  0xa1   : > { %v1819_v12 = vmax.f32 %v1643_v22, %v7111_v33  ;;  %v1822_v8 = vmax.f32 %v1646_v6, %v7112_v34  ;;  %v1986_v52 = vmax.f32 %v1810_v45, %v7113_v39  ;;  %v4547_v22 = vmax.f32 %v2852_v19, %v4524_v2 }
  0xa2   : > { %v4539_v47 = vmax.f32 %v1813_v21, %v7114_v13  ;;  %v4543_v17 = vmax.f32 %v1816_v46, %v7115_v23  ;;  %v329_v45 = vrot.slane %v4521_v11, 1  ;;  %v328_v33 = vsel %vm276_vm0, %v326_v36, %v327_v4 }
  0xa3   : > { %v4551_v6 = vmax.f32 %v1819_v12, %v1874_v28  ;;  %v4555_v34 = vmax.f32 %v1822_v8, %v1879_v0  ;;  %v331_v39 = vrot.slane %v4533_v43, 1  ;;  %2937 = vst.msk [vmem:[%s4339_s17] sm:$0xff] %vm2936_vm4, %v4547_v22  ;;  %v458_v19 = vmax.f32 %v4487_v5, %v328_v33 }
  0xa4   : > { %v2034_v21 = vmax.f32 %v4543_v17, %v1986_v52  ;;  %v2076_v46 = vmax.f32 %v4539_v47, %v1986_v52  ;;  %v330_v28 = vsel %vm276_vm0, %v327_v4, %v329_v45  ;;  %v535_v0 = vrot.slane %v4487_v5, 2 }
  0xa5   : > { %7116 = vst [vmem:[#allocation21_spill] sm:$0xff] %v4555_v34  ;;  %v536_v8 = vrot.slane %v4510_v25, 2  ;;  %v332_v36 = vsel %vm276_vm0, %v329_v45, %v331_v39  ;;  %v459_v52 = vmax.f32 %v4510_v25, %v330_v28  ;;  %v538_v4 = vrot.slane %v4521_v11, 2 }
  0xa6   : > { %v2079_v12 = vmax.f32 %v2034_v21, %v4539_v47  ;;  %v4571_v13 = vmax.f32 %v2076_v46, %v4543_v17  ;;  %v460_v23 = vmax.f32 %v4521_v11, %v332_v36  ;;  %v540_v33 = vrot.slane %v4533_v43, 2 }
  0xa7   : > { %v537_v37 = vsel %vm485_vm1, %v535_v0, %v536_v8  ;;  %v539_v0 = vsel %vm485_vm1, %v536_v8, %v538_v4  ;;  %v7122_v8 = vrot.slane %v4370_v57, 3  ;;  %v7126_v18 = vrot.slane %v4420_v51, 1 }
  0xa8   : > { %7117 = vst [vmem:[#allocation2_spill] sm:$0xff] %v4571_v13  ;;  %v2124_v50 = vmax.f32 %v2079_v12, %v4551_v6  ;;  %v4582_v21 = vmax.f32 %v4571_v13, %v4551_v6  ;;  %v2251_v46 = vrot.slane %v4571_v13, 1  ;;  %v2395_v45 = vrot.slane %v4571_v13, 2 }
  0xa9   : > { %v2539_v39 = vrot.slane %v4571_v13, 3  ;;  %v2683_v28 = vrot.slane %v4571_v13, 4  ;;  %v541_v36 = vsel %vm485_vm1, %v538_v4, %v540_v33  ;;  %v7120_v12 = vrot.slane %v4370_v57, 1 }
  0xaa   : > { %7118 = vst [vmem:[#allocation22_spill] sm:$0xff] %v4582_v21  ;;  %v4591_v48 = vmax.f32 %v2124_v50, %v4555_v34  ;;  %v2256_v53 = vrot.slane %v4582_v21, 1  ;;  %v2396_v56 = vsel %vm485_vm1, %v7121_v3, %v2395_v45  ;;  %v2400_v49 = vrot.slane %v4582_v21, 2 }
  0xab   : > { %v2252_v1 = vsel %vm276_vm0, %v7120_v12, %v2251_v46  ;;  %v2540_v4 = vsel %vm694_vm2, %v7122_v8, %v2539_v39  ;;  %v2544_v50 = vrot.slane %v4582_v21, 3  ;;  %v7123_v33 = vrot.slane %v4404_v42, 1 }
  0xac   : > { %7119 = vst [vmem:[#allocation3_spill] sm:$0xff] %v4591_v48  ;;  %v2361_v31 = vmax.f32 %v4370_v57, %v2252_v1  ;;  %v2261_v12 = vrot.slane %v4591_v48, 1  ;;  %v2405_v63 = vrot.slane %v4591_v48, 2  ;;  %v2549_v3 = vrot.slane %v4591_v48, 3 }
  0xad   : > { %v2257_v46 = vsel %vm276_vm0, %v7123_v33, %v2256_v53  ;;  %v7124_v45 = vrot.slane %v4404_v42, 2  ;;  %v7125_v39 = vrot.slane %v4404_v42, 3  ;;  %v7127_v33 = vrot.slane %v4420_v51, 2 }
  0xae   : > { %v2363_v1 = vmax.f32 %v4404_v42, %v2257_v46  ;;  %v2505_v13 = vmax.f32 %v2361_v31, %v2396_v56  ;;  %v2262_v53 = vsel %vm276_vm0, %v7126_v18, %v2261_v12  ;;  %v7128_v62 = vrot.slane %v4420_v51, 3 }
  0xaf   : > { %v2401_v58 = vsel %vm485_vm1, %v7124_v45, %v2400_v49  ;;  %v2545_v8 = vsel %vm694_vm2, %v7125_v39, %v2544_v50  ;;  %v2406_v32 = vsel %vm485_vm1, %v7127_v33, %v2405_v63  ;;  %v7129_v20 = vrot.slane %v4370_v57, 4 }
  0xb0   : > { %v2550_v46 = vsel %vm694_vm2, %v7128_v62, %v2549_v3  ;;  %v2365_v31 = vmax.f32 %v4420_v51, %v2262_v53  ;;  %v2507_v56 = vmax.f32 %v2363_v1, %v2401_v58  ;;  %v2649_v50 = vmax.f32 %v2505_v13, %v2540_v4 }
  0xb1   : > { %v2684_v49 = vsel %vm903_vm3, %v7129_v20, %v2683_v28  ;;  %v2688_v45 = vrot.slane %v4582_v21, 4  ;;  %v2693_v18 = vrot.slane %v4591_v48, 4  ;;  %v667_v12 = vmax.f32 %v458_v19, %v537_v37 }
  0xb2   : > { %v668_v39 = vmax.f32 %v459_v52, %v539_v0  ;;  %v669_v2 = vmax.f32 %v460_v23, %v541_v36  ;;  %v2509_v63 = vmax.f32 %v2365_v31, %v2406_v32  ;;  %v2651_v33 = vmax.f32 %v2507_v56, %v2545_v8 }
  0xb3   : > { %v7130_v38 = vrot.slane %v4404_v42, 4  ;;  %v4637_v57 = vmax.f32 %v2649_v50, %v2684_v49  ;;  %v7131_v20 = vrot.slane %v4420_v51, 4  ;;  %v744_v13 = vrot.slane %v4487_v5, 3 }
  0xb4   : > { %v745_v28 = vrot.slane %v4510_v25, 3  ;;  %v747_v37 = vrot.slane %v4521_v11, 3  ;;  %v2653_v19 = vmax.f32 %v2509_v63, %v2550_v46  ;;  %v749_v32 = vrot.slane %v4533_v43, 3 }
  0xb5   : > { %v2689_v62 = vsel %vm903_vm3, %v7130_v38, %v2688_v45  ;;  %v2694_v58 = vsel %vm903_vm3, %v7131_v20, %v2693_v18  ;;  %v953_v42 = vrot.slane %v4487_v5, 4  ;;  %v954_v51 = vrot.slane %v4510_v25, 4  ;;  %v4677_v18 = vld [vmem:[%s3442_s13 + $0x100] sm:$0xff] }
  0xb6   : > { %v4645_v52 = vmax.f32 %v2651_v33, %v2689_v62  ;;  %v746_v38 = vsel %vm694_vm2, %v744_v13, %v745_v28  ;;  %v748_v23 = vsel %vm694_vm2, %v745_v28, %v747_v37  ;;  %v956_v0 = vrot.slane %v4521_v11, 4  ;;  %v4699_v62 = vld [vmem:[%s3442_s13 + $0x110] sm:$0xff] }
  0xb7   : > { %v4653_v36 = vmax.f32 %v2653_v19, %v2694_v58  ;;  %v750_v3 = vsel %vm694_vm2, %v747_v37, %v749_v32  ;;  %v876_v1 = vmax.f32 %v667_v12, %v746_v38  ;;  %v877_v8 = vmax.f32 %v668_v39, %v748_v23  ;;  %v4709_v58 = vld [vmem:[%s3442_s13 + $0x118] sm:$0xf] }
  0xb8   : > { %7132 = vst [vmem:[#allocation23_spill] sm:$0xff] %v4645_v52  ;;  %v2853_v4 = vmax.f32 %v4645_v52, %v4637_v57  ;;  %v878_v5 = vmax.f32 %v669_v2, %v750_v3  ;;  %v955_v53 = vsel %vm903_vm3, %v953_v42, %v954_v51  ;;  %v957_v46 = vsel %vm903_vm3, %v954_v51, %v956_v0 }
  0xb9   : > { %7133 = vst [vmem:[#allocation13_spill] sm:$0xff] %v4653_v36  ;;  %v958_v11 = vrot.slane %v4533_v43, 4  ;;  %v4664_v49 = vmax.f32 %v876_v1, %v955_v53  ;;  %v1121_v31 = vmax.f32 %v4057_v60, %v4027_v15  ;;  %v4668_v56 = vmax.f32 %v877_v8, %v957_v46 }
  0xba   : > { %v4661_v25 = vmax.f32 %v2853_v4, %v4653_v36  ;;  %v1122_v2 = vmax.f32 %v4062_v7, %v4032_v54  ;;  %v1123_v50 = vmax.f32 %v4067_v40, %v4037_v29  ;;  %v2035_v45 = vmax.f32 %v4341_v55, %v4324_v14  ;;  %v4689_v29 = vld [vmem:[%s3442_s13 + $0x108] sm:$0xff] }
  0xbb   : > { %v959_v15 = vsel %vm903_vm3, %v956_v0, %v958_v11  ;;  %v1166_v43 = vmax.f32 %v1121_v31, %v4042_v30  ;;  %v2036_v12 = vmax.f32 %v4343_v16, %v4326_v26  ;;  %v2037_v54 = vmax.f32 %v4551_v6, %v4539_v47 }
  0xbc   : > { %2938 = vst.msk [vmem:[%s4339_s17 + $0x8] sm:$0xff] %vm2936_vm4, %v4661_v25  ;;  %v4691_v39 = vmax.f32 %v878_v5, %v959_v15  ;;  %v1167_v14 = vmax.f32 %v1122_v2, %v4047_v27  ;;  %v1168_v63 = vmax.f32 %v1123_v50, %v4052_v35  ;;  %v4696_v33 = vmax.f32 %v2035_v45, %v4332_v24 }
  0xbd   : > { %v1211_v20 = vmax.f32 %v1166_v43, %v4072_v41  ;;  %v4703_v26 = vmax.f32 %v2036_v12, %v4334_v59  ;;  %v4706_v47 = vmax.f32 %v2037_v54, %v4543_v17  ;;  %v333_v13 = vrot.slane %v4677_v18, 1 }
  0xbe   : > { %v1212_v28 = vmax.f32 %v1167_v14, %v4077_v61  ;;  %v1213_v37 = vmax.f32 %v1168_v63, %v4082_v44  ;;  %v2125_v19 = vmax.f32 %v4696_v33, %v4345_v9  ;;  %v334_v32 = vrot.slane %v4689_v29, 1 }
  0xbf   : > { %v4718_v42 = vmax.f32 %v1211_v20, %v4664_v49  ;;  %v2126_v38 = vmax.f32 %v4703_v26, %v4347_v10  ;;  %v2127_v23 = vmax.f32 %v4706_v47, %v4555_v34  ;;  %v336_v51 = vrot.slane %v4699_v62, 1 }
  0xc0   : > { %v1254_v0 = vmax.f32 %v1212_v28, %v4668_v56  ;;  %v4727_v4 = vmax.f32 %v1213_v37, %v4691_v39  ;;  %v335_v3 = vsel %vm276_vm0, %v333_v13, %v334_v32  ;;  %v338_v1 = vrot.slane %v4709_v58, 1 }
  0xc1   : > { %7134 = vst [vmem:[#allocation24_spill] sm:$0xff] %v4718_v42  ;;  %v1353_v8 = vrot.slane %v4718_v42, 1  ;;  %v1529_v5 = vrot.slane %v4718_v42, 2  ;;  %v1705_v53 = vrot.slane %v4718_v42, 3  ;;  %v1881_v46 = vrot.slane %v4718_v42, 4 }
  0xc2   : > { %7135 = vst [vmem:[#allocation19_spill] sm:$0xff] %v4727_v4  ;;  %v1354_v11 = vrot.slane %v1254_v0, 1  ;;  %v1356_v31 = vrot.slane %v4727_v4, 1  ;;  %v1530_v2 = vrot.slane %v1254_v0, 2  ;;  %v1532_v50 = vrot.slane %v4727_v4, 2 }
  0xc3   : > { %3292 = vst.msk [vmem:[%s4339_s17 + $0x254] sm:$0xff] %vm2936_vm4, %v1254_v0  ;;  %v1706_v45 = vrot.slane %v1254_v0, 3  ;;  %v1708_v15 = vrot.slane %v4727_v4, 3  ;;  %v1882_v43 = vrot.slane %v1254_v0, 4  ;;  %v1884_v12 = vrot.slane %v4727_v4, 4 }
  0xc4   : > { %v1355_v54 = vsel %vm276_vm0, %v1353_v8, %v1354_v11  ;;  %v1357_v14 = vsel %vm276_vm0, %v1354_v11, %v1356_v31  ;;  %v1531_v63 = vsel %vm485_vm1, %v1529_v5, %v1530_v2  ;;  %v1533_v33 = vsel %vm485_vm1, %v1530_v2, %v1532_v50 }
  0xc5   : > { %v1471_v20 = vmax.f32 %v4718_v42, %v1355_v54  ;;  %v1472_v26 = vmax.f32 %v1254_v0, %v1357_v14  ;;  %v1707_v47 = vsel %vm694_vm2, %v1705_v53, %v1706_v45  ;;  %v1709_v13 = vsel %vm694_vm2, %v1706_v45, %v1708_v15 }
  0xc6   : > { %v1883_v28 = vsel %vm903_vm3, %v1881_v46, %v1882_v43  ;;  %v1885_v37 = vsel %vm903_vm3, %v1882_v43, %v1884_v12  ;;  %v1473_v48 = vmax.f32 %v4727_v4, %v1356_v31  ;;  %v337_v8 = vsel %vm276_vm0, %v334_v32, %v336_v51 }
  0xc7   : > { %v1647_v11 = vmax.f32 %v1471_v20, %v1531_v63  ;;  %v1648_v21 = vmax.f32 %v1472_v26, %v1533_v33  ;;  %v339_v5 = vsel %vm276_vm0, %v336_v51, %v338_v1  ;;  %v461_v2 = vmax.f32 %v4677_v18, %v335_v3 }
  0xc8   : > { %v1649_v54 = vmax.f32 %v1473_v48, %v1532_v50  ;;  %v462_v0 = vmax.f32 %v4689_v29, %v337_v8  ;;  %v463_v53 = vmax.f32 %v4699_v62, %v339_v5  ;;  %v542_v45 = vrot.slane %v4677_v18, 2 }
  0xc9   : > { %v1823_v46 = vmax.f32 %v1647_v11, %v1707_v47  ;;  %v1824_v14 = vmax.f32 %v1648_v21, %v1709_v13  ;;  %v543_v43 = vrot.slane %v4689_v29, 2  ;;  %v545_v31 = vrot.slane %v4699_v62, 2 }
  0xca   : > { %v1825_v32 = vmax.f32 %v1649_v54, %v1708_v15  ;;  %v547_v63 = vrot.slane %v4709_v58, 2  ;;  %v751_v51 = vrot.slane %v4677_v18, 3  ;;  %v752_v3 = vrot.slane %v4689_v29, 3 }
  0xcb   : > { %v4762_v48 = vmax.f32 %v1823_v46, %v1883_v28  ;;  %v4764_v1 = vmax.f32 %v1824_v14, %v1885_v37  ;;  %v544_v50 = vsel %vm485_vm1, %v542_v45, %v543_v43  ;;  %v546_v33 = vsel %vm485_vm1, %v543_v43, %v545_v31 }
  0xcc   : > { %v4768_v21 = vmax.f32 %v1825_v32, %v1884_v12  ;;  %v548_v20 = vsel %vm485_vm1, %v545_v31, %v547_v63  ;;  %v670_v15 = vmax.f32 %v461_v2, %v544_v50  ;;  %v671_v26 = vmax.f32 %v462_v0, %v546_v33 }
  0xcd   : > { %v4772_v47 = vmax.f32 %v2125_v19, %v4762_v48  ;;  %v2168_v13 = vmax.f32 %v2126_v38, %v4764_v1  ;;  %v672_v28 = vmax.f32 %v463_v53, %v548_v20  ;;  %v753_v37 = vsel %vm694_vm2, %v751_v51, %v752_v3 }
  0xce   : > { %v4777_v8 = vmax.f32 %v2127_v23, %v4768_v21  ;;  %v754_v11 = vrot.slane %v4699_v62, 3  ;;  %v756_v12 = vrot.slane %v4709_v58, 3  ;;  %v879_v5 = vmax.f32 %v670_v15, %v753_v37 }
  0xcf   : > { %7136 = vst [vmem:[#allocation25_spill] sm:$0xff] %v4772_v47  ;;  %v2263_v54 = vrot.slane %v4772_v47, 1  ;;  %v2264_v2 = vrot.slane %v2168_v13, 1  ;;  %v2407_v0 = vrot.slane %v4772_v47, 2  ;;  %v2408_v19 = vrot.slane %v2168_v13, 2 }
  0xd0   : > { %7137 = vst [vmem:[#allocation27_spill] sm:$0xff] %v4777_v8  ;;  %v2551_v38 = vrot.slane %v4772_v47, 3  ;;  %v2552_v53 = vrot.slane %v2168_v13, 3  ;;  %v2695_v45 = vrot.slane %v4772_v47, 4  ;;  %v2696_v23 = vrot.slane %v2168_v13, 4 }
  0xd1   : > { %3238 = vst.msk [vmem:[%s4339_s17 + $0x136] sm:$0xff] %vm2936_vm4, %v2168_v13  ;;  %v2265_v46 = vsel %vm276_vm0, %v2263_v54, %v2264_v2  ;;  %v2409_v14 = vsel %vm485_vm1, %v2407_v0, %v2408_v19  ;;  %v2266_v43 = vrot.slane %v4777_v8, 1  ;;  %v2410_v31 = vrot.slane %v4777_v8, 2 }
  0xd2   : > { %v2366_v32 = vmax.f32 %v4772_v47, %v2265_v46  ;;  %v2553_v63 = vsel %vm694_vm2, %v2551_v38, %v2552_v53  ;;  %v2697_v51 = vsel %vm903_vm3, %v2695_v45, %v2696_v23  ;;  %v2554_v50 = vrot.slane %v4777_v8, 3 }
  0xd3   : > { %v2267_v33 = vsel %vm276_vm0, %v2264_v2, %v2266_v43  ;;  %v2411_v20 = vsel %vm485_vm1, %v2408_v19, %v2410_v31  ;;  %v2698_v15 = vrot.slane %v4777_v8, 4  ;;  %v755_v37 = vsel %vm694_vm2, %v752_v3, %v754_v11  ;;  %v7139_v31 = vld [vmem:[#allocation18_spill] sm:$0xff] }
  0xd4   : > { %v2510_v54 = vmax.f32 %v2366_v32, %v2409_v14  ;;  %v2367_v0 = vmax.f32 %v2168_v13, %v2267_v33  ;;  %v2555_v4 = vsel %vm694_vm2, %v2552_v53, %v2554_v50  ;;  %v757_v46 = vsel %vm694_vm2, %v754_v11, %v756_v12  ;;  %v7140_v32 = vld [vmem:[#allocation26_spill] sm:$0xff] }
  0xd5   : > { %v2699_v38 = vsel %vm903_vm3, %v2696_v23, %v2698_v15  ;;  %v880_v42 = vmax.f32 %v671_v26, %v755_v37  ;;  %v881_v45 = vmax.f32 %v672_v28, %v757_v46  ;;  %v960_v47 = vrot.slane %v4677_v18, 4 }
  0xd6   : > { %v2654_v52 = vmax.f32 %v2510_v54, %v2553_v63  ;;  %v2511_v2 = vmax.f32 %v2367_v0, %v2411_v20  ;;  %v961_v19 = vrot.slane %v4689_v29, 4  ;;  %v963_v43 = vrot.slane %v4699_v62, 4  ;;  %v7142_v20 = vld [vmem:[#allocation20_spill] sm:$0xff] }
  0xd7   : > { %v965_v3 = vrot.slane %v4709_v58, 4  ;;  %v1124_v13 = vmax.f32 %v4072_v41, %v4042_v30  ;;  %v1125_v11 = vmax.f32 %v4077_v61, %v4047_v27  ;;  %v1126_v26 = vmax.f32 %v4082_v44, %v4052_v35 }
  0xd8   : > { %v4812_v28 = vmax.f32 %v2654_v52, %v2697_v51  ;;  %v2655_v18 = vmax.f32 %v2511_v2, %v2555_v4  ;;  %v962_v12 = vsel %vm903_vm3, %v960_v47, %v961_v19  ;;  %v964_v29 = vsel %vm903_vm3, %v961_v19, %v963_v43 }
  0xd9   : > { %v966_v62 = vsel %vm903_vm3, %v963_v43, %v965_v3  ;;  %v4817_v58 = vmax.f32 %v879_v5, %v962_v12  ;;  %v4819_v53 = vmax.f32 %v880_v42, %v964_v29  ;;  %v1169_v30 = vmax.f32 %v1124_v13, %v4057_v60 }
  0xda   : > { %v2910_v27 = vmax.f32 %v4547_v22, %v4812_v28  ;;  %v4824_v35 = vmax.f32 %v2655_v18, %v2699_v38  ;;  %v4826_v52 = vmax.f32 %v881_v45, %v966_v62  ;;  %v1170_v4 = vmax.f32 %v1125_v11, %v4062_v7 }
  0xdb   : > { %v1171_v47 = vmax.f32 %v1126_v26, %v4067_v40  ;;  %v1214_v23 = vmax.f32 %v1169_v30, %v4664_v49  ;;  %v2038_v42 = vmax.f32 %v4345_v9, %v4332_v24  ;;  %v2039_v5 = vmax.f32 %v4347_v10, %v4334_v59 }
  0xdc   : > { %7138 = vst [vmem:[#allocation28_spill] sm:$0xff] %v4824_v35  ;;  %v2911_v22 = vmax.f32 %v4661_v25, %v4824_v35  ;;  %v1215_v14 = vmax.f32 %v1170_v4, %v4668_v56  ;;  %v2824_v63 = vmax.f32 %v7140_v32, %v7139_v31  ;;  %v2040_v51 = vmax.f32 %v4555_v34, %v4543_v17  ;;  %v4893_v31 = vld [vmem:[%s3442_s13 + $0x130] sm:$0xff] }
  0xdd   : > { %2939 = vst.msk [vmem:[%s4339_s17 + $0x10] sm:$0xff] %vm2936_vm4, %v2910_v27  ;;  %v1216_v50 = vmax.f32 %v1171_v47, %v4691_v39  ;;  %v4846_v24 = vmax.f32 %v1214_v23, %v4817_v58  ;;  %v2083_v59 = vmax.f32 %v2038_v42, %v4341_v55  ;;  %v4850_v33 = vmax.f32 %v2039_v5, %v4343_v16  ;;  %v4884_v47 = vld [vmem:[%s3442_s13 + $0x120] sm:$0xff] }
  0xde   : > { %2940 = vst.msk [vmem:[%s4339_s17 + $0x18] sm:$0xff] %vm2936_vm4, %v2911_v22  ;;  %v1257_v25 = vmax.f32 %v1215_v14, %v4819_v53  ;;  %v4856_v15 = vmax.f32 %v2824_v63, %v7142_v20  ;;  %v4859_v17 = vmax.f32 %v2040_v51, %v4551_v6  ;;  %v2825_v37 = vmax.f32 %v4653_v36, %v4637_v57  ;;  %v4890_v14 = vld [vmem:[%s3442_s13 + $0x128] sm:$0xff] }
  0xdf   : > { %7141 = vst [vmem:[#allocation18_spill] sm:$0xff] %v4846_v24  ;;  %v4864_v54 = vmax.f32 %v1216_v50, %v4826_v52  ;;  %v1358_v0 = vrot.slane %v4846_v24, 1  ;;  %v1534_v46 = vrot.slane %v4846_v24, 2  ;;  %v1710_v38 = vrot.slane %v4846_v24, 3 }
  0xe0   : > { %v1359_v45 = vrot.slane %v1257_v25, 1  ;;  %v1535_v2 = vrot.slane %v1257_v25, 2  ;;  %v1711_v19 = vrot.slane %v1257_v25, 3  ;;  %v1886_v43 = vrot.slane %v4846_v24, 4  ;;  %3295 = vst.msk [vmem:[%s4339_s17 + $0x264] sm:$0xff] %vm2936_vm4, %v1257_v25 }
  0xe1   : > { %7143 = vst [vmem:[#allocation26_spill] sm:$0xff] %v4864_v54  ;;  %v1361_v3 = vrot.slane %v4864_v54, 1  ;;  %v1537_v57 = vrot.slane %v4864_v54, 2  ;;  %v1713_v13 = vrot.slane %v4864_v54, 3  ;;  %v1887_v11 = vrot.slane %v1257_v25, 4 }
  0xe2   : > { %v1360_v26 = vsel %vm276_vm0, %v1358_v0, %v1359_v45  ;;  %v1536_v18 = vsel %vm485_vm1, %v1534_v46, %v1535_v2  ;;  %v1712_v12 = vsel %vm694_vm2, %v1710_v38, %v1711_v19  ;;  %v1889_v29 = vrot.slane %v4864_v54, 4 }
  0xe3   : > { %v1362_v62 = vsel %vm276_vm0, %v1359_v45, %v1361_v3  ;;  %v1474_v30 = vmax.f32 %v4846_v24, %v1360_v26  ;;  %v1538_v27 = vsel %vm485_vm1, %v1535_v2, %v1537_v57  ;;  %v1714_v4 = vsel %vm694_vm2, %v1711_v19, %v1713_v13 }
  0xe4   : > { %v1475_v23 = vmax.f32 %v1257_v25, %v1362_v62  ;;  %v1888_v42 = vsel %vm903_vm3, %v1886_v43, %v1887_v11  ;;  %v1890_v5 = vsel %vm903_vm3, %v1887_v11, %v1889_v29  ;;  %v2128_v22 = vmax.f32 %v2083_v59, %v4762_v48  ;;  %v4901_v25 = vld [vmem:[%s3442_s13 + $0x138] sm:$0xf]  ;;  %v7144_v59 = vld [vmem:[#allocation23_spill] sm:$0xff] }
  0xe5   : > { %v1650_v63 = vmax.f32 %v1474_v30, %v1536_v18  ;;  %v2129_v51 = vmax.f32 %v4850_v33, %v4764_v1  ;;  %v1476_v0 = vmax.f32 %v4864_v54, %v1361_v3  ;;  %v2130_v38 = vmax.f32 %v4859_v17, %v4768_v21 }
  0xe6   : > { %v1651_v46 = vmax.f32 %v1475_v23, %v1538_v27  ;;  %v4906_v45 = vmax.f32 %v2825_v37, %v7144_v59  ;;  %v340_v2 = vrot.slane %v4884_v47, 1  ;;  %v341_v33 = vrot.slane %v4890_v14, 1 }
  0xe7   : > { %v1826_v19 = vmax.f32 %v1650_v63, %v1712_v12  ;;  %v1652_v43 = vmax.f32 %v1476_v0, %v1537_v57  ;;  %v343_v11 = vrot.slane %v4893_v31, 1  ;;  %v345_v18 = vrot.slane %v4901_v25, 1 }
  0xe8   : > { %v1827_v26 = vmax.f32 %v1651_v46, %v1714_v4  ;;  %v549_v62 = vrot.slane %v4884_v47, 2  ;;  %v342_v30 = vsel %vm276_vm0, %v340_v2, %v341_v33  ;;  %v554_v2 = vrot.slane %v4901_v25, 2 }
  0xe9   : > { %v4915_v17 = vmax.f32 %v1826_v19, %v1888_v42  ;;  %v1828_v37 = vmax.f32 %v1652_v43, %v1713_v13  ;;  %v344_v12 = vsel %vm276_vm0, %v341_v33, %v343_v11  ;;  %v346_v27 = vsel %vm276_vm0, %v343_v11, %v345_v18 }
  0xea   : > { %v4919_v57 = vmax.f32 %v1827_v26, %v1890_v5  ;;  %v464_v4 = vmax.f32 %v4884_v47, %v342_v30  ;;  %v465_v23 = vmax.f32 %v4890_v14, %v344_v12  ;;  %v466_v13 = vmax.f32 %v4893_v31, %v346_v27 }
  0xeb   : > { %7145 = vst [vmem:[#allocation20_spill] sm:$0xff] %v4915_v17  ;;  %v4925_v63 = vmax.f32 %v2128_v22, %v4915_v17  ;;  %v4927_v0 = vmax.f32 %v1828_v37, %v1889_v29  ;;  %v550_v42 = vrot.slane %v4890_v14, 2  ;;  %v552_v5 = vrot.slane %v4893_v31, 2 }
  0xec   : > { %7146 = vst [vmem:[#allocation23_spill] sm:$0xff] %v4919_v57  ;;  %v2171_v46 = vmax.f32 %v2129_v51, %v4919_v57  ;;  %v758_v19 = vrot.slane %v4884_v47, 3  ;;  %v761_v57 = vrot.slane %v4893_v31, 3 }
  0xed   : > { %7147 = vst [vmem:[#allocation29_spill] sm:$0xff] %v4925_v63  ;;  %v2268_v43 = vrot.slane %v4925_v63, 1  ;;  %v2412_v22 = vrot.slane %v4925_v63, 2  ;;  %v2556_v33 = vrot.slane %v4925_v63, 3  ;;  %v2700_v29 = vrot.slane %v4925_v63, 4 }
  0xee   : > { %7148 = vst [vmem:[#allocation30_spill] sm:$0xff] %v4927_v0  ;;  %v2269_v11 = vrot.slane %v2171_v46, 1  ;;  %v2413_v26 = vrot.slane %v2171_v46, 2  ;;  %v2557_v18 = vrot.slane %v2171_v46, 3  ;;  %v2701_v37 = vrot.slane %v2171_v46, 4 }
  0xef   : > { %3241 = vst.msk [vmem:[%s4339_s17 + $0x146] sm:$0xff] %vm2936_vm4, %v2171_v46  ;;  %v4942_v51 = vmax.f32 %v2130_v38, %v4927_v0  ;;  %v551_v30 = vsel %vm485_vm1, %v549_v62, %v550_v42  ;;  %v553_v12 = vsel %vm485_vm1, %v550_v42, %v552_v5  ;;  %v555_v27 = vsel %vm485_vm1, %v552_v5, %v554_v2 }
  0xf0   : > { %v2270_v3 = vsel %vm276_vm0, %v2268_v43, %v2269_v11  ;;  %v2414_v50 = vsel %vm485_vm1, %v2412_v22, %v2413_v26  ;;  %v2558_v54 = vsel %vm694_vm2, %v2556_v33, %v2557_v18  ;;  %v2702_v24 = vsel %vm903_vm3, %v2700_v29, %v2701_v37 }
  0xf1   : > { %7149 = vst [vmem:[#allocation31_spill] sm:$0xff] %v4942_v51  ;;  %v2368_v8 = vmax.f32 %v4925_v63, %v2270_v3  ;;  %v2271_v36 = vrot.slane %v4942_v51, 1  ;;  %v2415_v38 = vrot.slane %v4942_v51, 2  ;;  %v2559_v62 = vrot.slane %v4942_v51, 3 }
  0xf2   : > { %v2703_v42 = vrot.slane %v4942_v51, 4  ;;  %v673_v0 = vmax.f32 %v464_v4, %v551_v30  ;;  %v674_v5 = vmax.f32 %v465_v23, %v553_v12  ;;  %v675_v2 = vmax.f32 %v466_v13, %v555_v27 }
  0xf3   : > { %v2512_v43 = vmax.f32 %v2368_v8, %v2414_v50  ;;  %v2272_v22 = vsel %vm276_vm0, %v2269_v11, %v2271_v36  ;;  %v2416_v33 = vsel %vm485_vm1, %v2413_v26, %v2415_v38  ;;  %v2560_v29 = vsel %vm694_vm2, %v2557_v18, %v2559_v62 }
  0xf4   : > { %v2369_v34 = vmax.f32 %v2171_v46, %v2272_v22  ;;  %v2704_v3 = vsel %vm903_vm3, %v2701_v37, %v2703_v42  ;;  %v759_v63 = vrot.slane %v4890_v14, 3  ;;  %v763_v51 = vrot.slane %v4901_v25, 3  ;;  %v5029_v22 = vld [vmem:[%s3442_s13 + $0x148] sm:$0xff] }
  0xf5   : > { %v2656_v17 = vmax.f32 %v2512_v43, %v2558_v54  ;;  %v967_v4 = vrot.slane %v4884_v47, 4  ;;  %v968_v8 = vrot.slane %v4890_v14, 4  ;;  %v970_v13 = vrot.slane %v4893_v31, 4  ;;  %v5026_v43 = vld [vmem:[%s3442_s13 + $0x140] sm:$0xff] }
  0xf6   : > { %v2513_v50 = vmax.f32 %v2369_v34, %v2416_v33  ;;  %v760_v36 = vsel %vm694_vm2, %v758_v19, %v759_v63  ;;  %v762_v23 = vsel %vm694_vm2, %v759_v63, %v761_v57  ;;  %v764_v11 = vsel %vm694_vm2, %v761_v57, %v763_v51  ;;  %v5032_v33 = vld [vmem:[%s3442_s13 + $0x150] sm:$0xff] }
  0xf7   : > { %v4968_v46 = vmax.f32 %v2656_v17, %v2702_v24  ;;  %v882_v26 = vmax.f32 %v673_v0, %v760_v36  ;;  %v883_v54 = vmax.f32 %v674_v5, %v762_v23  ;;  %v884_v37 = vmax.f32 %v675_v2, %v764_v11  ;;  %v7156_v23 = vld [vmem:[#allocation21_spill] sm:$0xff] }
  0xf8   : > { %v2657_v18 = vmax.f32 %v2513_v50, %v2560_v29  ;;  %v969_v47 = vsel %vm903_vm3, %v967_v4, %v968_v8  ;;  %v971_v14 = vsel %vm903_vm3, %v968_v8, %v970_v13  ;;  %v7150_v34 = vmax.f32 %v4856_v15, %v4812_v28  ;;  %v7154_v8 = vld [vmem:[#allocation23_spill] sm:$0xff]  ;;  %v7157_v11 = vld [vmem:[#allocation13_spill] sm:$0xff] }
  0xf9   : > { %v972_v31 = vrot.slane %v4901_v25, 4  ;;  %v4978_v24 = vmax.f32 %v882_v26, %v969_v47  ;;  %v4980_v17 = vmax.f32 %v883_v54, %v971_v14  ;;  %v1127_v0 = vmax.f32 %v4664_v49, %v4057_v60 }
  0xfa   : > { %v2912_v63 = vmax.f32 %v7150_v34, %v4968_v46  ;;  %v4982_v57 = vmax.f32 %v2657_v18, %v2704_v3  ;;  %v1128_v19 = vmax.f32 %v4668_v56, %v4062_v7  ;;  %v1129_v51 = vmax.f32 %v4691_v39, %v4067_v40  ;;  %v7153_v3 = vld [vmem:[#allocation20_spill] sm:$0xff] }
  0xfb   : > { %v973_v15 = vsel %vm903_vm3, %v970_v13, %v972_v31  ;;  %v2041_v25 = vmax.f32 %v4762_v48, %v4341_v55  ;;  %v2042_v30 = vmax.f32 %v4764_v1, %v4343_v16  ;;  %v2826_v60 = vmax.f32 %v4812_v28, %v7142_v20 }
  0xfc   : > { %7151 = vst [vmem:[#allocation32_spill] sm:$0xff] %v4982_v57  ;;  %v7152_v7 = vmax.f32 %v4906_v45, %v4824_v35  ;;  %v5003_v12 = vmax.f32 %v884_v37, %v973_v15  ;;  %v1172_v27 = vmax.f32 %v1127_v0, %v4072_v41  ;;  %v1173_v55 = vmax.f32 %v1128_v19, %v4077_v61 }
  0xfd   : > { %2941 = vst.msk [vmem:[%s4339_s17 + $0x20] sm:$0xff] %vm2936_vm4, %v2912_v63  ;;  %v1174_v38 = vmax.f32 %v1129_v51, %v4082_v44  ;;  %v5009_v16 = vmax.f32 %v2041_v25, %v4345_v9  ;;  %v5012_v62 = vmax.f32 %v2042_v30, %v4347_v10  ;;  %v5015_v20 = vmax.f32 %v2826_v60, %v7140_v32 }
  0xfe   : > { %v2913_v40 = vmax.f32 %v7152_v7, %v4982_v57  ;;  %v1217_v45 = vmax.f32 %v1172_v27, %v4817_v58  ;;  %v1218_v42 = vmax.f32 %v1173_v55, %v4819_v53  ;;  %v2043_v5 = vmax.f32 %v4768_v21, %v4551_v6 }
  0xff   : > { %v2827_v2 = vmax.f32 %v4824_v35, %v7144_v59  ;;  %v1219_v29 = vmax.f32 %v1174_v38, %v4826_v52  ;;  %v2131_v4 = vmax.f32 %v5009_v16, %v7153_v3  ;;  %v2132_v50 = vmax.f32 %v5012_v62, %v7154_v8 }
 0x100   : > { %2942 = vst.msk [vmem:[%s4339_s17 + $0x28] sm:$0xff] %vm2936_vm4, %v2913_v40  ;;  %v5042_v59 = vmax.f32 %v1217_v45, %v4978_v24  ;;  %v1260_v36 = vmax.f32 %v1218_v42, %v4980_v17  ;;  %v5046_v13 = vmax.f32 %v2043_v5, %v7156_v23  ;;  %v347_v18 = vrot.slane %v5026_v43, 1  ;;  %v5075_v5 = vld [vmem:[%s3442_s13 + $0x158] sm:$0xf] }
 0x101   : > { %v5049_v26 = vmax.f32 %v2827_v2, %v7157_v11  ;;  %v5052_v54 = vmax.f32 %v1219_v29, %v5003_v12  ;;  %v348_v37 = vrot.slane %v5029_v22, 1  ;;  %v350_v47 = vrot.slane %v5032_v33, 1 }
 0x102   : > { %7155 = vst [vmem:[#allocation20_spill] sm:$0xff] %v5042_v59  ;;  %v1363_v14 = vrot.slane %v5042_v59, 1  ;;  %v1364_v34 = vrot.slane %v1260_v36, 1  ;;  %v1539_v63 = vrot.slane %v5042_v59, 2  ;;  %v1540_v31 = vrot.slane %v1260_v36, 2 }
 0x103   : > { %7158 = vst [vmem:[#allocation23_spill] sm:$0xff] %v5052_v54  ;;  %v1366_v0 = vrot.slane %v5052_v54, 1  ;;  %v1542_v19 = vrot.slane %v5052_v54, 2  ;;  %v1715_v51 = vrot.slane %v5042_v59, 3  ;;  %v1716_v15 = vrot.slane %v1260_v36, 3 }
 0x104   : > { %3298 = vst.msk [vmem:[%s4339_s17 + $0x274] sm:$0xff] %vm2936_vm4, %v1260_v36  ;;  %v1365_v25 = vsel %vm276_vm0, %v1363_v14, %v1364_v34  ;;  %v1541_v30 = vsel %vm485_vm1, %v1539_v63, %v1540_v31  ;;  %v1718_v60 = vrot.slane %v5052_v54, 3  ;;  %v1891_v7 = vrot.slane %v5042_v59, 4  ;;  %v7159_v14 = vld [vmem:[#allocation30_spill] sm:$0xff] }
 0x105   : > { %v1367_v40 = vsel %vm276_vm0, %v1364_v34, %v1366_v0  ;;  %v1477_v27 = vmax.f32 %v5042_v59, %v1365_v25  ;;  %v1543_v55 = vsel %vm485_vm1, %v1540_v31, %v1542_v19  ;;  %v1717_v38 = vsel %vm694_vm2, %v1715_v51, %v1716_v15 }
 0x106   : > { %v1478_v16 = vmax.f32 %v1260_v36, %v1367_v40  ;;  %v1719_v62 = vsel %vm694_vm2, %v1716_v15, %v1718_v60  ;;  %v1892_v45 = vrot.slane %v1260_v36, 4  ;;  %v1894_v42 = vrot.slane %v5052_v54, 4 }
 0x107   : > { %v1653_v2 = vmax.f32 %v1477_v27, %v1541_v30  ;;  %v1479_v29 = vmax.f32 %v5052_v54, %v1366_v0  ;;  %v2133_v34 = vmax.f32 %v5046_v13, %v7159_v14  ;;  %v349_v36 = vsel %vm276_vm0, %v347_v18, %v348_v37 }
 0x108   : > { %v1654_v31 = vmax.f32 %v1478_v16, %v1543_v55  ;;  %v1893_v51 = vsel %vm903_vm3, %v1891_v7, %v1892_v45  ;;  %v1895_v25 = vsel %vm903_vm3, %v1892_v45, %v1894_v42  ;;  %v351_v6 = vsel %vm276_vm0, %v348_v37, %v350_v47 }
 0x109   : > { %v1829_v15 = vmax.f32 %v1653_v2, %v1717_v38  ;;  %v1655_v40 = vmax.f32 %v1479_v29, %v1542_v19  ;;  %v352_v30 = vrot.slane %v5075_v5, 1  ;;  %v467_v27 = vmax.f32 %v5026_v43, %v349_v36 }
 0x10a   : > { %v1830_v0 = vmax.f32 %v1654_v31, %v1719_v62  ;;  %v468_v13 = vmax.f32 %v5029_v22, %v351_v6  ;;  %v556_v63 = vrot.slane %v5026_v43, 2  ;;  %v557_v18 = vrot.slane %v5029_v22, 2 }
 0x10b   : > { %v5090_v55 = vmax.f32 %v1829_v15, %v1893_v51  ;;  %v1831_v7 = vmax.f32 %v1655_v40, %v1718_v60  ;;  %v353_v16 = vsel %vm276_vm0, %v350_v47, %v352_v30  ;;  %v559_v19 = vrot.slane %v5032_v33, 2 }
 0x10c   : > { %v5094_v38 = vmax.f32 %v1830_v0, %v1895_v25  ;;  %v469_v37 = vmax.f32 %v5032_v33, %v353_v16  ;;  %v561_v62 = vrot.slane %v5075_v5, 2  ;;  %v558_v60 = vsel %vm485_vm1, %v556_v63, %v557_v18 }
 0x10d   : > { %7160 = vst [vmem:[#allocation21_spill] sm:$0xff] %v5090_v55  ;;  %v5100_v45 = vmax.f32 %v2131_v4, %v5090_v55  ;;  %v5102_v6 = vmax.f32 %v1831_v7, %v1894_v42  ;;  %v765_v47 = vrot.slane %v5026_v43, 3  ;;  %v560_v29 = vsel %vm485_vm1, %v557_v18, %v559_v19 }
 0x10e   : > { %7161 = vst [vmem:[#allocation33_spill] sm:$0xff] %v5094_v38  ;;  %v2174_v2 = vmax.f32 %v2132_v50, %v5094_v38  ;;  %v562_v31 = vsel %vm485_vm1, %v559_v19, %v561_v62  ;;  %v676_v51 = vmax.f32 %v467_v27, %v558_v60  ;;  %v677_v0 = vmax.f32 %v468_v13, %v560_v29 }
 0x10f   : > { %7162 = vst [vmem:[#allocation34_spill] sm:$0xff] %v5100_v45  ;;  %v2273_v25 = vrot.slane %v5100_v45, 1  ;;  %v2417_v36 = vrot.slane %v5100_v45, 2  ;;  %v2561_v4 = vrot.slane %v5100_v45, 3  ;;  %v2705_v42 = vrot.slane %v5100_v45, 4 }
 0x110   : > { %7163 = vst [vmem:[#allocation35_spill] sm:$0xff] %v5102_v6  ;;  %v2274_v15 = vrot.slane %v2174_v2, 1  ;;  %v2418_v40 = vrot.slane %v2174_v2, 2  ;;  %v2562_v63 = vrot.slane %v2174_v2, 3  ;;  %v2706_v30 = vrot.slane %v2174_v2, 4 }
 0x111   : > { %3244 = vst.msk [vmem:[%s4339_s17 + $0x156] sm:$0xff] %vm2936_vm4, %v2174_v2  ;;  %v5116_v50 = vmax.f32 %v2133_v34, %v5102_v6  ;;  %v678_v7 = vmax.f32 %v469_v37, %v562_v31  ;;  %v766_v27 = vrot.slane %v5029_v22, 3  ;;  %v768_v29 = vrot.slane %v5032_v33, 3 }
 0x112   : > { %v2275_v16 = vsel %vm276_vm0, %v2273_v25, %v2274_v15  ;;  %v2419_v18 = vsel %vm485_vm1, %v2417_v36, %v2418_v40  ;;  %v2563_v19 = vsel %vm694_vm2, %v2561_v4, %v2562_v63  ;;  %v2707_v62 = vsel %vm903_vm3, %v2705_v42, %v2706_v30 }
 0x113   : > { %7164 = vst [vmem:[#allocation36_spill] sm:$0xff] %v5116_v50  ;;  %v2370_v60 = vmax.f32 %v5100_v45, %v2275_v16  ;;  %v2276_v54 = vrot.slane %v5116_v50, 1  ;;  %v2420_v59 = vrot.slane %v5116_v50, 2  ;;  %v2564_v34 = vrot.slane %v5116_v50, 3 }
 0x114   : > { %v2708_v13 = vrot.slane %v5116_v50, 4  ;;  %v767_v37 = vsel %vm694_vm2, %v765_v47, %v766_v27  ;;  %v770_v31 = vrot.slane %v5075_v5, 3  ;;  %v769_v35 = vsel %vm694_vm2, %v766_v27, %v768_v29 }
 0x115   : > { %v2514_v25 = vmax.f32 %v2370_v60, %v2419_v18  ;;  %v2277_v36 = vsel %vm276_vm0, %v2274_v15, %v2276_v54  ;;  %v2421_v4 = vsel %vm485_vm1, %v2418_v40, %v2420_v59  ;;  %v2565_v42 = vsel %vm694_vm2, %v2562_v63, %v2564_v34 }
 0x116   : > { %v2371_v16 = vmax.f32 %v2174_v2, %v2277_v36  ;;  %v2709_v45 = vsel %vm903_vm3, %v2706_v30, %v2708_v13  ;;  %v771_v50 = vsel %vm694_vm2, %v768_v29, %v770_v31  ;;  %v885_v47 = vmax.f32 %v676_v51, %v767_v37  ;;  %v7169_v13 = vld [vmem:[#allocation13_spill] sm:$0xff] }
 0x117   : > { %v2658_v6 = vmax.f32 %v2514_v25, %v2563_v19  ;;  %v886_v38 = vmax.f32 %v677_v0, %v769_v35  ;;  %v887_v55 = vmax.f32 %v678_v7, %v771_v50  ;;  %v974_v18 = vrot.slane %v5026_v43, 4  ;;  %v7171_v31 = vld [vmem:[#allocation21_spill] sm:$0xff] }
 0x118   : > { %v2515_v11 = vmax.f32 %v2371_v16, %v2421_v4  ;;  %v975_v54 = vrot.slane %v5029_v22, 4  ;;  %v977_v59 = vrot.slane %v5032_v33, 4  ;;  %v979_v2 = vrot.slane %v5075_v5, 4  ;;  %v7172_v36 = vld [vmem:[#allocation33_spill] sm:$0xff] }
 0x119   : > { %v5140_v15 = vmax.f32 %v2658_v6, %v2707_v62  ;;  %v1130_v40 = vmax.f32 %v4817_v58, %v4072_v41  ;;  %v1131_v51 = vmax.f32 %v4819_v53, %v4077_v61  ;;  %v1132_v22 = vmax.f32 %v4826_v52, %v4082_v44 }
 0x11a   : > { %v2659_v35 = vmax.f32 %v2515_v11, %v2565_v42  ;;  %v976_v63 = vsel %vm903_vm3, %v974_v18, %v975_v54  ;;  %v978_v43 = vsel %vm903_vm3, %v975_v54, %v977_v59  ;;  %v7165_v33 = vmax.f32 %v5015_v20, %v4968_v46 }
 0x11b   : > { %v980_v5 = vsel %vm903_vm3, %v977_v59, %v979_v2  ;;  %v5156_v30 = vmax.f32 %v885_v47, %v976_v63  ;;  %v5158_v41 = vmax.f32 %v886_v38, %v978_v43  ;;  %v1175_v50 = vmax.f32 %v1130_v40, %v4664_v49 }
 0x11c   : > { %v2914_v6 = vmax.f32 %v7165_v33, %v5140_v15  ;;  %v5160_v61 = vmax.f32 %v2659_v35, %v2709_v45  ;;  %v5162_v11 = vmax.f32 %v887_v55, %v980_v5  ;;  %v1176_v44 = vmax.f32 %v1131_v51, %v4668_v56 }
 0x11d   : > { %v1177_v20 = vmax.f32 %v1132_v22, %v4691_v39  ;;  %v2044_v0 = vmax.f32 %v7153_v3, %v4345_v9  ;;  %v2045_v38 = vmax.f32 %v7154_v8, %v4347_v10  ;;  %v2828_v45 = vmax.f32 %v4968_v46, %v7140_v32 }
 0x11e   : > { %7166 = vst [vmem:[#allocation37_spill] sm:$0xff] %v5160_v61  ;;  %v7167_v55 = vmax.f32 %v5049_v26, %v4982_v57  ;;  %v1220_v27 = vmax.f32 %v1175_v50, %v4978_v24  ;;  %v1221_v19 = vmax.f32 %v1176_v44, %v4980_v17  ;;  %v2046_v62 = vmax.f32 %v7159_v14, %v7156_v23  ;;  %v5226_v44 = vld [vmem:[%s3442_s13 + $0x160] sm:$0xff] }
 0x11f   : > { %2943 = vst.msk [vmem:[%s4339_s17 + $0x30] sm:$0xff] %vm2936_vm4, %v2914_v6  ;;  %v1222_v9 = vmax.f32 %v1177_v20, %v5003_v12  ;;  %v2089_v60 = vmax.f32 %v2044_v0, %v4762_v48  ;;  %v5186_v10 = vmax.f32 %v2045_v38, %v4764_v1  ;;  %v5189_v32 = vmax.f32 %v2828_v45, %v4812_v28 }
 0x120   : > { %v2915_v7 = vmax.f32 %v7167_v55, %v5160_v61  ;;  %v5194_v26 = vmax.f32 %v1220_v27, %v5156_v30  ;;  %v1263_v34 = vmax.f32 %v1221_v19, %v5158_v41  ;;  %v5198_v23 = vmax.f32 %v2046_v62, %v4768_v21  ;;  %v5231_v55 = vld [vmem:[%s3442_s13 + $0x168] sm:$0xff] }
 0x121   : > { %v2829_v37 = vmax.f32 %v4982_v57, %v7169_v13  ;;  %v5203_v29 = vmax.f32 %v1222_v9, %v5162_v11  ;;  %v2134_v25 = vmax.f32 %v2089_v60, %v7171_v31  ;;  %v2135_v4 = vmax.f32 %v5186_v10, %v7172_v36  ;;  %v7173_v19 = vld [vmem:[#allocation35_spill] sm:$0xff]  ;;  %v7174_v9 = vld [vmem:[#allocation28_spill] sm:$0xff]  ;;  %v5243_v13 = vld [vmem:[%s3442_s13 + $0x178] sm:$0xf] }
 0x122   : > { %2944 = vst.msk [vmem:[%s4339_s17 + $0x38] sm:$0xff] %vm2936_vm4, %v2915_v7  ;;  %v1368_v16 = vrot.slane %v5194_v26, 1  ;;  %v1369_v47 = vrot.slane %v1263_v34, 1  ;;  %v1544_v18 = vrot.slane %v5194_v26, 2  ;;  %v1545_v54 = vrot.slane %v1263_v34, 2  ;;  %v5240_v10 = vld [vmem:[%s3442_s13 + $0x170] sm:$0xff] }
 0x123   : > { %7168 = vst [vmem:[#allocation38_spill] sm:$0xff] %v5194_v26  ;;  %v1371_v59 = vrot.slane %v5203_v29, 1  ;;  %v1547_v2 = vrot.slane %v5203_v29, 2  ;;  %v1720_v40 = vrot.slane %v5194_v26, 3  ;;  %v1721_v51 = vrot.slane %v1263_v34, 3 }
 0x124   : > { %7170 = vst [vmem:[#allocation13_spill] sm:$0xff] %v5203_v29  ;;  %v1370_v35 = vsel %vm276_vm0, %v1368_v16, %v1369_v47  ;;  %v1546_v63 = vsel %vm485_vm1, %v1544_v18, %v1545_v54  ;;  %v1723_v43 = vrot.slane %v5203_v29, 3  ;;  %v1896_v22 = vrot.slane %v5194_v26, 4 }
 0x125   : > { %3301 = vst.msk [vmem:[%s4339_s17 + $0x284] sm:$0xff] %vm2936_vm4, %v1263_v34  ;;  %v1372_v33 = vsel %vm276_vm0, %v1369_v47, %v1371_v59  ;;  %v1480_v6 = vmax.f32 %v5194_v26, %v1370_v35  ;;  %v1548_v5 = vsel %vm485_vm1, %v1545_v54, %v1547_v2  ;;  %v1722_v50 = vsel %vm694_vm2, %v1720_v40, %v1721_v51 }
 0x126   : > { %v1481_v20 = vmax.f32 %v1263_v34, %v1372_v33  ;;  %v1724_v0 = vsel %vm694_vm2, %v1721_v51, %v1723_v43  ;;  %v1897_v38 = vrot.slane %v1263_v34, 4  ;;  %v1899_v45 = vrot.slane %v5203_v29, 4 }
 0x127   : > { %v1656_v7 = vmax.f32 %v1480_v6, %v1546_v63  ;;  %v1482_v27 = vmax.f32 %v5203_v29, %v1371_v59  ;;  %v2136_v62 = vmax.f32 %v5198_v23, %v7173_v19  ;;  %v5237_v60 = vmax.f32 %v2829_v37, %v7174_v9 }
 0x128   : > { %v1657_v16 = vmax.f32 %v1481_v20, %v1548_v5  ;;  %v1898_v34 = vsel %vm903_vm3, %v1896_v22, %v1897_v38  ;;  %v1900_v47 = vsel %vm903_vm3, %v1897_v38, %v1899_v45  ;;  %v354_v18 = vrot.slane %v5226_v44, 1 }
 0x129   : > { %v1832_v54 = vmax.f32 %v1656_v7, %v1722_v50  ;;  %v1658_v40 = vmax.f32 %v1482_v27, %v1547_v2  ;;  %v355_v23 = vrot.slane %v5231_v55, 1  ;;  %v357_v51 = vrot.slane %v5240_v10, 1 }
 0x12a   : > { %v1833_v37 = vmax.f32 %v1657_v16, %v1724_v0  ;;  %v359_v35 = vrot.slane %v5243_v13, 1  ;;  %v563_v63 = vrot.slane %v5226_v44, 2  ;;  %v564_v5 = vrot.slane %v5231_v55, 2 }
 0x12b   : > { %v5254_v33 = vmax.f32 %v1832_v54, %v1898_v34  ;;  %v1834_v22 = vmax.f32 %v1658_v40, %v1723_v43  ;;  %v356_v6 = vsel %vm276_vm0, %v354_v18, %v355_v23  ;;  %v358_v50 = vsel %vm276_vm0, %v355_v23, %v357_v51 }
 0x12c   : > { %v5258_v2 = vmax.f32 %v1833_v37, %v1900_v47  ;;  %v360_v20 = vsel %vm276_vm0, %v357_v51, %v359_v35  ;;  %v470_v0 = vmax.f32 %v5226_v44, %v356_v6  ;;  %v471_v43 = vmax.f32 %v5231_v55, %v358_v50 }
 0x12d   : > { %v5264_v38 = vmax.f32 %v2134_v25, %v5254_v33  ;;  %v5266_v7 = vmax.f32 %v1834_v22, %v1899_v45  ;;  %v472_v27 = vmax.f32 %v5240_v10, %v360_v20  ;;  %v565_v34 = vsel %vm485_vm1, %v563_v63, %v564_v5 }
 0x12e   : > { %v2177_v16 = vmax.f32 %v2135_v4, %v5258_v2  ;;  %v566_v47 = vrot.slane %v5240_v10, 2  ;;  %v568_v18 = vrot.slane %v5243_v13, 2  ;;  %v679_v6 = vmax.f32 %v470_v0, %v565_v34 }
 0x12f   : > { %7175 = vst [vmem:[#allocation21_spill] sm:$0xff] %v5264_v38  ;;  %v2278_v54 = vrot.slane %v5264_v38, 1  ;;  %v2422_v25 = vrot.slane %v5264_v38, 2  ;;  %v2566_v40 = vrot.slane %v5264_v38, 3  ;;  %v2710_v45 = vrot.slane %v5264_v38, 4 }
 0x130   : > { %7176 = vst [vmem:[#allocation33_spill] sm:$0xff] %v5266_v7  ;;  %v2279_v23 = vrot.slane %v2177_v16, 1  ;;  %v2423_v37 = vrot.slane %v2177_v16, 2  ;;  %v2567_v51 = vrot.slane %v2177_v16, 3  ;;  %v2711_v35 = vrot.slane %v2177_v16, 4 }
 0x131   : > { %3247 = vst.msk [vmem:[%s4339_s17 + $0x166] sm:$0xff] %vm2936_vm4, %v2177_v16  ;;  %v5281_v4 = vmax.f32 %v2136_v62, %v5266_v7  ;;  %v567_v63 = vsel %vm485_vm1, %v564_v5, %v566_v47  ;;  %v569_v22 = vsel %vm485_vm1, %v566_v47, %v568_v18  ;;  %v772_v34 = vrot.slane %v5226_v44, 3 }
 0x132   : > { %v2280_v50 = vsel %vm276_vm0, %v2278_v54, %v2279_v23  ;;  %v2424_v20 = vsel %vm485_vm1, %v2422_v25, %v2423_v37  ;;  %v2568_v59 = vsel %vm694_vm2, %v2566_v40, %v2567_v51  ;;  %v2712_v42 = vsel %vm903_vm3, %v2710_v45, %v2711_v35 }
 0x133   : > { %7177 = vst [vmem:[#allocation35_spill] sm:$0xff] %v5281_v4  ;;  %v2372_v29 = vmax.f32 %v5264_v38, %v2280_v50  ;;  %v2281_v26 = vrot.slane %v5281_v4, 1  ;;  %v2425_v62 = vrot.slane %v5281_v4, 2  ;;  %v2569_v7 = vrot.slane %v5281_v4, 3 }
 0x134   : > { %v2713_v5 = vrot.slane %v5281_v4, 4  ;;  %v680_v47 = vmax.f32 %v471_v43, %v567_v63  ;;  %v681_v0 = vmax.f32 %v472_v27, %v569_v22  ;;  %v773_v38 = vrot.slane %v5231_v55, 3 }
 0x135   : > { %v2516_v18 = vmax.f32 %v2372_v29, %v2424_v20  ;;  %v2282_v54 = vsel %vm276_vm0, %v2279_v23, %v2281_v26  ;;  %v2426_v25 = vsel %vm485_vm1, %v2423_v37, %v2425_v62  ;;  %v2570_v40 = vsel %vm694_vm2, %v2567_v51, %v2569_v7 }
 0x136   : > { %v2373_v45 = vmax.f32 %v2177_v16, %v2282_v54  ;;  %v2714_v50 = vsel %vm903_vm3, %v2711_v35, %v2713_v5  ;;  %v775_v57 = vrot.slane %v5240_v10, 3  ;;  %v777_v43 = vrot.slane %v5243_v13, 3 }
 0x137   : > { %v2660_v14 = vmax.f32 %v2516_v18, %v2568_v59  ;;  %v981_v27 = vrot.slane %v5226_v44, 4  ;;  %v982_v29 = vrot.slane %v5231_v55, 4  ;;  %v774_v26 = vsel %vm694_vm2, %v772_v34, %v773_v38 }
 0x138   : > { %v2517_v63 = vmax.f32 %v2373_v45, %v2426_v25  ;;  %v776_v23 = vsel %vm694_vm2, %v773_v38, %v775_v57  ;;  %v984_v7 = vrot.slane %v5240_v10, 4  ;;  %v778_v37 = vsel %vm694_vm2, %v775_v57, %v777_v43  ;;  %v5368_v43 = vld [vmem:[%s3442_s13 + $0x188] sm:$0xff] }
 0x139   : > { %v5307_v16 = vmax.f32 %v2660_v14, %v2712_v42  ;;  %v888_v51 = vmax.f32 %v679_v6, %v774_v26  ;;  %v889_v59 = vmax.f32 %v680_v47, %v776_v23  ;;  %v890_v22 = vmax.f32 %v681_v0, %v778_v37 }
 0x13a   : > { %v2661_v35 = vmax.f32 %v2517_v63, %v2570_v40  ;;  %v983_v44 = vsel %vm903_vm3, %v981_v27, %v982_v29  ;;  %v985_v55 = vsel %vm903_vm3, %v982_v29, %v984_v7  ;;  %v7178_v20 = vmax.f32 %v5189_v32, %v5140_v15  ;;  %v5371_v27 = vld [vmem:[%s3442_s13 + $0x190] sm:$0xff] }
 0x13b   : > { %v986_v10 = vrot.slane %v5243_v13, 4  ;;  %v5317_v14 = vmax.f32 %v888_v51, %v983_v44  ;;  %v5319_v42 = vmax.f32 %v889_v59, %v985_v55  ;;  %v1133_v6 = vmax.f32 %v4978_v24, %v4664_v49  ;;  %v7183_v51 = vld [vmem:[#allocation32_spill] sm:$0xff] }
 0x13c   : > { %v2916_v38 = vmax.f32 %v7178_v20, %v5307_v16  ;;  %v5321_v57 = vmax.f32 %v2661_v35, %v2714_v50  ;;  %v1134_v62 = vmax.f32 %v4980_v17, %v4668_v56  ;;  %v1135_v5 = vmax.f32 %v5003_v12, %v4691_v39  ;;  %v5365_v50 = vld [vmem:[%s3442_s13 + $0x180] sm:$0xff] }
 0x13d   : > { %v987_v32 = vsel %vm903_vm3, %v984_v7, %v986_v10  ;;  %v2047_v13 = vmax.f32 %v7171_v31, %v4762_v48  ;;  %v2048_v47 = vmax.f32 %v7172_v36, %v4764_v1  ;;  %v2830_v49 = vmax.f32 %v5140_v15, %v4812_v28  ;;  %v7182_v7 = vld [vmem:[#allocation30_spill] sm:$0xff] }
 0x13e   : > { %7179 = vst [vmem:[#allocation28_spill] sm:$0xff] %v5321_v57  ;;  %v7180_v56 = vmax.f32 %v5237_v60, %v5160_v61  ;;  %v5342_v0 = vmax.f32 %v890_v22, %v987_v32  ;;  %v1178_v34 = vmax.f32 %v1133_v6, %v4817_v58  ;;  %v1179_v48 = vmax.f32 %v1134_v62, %v4819_v53 }
 0x13f   : > { %2945 = vst.msk [vmem:[%s4339_s17 + $0x40] sm:$0xff] %vm2936_vm4, %v2916_v38  ;;  %v1180_v18 = vmax.f32 %v1135_v5, %v4826_v52  ;;  %v5348_v1 = vmax.f32 %v2047_v13, %v7153_v3  ;;  %v5351_v54 = vmax.f32 %v2048_v47, %v7154_v8  ;;  %v5354_v28 = vmax.f32 %v2830_v49, %v4968_v46 }
 0x140   : > { %v2917_v39 = vmax.f32 %v7180_v56, %v5321_v57  ;;  %v1223_v60 = vmax.f32 %v1178_v34, %v5156_v30  ;;  %v1224_v25 = vmax.f32 %v1179_v48, %v5158_v41  ;;  %v2049_v40 = vmax.f32 %v7173_v19, %v4768_v21 }
 0x141   : > { %v2831_v45 = vmax.f32 %v5160_v61, %v7174_v9  ;;  %v1225_v29 = vmax.f32 %v1180_v18, %v5162_v11  ;;  %v2137_v63 = vmax.f32 %v5348_v1, %v5254_v33  ;;  %v2138_v26 = vmax.f32 %v5351_v54, %v5258_v2 }
 0x142   : > { %2946 = vst.msk [vmem:[%s4339_s17 + $0x48] sm:$0xff] %vm2936_vm4, %v2917_v39  ;;  %v5381_v9 = vmax.f32 %v1223_v60, %v5317_v14  ;;  %v1266_v23 = vmax.f32 %v1224_v25, %v5319_v42  ;;  %v5385_v37 = vmax.f32 %v2049_v40, %v7182_v7  ;;  %v361_v22 = vrot.slane %v5365_v50, 1 }
 0x143   : > { %v5388_v59 = vmax.f32 %v2831_v45, %v7183_v51  ;;  %v5391_v35 = vmax.f32 %v1225_v29, %v5342_v0  ;;  %v362_v44 = vrot.slane %v5368_v43, 1  ;;  %v364_v55 = vrot.slane %v5371_v27, 1  ;;  %v5414_v45 = vld [vmem:[%s3442_s13 + $0x198] sm:$0xf] }
 0x144   : > { %7181 = vst [vmem:[#allocation39_spill] sm:$0xff] %v5381_v9  ;;  %v1373_v20 = vrot.slane %v5381_v9, 1  ;;  %v1374_v38 = vrot.slane %v1266_v23, 1  ;;  %v1549_v10 = vrot.slane %v5381_v9, 2  ;;  %v1550_v6 = vrot.slane %v1266_v23, 2 }
 0x145   : > { %7184 = vst [vmem:[#allocation30_spill] sm:$0xff] %v5391_v35  ;;  %v1376_v62 = vrot.slane %v5391_v35, 1  ;;  %v1552_v5 = vrot.slane %v5391_v35, 2  ;;  %v1725_v32 = vrot.slane %v5381_v9, 3  ;;  %v1726_v13 = vrot.slane %v1266_v23, 3 }
 0x146   : > { %3304 = vst.msk [vmem:[%s4339_s17 + $0x294] sm:$0xff] %vm2936_vm4, %v1266_v23  ;;  %v1375_v47 = vsel %vm276_vm0, %v1373_v20, %v1374_v38  ;;  %v1551_v49 = vsel %vm485_vm1, %v1549_v10, %v1550_v6  ;;  %v1728_v56 = vrot.slane %v5391_v35, 3  ;;  %v1901_v39 = vrot.slane %v5381_v9, 4  ;;  %v7185_v10 = vld [vmem:[#allocation33_spill] sm:$0xff] }
 0x147   : > { %v1377_v34 = vsel %vm276_vm0, %v1374_v38, %v1376_v62  ;;  %v1483_v48 = vmax.f32 %v5381_v9, %v1375_v47  ;;  %v1553_v18 = vsel %vm485_vm1, %v1550_v6, %v1552_v5  ;;  %v1727_v1 = vsel %vm694_vm2, %v1725_v32, %v1726_v13 }
 0x148   : > { %v1484_v54 = vmax.f32 %v1266_v23, %v1377_v34  ;;  %v1729_v60 = vsel %vm694_vm2, %v1726_v13, %v1728_v56  ;;  %v1902_v25 = vrot.slane %v1266_v23, 4  ;;  %v1904_v40 = vrot.slane %v5391_v35, 4 }
 0x149   : > { %v1659_v29 = vmax.f32 %v1483_v48, %v1551_v49  ;;  %v1485_v20 = vmax.f32 %v5391_v35, %v1376_v62  ;;  %v2139_v38 = vmax.f32 %v5385_v37, %v7185_v10  ;;  %v363_v23 = vsel %vm276_vm0, %v361_v22, %v362_v44 }
 0x14a   : > { %v1660_v6 = vmax.f32 %v1484_v54, %v1553_v18  ;;  %v1903_v32 = vsel %vm903_vm3, %v1901_v39, %v1902_v25  ;;  %v1905_v34 = vsel %vm903_vm3, %v1902_v25, %v1904_v40  ;;  %v365_v9 = vsel %vm276_vm0, %v362_v44, %v364_v55 }
 0x14b   : > { %v1835_v13 = vmax.f32 %v1659_v29, %v1727_v1  ;;  %v1661_v21 = vmax.f32 %v1485_v20, %v1552_v5  ;;  %v366_v49 = vrot.slane %v5414_v45, 1  ;;  %v473_v48 = vmax.f32 %v5365_v50, %v363_v23 }
 0x14c   : > { %v1836_v62 = vmax.f32 %v1660_v6, %v1729_v60  ;;  %v474_v37 = vmax.f32 %v5368_v43, %v365_v9  ;;  %v570_v47 = vrot.slane %v5365_v50, 2  ;;  %v571_v22 = vrot.slane %v5368_v43, 2 }
 0x14d   : > { %v5429_v18 = vmax.f32 %v1835_v13, %v1903_v32  ;;  %v1837_v39 = vmax.f32 %v1661_v21, %v1728_v56  ;;  %v367_v54 = vsel %vm276_vm0, %v364_v55, %v366_v49  ;;  %v573_v5 = vrot.slane %v5371_v27, 2 }
 0x14e   : > { %v5433_v1 = vmax.f32 %v1836_v62, %v1905_v34  ;;  %v475_v44 = vmax.f32 %v5371_v27, %v367_v54  ;;  %v575_v60 = vrot.slane %v5414_v45, 2  ;;  %v572_v21 = vsel %vm485_vm1, %v570_v47, %v571_v22 }
 0x14f   : > { %7186 = vst [vmem:[#allocation40_spill] sm:$0xff] %v5429_v18  ;;  %v5439_v25 = vmax.f32 %v2137_v63, %v5429_v18  ;;  %v5441_v9 = vmax.f32 %v1837_v39, %v1904_v40  ;;  %v779_v55 = vrot.slane %v5365_v50, 3  ;;  %v574_v29 = vsel %vm485_vm1, %v571_v22, %v573_v5 }
 0x150   : > { %7187 = vst [vmem:[#allocation41_spill] sm:$0xff] %v5433_v1  ;;  %v2180_v56 = vmax.f32 %v2138_v26, %v5433_v1  ;;  %v576_v20 = vsel %vm485_vm1, %v573_v5, %v575_v60  ;;  %v682_v6 = vmax.f32 %v473_v48, %v572_v21  ;;  %v683_v62 = vmax.f32 %v474_v37, %v574_v29 }
 0x151   : > { %7188 = vst [vmem:[#allocation42_spill] sm:$0xff] %v5439_v25  ;;  %v2283_v32 = vrot.slane %v5439_v25, 1  ;;  %v2427_v34 = vrot.slane %v5439_v25, 2  ;;  %v2571_v63 = vrot.slane %v5439_v25, 3  ;;  %v2715_v40 = vrot.slane %v5439_v25, 4 }
 0x152   : > { %7189 = vst [vmem:[#allocation43_spill] sm:$0xff] %v5441_v9  ;;  %v2284_v23 = vrot.slane %v2180_v56, 1  ;;  %v2428_v13 = vrot.slane %v2180_v56, 2  ;;  %v2572_v47 = vrot.slane %v2180_v56, 3  ;;  %v2716_v49 = vrot.slane %v2180_v56, 4 }
 0x153   : > { %3250 = vst.msk [vmem:[%s4339_s17 + $0x176] sm:$0xff] %vm2936_vm4, %v2180_v56  ;;  %v5455_v26 = vmax.f32 %v2139_v38, %v5441_v9  ;;  %v684_v39 = vmax.f32 %v475_v44, %v576_v20  ;;  %v780_v48 = vrot.slane %v5368_v43, 3  ;;  %v782_v29 = vrot.slane %v5371_v27, 3 }
 0x154   : > { %v2285_v54 = vsel %vm276_vm0, %v2283_v32, %v2284_v23  ;;  %v2429_v22 = vsel %vm485_vm1, %v2427_v34, %v2428_v13  ;;  %v2573_v5 = vsel %vm694_vm2, %v2571_v63, %v2572_v47  ;;  %v2717_v60 = vsel %vm903_vm3, %v2715_v40, %v2716_v49 }
 0x155   : > { %7190 = vst [vmem:[#allocation44_spill] sm:$0xff] %v5455_v26  ;;  %v2374_v21 = vmax.f32 %v5439_v25, %v2285_v54  ;;  %v2286_v35 = vrot.slane %v5455_v26, 1  ;;  %v2430_v4 = vrot.slane %v5455_v26, 2  ;;  %v2574_v38 = vrot.slane %v5455_v26, 3 }
 0x156   : > { %v2718_v37 = vrot.slane %v5455_v26, 4  ;;  %v781_v44 = vsel %vm694_vm2, %v779_v55, %v780_v48  ;;  %v784_v20 = vrot.slane %v5414_v45, 3  ;;  %v783_v61 = vsel %vm694_vm2, %v780_v48, %v782_v29 }
 0x157   : > { %v2518_v32 = vmax.f32 %v2374_v21, %v2429_v22  ;;  %v2287_v34 = vsel %vm276_vm0, %v2284_v23, %v2286_v35  ;;  %v2431_v63 = vsel %vm485_vm1, %v2428_v13, %v2430_v4  ;;  %v2575_v40 = vsel %vm694_vm2, %v2572_v47, %v2574_v38 }
 0x158   : > { %v2375_v54 = vmax.f32 %v2180_v56, %v2287_v34  ;;  %v2719_v25 = vsel %vm903_vm3, %v2716_v49, %v2718_v37  ;;  %v785_v26 = vsel %vm694_vm2, %v782_v29, %v784_v20  ;;  %v891_v55 = vmax.f32 %v682_v6, %v781_v44  ;;  %v7195_v37 = vld [vmem:[#allocation32_spill] sm:$0xff]  ;;  %v7198_v34 = vld [vmem:[#allocation41_spill] sm:$0xff] }
 0x159   : > { %v2662_v9 = vmax.f32 %v2518_v32, %v2573_v5  ;;  %v892_v1 = vmax.f32 %v683_v62, %v783_v61  ;;  %v893_v18 = vmax.f32 %v684_v39, %v785_v26  ;;  %v988_v22 = vrot.slane %v5365_v50, 4  ;;  %v7197_v20 = vld [vmem:[#allocation40_spill] sm:$0xff] }
 0x15a   : > { %v2519_v51 = vmax.f32 %v2375_v54, %v2431_v63  ;;  %v989_v35 = vrot.slane %v5368_v43, 4  ;;  %v991_v4 = vrot.slane %v5371_v27, 4  ;;  %v993_v56 = vrot.slane %v5414_v45, 4 }
 0x15b   : > { %v5479_v23 = vmax.f32 %v2662_v9, %v2717_v60  ;;  %v1136_v13 = vmax.f32 %v5156_v30, %v4817_v58  ;;  %v1137_v6 = vmax.f32 %v5158_v41, %v4819_v53  ;;  %v1138_v43 = vmax.f32 %v5162_v11, %v4826_v52 }
 0x15c   : > { %v2663_v61 = vmax.f32 %v2519_v51, %v2575_v40  ;;  %v990_v47 = vsel %vm903_vm3, %v988_v22, %v989_v35  ;;  %v992_v50 = vsel %vm903_vm3, %v989_v35, %v991_v4  ;;  %v7191_v27 = vmax.f32 %v5354_v28, %v5307_v16 }
 0x15d   : > { %v994_v45 = vsel %vm903_vm3, %v991_v4, %v993_v56  ;;  %v5495_v49 = vmax.f32 %v891_v55, %v990_v47  ;;  %v5497_v58 = vmax.f32 %v892_v1, %v992_v50  ;;  %v1181_v26 = vmax.f32 %v1136_v13, %v4978_v24 }
 0x15e   : > { %v2918_v9 = vmax.f32 %v7191_v27, %v5479_v23  ;;  %v5499_v53 = vmax.f32 %v2663_v61, %v2719_v25  ;;  %v5501_v51 = vmax.f32 %v893_v18, %v994_v45  ;;  %v1182_v52 = vmax.f32 %v1137_v6, %v4980_v17 }
 0x15f   : > { %v1183_v28 = vmax.f32 %v1138_v43, %v5003_v12  ;;  %v2050_v62 = vmax.f32 %v5254_v33, %v7153_v3  ;;  %v2051_v1 = vmax.f32 %v5258_v2, %v7154_v8  ;;  %v2832_v25 = vmax.f32 %v5307_v16, %v4968_v46 }
 0x160   : > { %7192 = vst [vmem:[#allocation45_spill] sm:$0xff] %v5499_v53  ;;  %v7193_v18 = vmax.f32 %v5388_v59, %v5321_v57  ;;  %v1226_v48 = vmax.f32 %v1181_v26, %v5317_v14  ;;  %v1227_v5 = vmax.f32 %v1182_v52, %v5319_v42  ;;  %v2052_v60 = vmax.f32 %v7185_v10, %v7182_v7  ;;  %v5565_v52 = vld [vmem:[%s3442_s13 + $0x1a0] sm:$0xff] }
 0x161   : > { %2947 = vst.msk [vmem:[%s4339_s17 + $0x50] sm:$0xff] %vm2936_vm4, %v2918_v9  ;;  %v1228_v3 = vmax.f32 %v1183_v28, %v5342_v0  ;;  %v2095_v21 = vmax.f32 %v2050_v62, %v7171_v31  ;;  %v5525_v8 = vmax.f32 %v2051_v1, %v7172_v36  ;;  %v5528_v46 = vmax.f32 %v2832_v25, %v5140_v15 }
 0x162   : > { %v2919_v39 = vmax.f32 %v7193_v18, %v5499_v53  ;;  %v5533_v59 = vmax.f32 %v1226_v48, %v5495_v49  ;;  %v1269_v38 = vmax.f32 %v1227_v5, %v5497_v58  ;;  %v5537_v7 = vmax.f32 %v2052_v60, %v7173_v19  ;;  %v5570_v18 = vld [vmem:[%s3442_s13 + $0x1a8] sm:$0xff] }
 0x163   : > { %v2833_v44 = vmax.f32 %v5321_v57, %v7195_v37  ;;  %v5542_v29 = vmax.f32 %v1228_v3, %v5501_v51  ;;  %v2140_v32 = vmax.f32 %v2095_v21, %v7197_v20  ;;  %v2141_v63 = vmax.f32 %v5525_v8, %v7198_v34  ;;  %v7199_v5 = vld [vmem:[#allocation43_spill] sm:$0xff]  ;;  %v7200_v3 = vld [vmem:[#allocation37_spill] sm:$0xff]  ;;  %v5579_v8 = vld [vmem:[%s3442_s13 + $0x1b0] sm:$0xff] }
 0x164   : > { %2948 = vst.msk [vmem:[%s4339_s17 + $0x58] sm:$0xff] %vm2936_vm4, %v2919_v39  ;;  %v1378_v54 = vrot.slane %v5533_v59, 1  ;;  %v1379_v55 = vrot.slane %v1269_v38, 1  ;;  %v1554_v22 = vrot.slane %v5533_v59, 2  ;;  %v1555_v35 = vrot.slane %v1269_v38, 2 }
 0x165   : > { %7194 = vst [vmem:[#allocation46_spill] sm:$0xff] %v5533_v59  ;;  %v1381_v4 = vrot.slane %v5542_v29, 1  ;;  %v1557_v56 = vrot.slane %v5542_v29, 2  ;;  %v1730_v13 = vrot.slane %v5533_v59, 3  ;;  %v1731_v6 = vrot.slane %v1269_v38, 3 }
 0x166   : > { %7196 = vst [vmem:[#allocation32_spill] sm:$0xff] %v5542_v29  ;;  %v1380_v61 = vsel %vm276_vm0, %v1378_v54, %v1379_v55  ;;  %v1556_v47 = vsel %vm485_vm1, %v1554_v22, %v1555_v35  ;;  %v1733_v50 = vrot.slane %v5542_v29, 3  ;;  %v1906_v43 = vrot.slane %v5533_v59, 4  ;;  %v5582_v37 = vld [vmem:[%s3442_s13 + $0x1b8] sm:$0xf] }
 0x167   : > { %3307 = vst.msk [vmem:[%s4339_s17 + $0x2a4] sm:$0xff] %vm2936_vm4, %v1269_v38  ;;  %v1382_v27 = vsel %vm276_vm0, %v1379_v55, %v1381_v4  ;;  %v1486_v9 = vmax.f32 %v5533_v59, %v1380_v61  ;;  %v1558_v45 = vsel %vm485_vm1, %v1555_v35, %v1557_v56  ;;  %v1732_v26 = vsel %vm694_vm2, %v1730_v13, %v1731_v6 }
 0x168   : > { %v1487_v28 = vmax.f32 %v1269_v38, %v1382_v27  ;;  %v1734_v62 = vsel %vm694_vm2, %v1731_v6, %v1733_v50  ;;  %v1907_v1 = vrot.slane %v1269_v38, 4  ;;  %v1909_v25 = vrot.slane %v5542_v29, 4 }
 0x169   : > { %v1662_v39 = vmax.f32 %v1486_v9, %v1556_v47  ;;  %v1488_v48 = vmax.f32 %v5542_v29, %v1381_v4  ;;  %v2142_v60 = vmax.f32 %v5537_v7, %v7199_v5  ;;  %v5576_v21 = vmax.f32 %v2833_v44, %v7200_v3 }
 0x16a   : > { %v1663_v54 = vmax.f32 %v1487_v28, %v1558_v45  ;;  %v1908_v38 = vsel %vm903_vm3, %v1906_v43, %v1907_v1  ;;  %v1910_v55 = vsel %vm903_vm3, %v1907_v1, %v1909_v25  ;;  %v368_v22 = vrot.slane %v5565_v52, 1 }
 0x16b   : > { %v1838_v35 = vmax.f32 %v1662_v39, %v1732_v26  ;;  %v1664_v13 = vmax.f32 %v1488_v48, %v1557_v56  ;;  %v369_v7 = vrot.slane %v5570_v18, 1  ;;  %v371_v6 = vrot.slane %v5579_v8, 1 }
 0x16c   : > { %v1839_v44 = vmax.f32 %v1663_v54, %v1734_v62  ;;  %v373_v61 = vrot.slane %v5582_v37, 1  ;;  %v577_v47 = vrot.slane %v5565_v52, 2  ;;  %v578_v45 = vrot.slane %v5570_v18, 2 }
 0x16d   : > { %v5593_v27 = vmax.f32 %v1838_v35, %v1908_v38  ;;  %v1840_v43 = vmax.f32 %v1664_v13, %v1733_v50  ;;  %v370_v9 = vsel %vm276_vm0, %v368_v22, %v369_v7  ;;  %v372_v26 = vsel %vm276_vm0, %v369_v7, %v371_v6 }
 0x16e   : > { %v5597_v56 = vmax.f32 %v1839_v44, %v1910_v55  ;;  %v374_v28 = vsel %vm276_vm0, %v371_v6, %v373_v61  ;;  %v476_v62 = vmax.f32 %v5565_v52, %v370_v9  ;;  %v477_v50 = vmax.f32 %v5570_v18, %v372_v26 }
 0x16f   : > { %v5603_v1 = vmax.f32 %v2140_v32, %v5593_v27  ;;  %v5605_v39 = vmax.f32 %v1840_v43, %v1909_v25  ;;  %v478_v48 = vmax.f32 %v5579_v8, %v374_v28  ;;  %v579_v38 = vsel %vm485_vm1, %v577_v47, %v578_v45 }
 0x170   : > { %v2183_v54 = vmax.f32 %v2141_v63, %v5597_v56  ;;  %v580_v55 = vrot.slane %v5579_v8, 2  ;;  %v582_v22 = vrot.slane %v5582_v37, 2  ;;  %v685_v9 = vmax.f32 %v476_v62, %v579_v38 }
 0x171   : > { %7201 = vst [vmem:[#allocation40_spill] sm:$0xff] %v5603_v1  ;;  %v2288_v35 = vrot.slane %v5603_v1, 1  ;;  %v2432_v32 = vrot.slane %v5603_v1, 2  ;;  %v2576_v13 = vrot.slane %v5603_v1, 3  ;;  %v2720_v25 = vrot.slane %v5603_v1, 4 }
 0x172   : > { %7202 = vst [vmem:[#allocation41_spill] sm:$0xff] %v5605_v39  ;;  %v2289_v7 = vrot.slane %v2183_v54, 1  ;;  %v2433_v44 = vrot.slane %v2183_v54, 2  ;;  %v2577_v6 = vrot.slane %v2183_v54, 3  ;;  %v2721_v61 = vrot.slane %v2183_v54, 4 }
 0x173   : > { %3253 = vst.msk [vmem:[%s4339_s17 + $0x186] sm:$0xff] %vm2936_vm4, %v2183_v54  ;;  %v5620_v63 = vmax.f32 %v2142_v60, %v5605_v39  ;;  %v581_v47 = vsel %vm485_vm1, %v578_v45, %v580_v55  ;;  %v583_v43 = vsel %vm485_vm1, %v580_v55, %v582_v22  ;;  %v786_v38 = vrot.slane %v5565_v52, 3 }
 0x174   : > { %v2290_v26 = vsel %vm276_vm0, %v2288_v35, %v2289_v7  ;;  %v2434_v28 = vsel %vm485_vm1, %v2432_v32, %v2433_v44  ;;  %v2578_v4 = vsel %vm694_vm2, %v2576_v13, %v2577_v6  ;;  %v2722_v40 = vsel %vm903_vm3, %v2720_v25, %v2721_v61 }
 0x175   : > { %7203 = vst [vmem:[#allocation43_spill] sm:$0xff] %v5620_v63  ;;  %v2376_v29 = vmax.f32 %v5603_v1, %v2290_v26  ;;  %v2291_v59 = vrot.slane %v5620_v63, 1  ;;  %v2435_v60 = vrot.slane %v5620_v63, 2  ;;  %v2579_v39 = vrot.slane %v5620_v63, 3 }
 0x176   : > { %v2723_v45 = vrot.slane %v5620_v63, 4  ;;  %v686_v55 = vmax.f32 %v477_v50, %v581_v47  ;;  %v687_v62 = vmax.f32 %v478_v48, %v583_v43  ;;  %v787_v1 = vrot.slane %v5570_v18, 3 }
 0x177   : > { %v2520_v22 = vmax.f32 %v2376_v29, %v2434_v28  ;;  %v2292_v35 = vsel %vm276_vm0, %v2289_v7, %v2291_v59  ;;  %v2436_v32 = vsel %vm485_vm1, %v2433_v44, %v2435_v60  ;;  %v2580_v13 = vsel %vm694_vm2, %v2577_v6, %v2579_v39 }
 0x178   : > { %v2377_v25 = vmax.f32 %v2183_v54, %v2292_v35  ;;  %v2724_v26 = vsel %vm903_vm3, %v2721_v61, %v2723_v45  ;;  %v789_v57 = vrot.slane %v5579_v8, 3  ;;  %v791_v50 = vrot.slane %v5582_v37, 3 }
 0x179   : > { %v2664_v10 = vmax.f32 %v2520_v22, %v2578_v4  ;;  %v995_v48 = vrot.slane %v5565_v52, 4  ;;  %v996_v29 = vrot.slane %v5570_v18, 4  ;;  %v788_v59 = vsel %vm694_vm2, %v786_v38, %v787_v1 }
 0x17a   : > { %v2521_v47 = vmax.f32 %v2377_v25, %v2436_v32  ;;  %v790_v7 = vsel %vm694_vm2, %v787_v1, %v789_v57  ;;  %v998_v39 = vrot.slane %v5579_v8, 4  ;;  %v792_v44 = vsel %vm694_vm2, %v789_v57, %v791_v50  ;;  %v5707_v50 = vld [vmem:[%s3442_s13 + $0x1c8] sm:$0xff] }
 0x17b   : > { %v5646_v54 = vmax.f32 %v2664_v10, %v2722_v40  ;;  %v894_v6 = vmax.f32 %v685_v9, %v788_v59  ;;  %v895_v4 = vmax.f32 %v686_v55, %v790_v7  ;;  %v896_v43 = vmax.f32 %v687_v62, %v792_v44 }
 0x17c   : > { %v2665_v61 = vmax.f32 %v2521_v47, %v2580_v13  ;;  %v997_v52 = vsel %vm903_vm3, %v995_v48, %v996_v29  ;;  %v999_v18 = vsel %vm903_vm3, %v996_v29, %v998_v39  ;;  %v7204_v28 = vmax.f32 %v5528_v46, %v5479_v23  ;;  %v5710_v48 = vld [vmem:[%s3442_s13 + $0x1d0] sm:$0xff] }
 0x17d   : > { %v1000_v8 = vrot.slane %v5582_v37, 4  ;;  %v5656_v10 = vmax.f32 %v894_v6, %v997_v52  ;;  %v5658_v40 = vmax.f32 %v895_v4, %v999_v18  ;;  %v1139_v9 = vmax.f32 %v5317_v14, %v4978_v24  ;;  %v7209_v6 = vld [vmem:[#allocation28_spill] sm:$0xff] }
 0x17e   : > { %v2920_v1 = vmax.f32 %v7204_v28, %v5646_v54  ;;  %v5660_v57 = vmax.f32 %v2665_v61, %v2724_v26  ;;  %v1140_v60 = vmax.f32 %v5319_v42, %v4980_v17  ;;  %v1141_v45 = vmax.f32 %v5342_v0, %v5003_v12  ;;  %v5704_v26 = vld [vmem:[%s3442_s13 + $0x1c0] sm:$0xff] }
 0x17f   : > { %v1001_v46 = vsel %vm903_vm3, %v998_v39, %v1000_v8  ;;  %v2053_v37 = vmax.f32 %v7197_v20, %v7171_v31  ;;  %v2054_v55 = vmax.f32 %v7198_v34, %v7172_v36  ;;  %v2834_v24 = vmax.f32 %v5479_v23, %v5140_v15  ;;  %v7208_v39 = vld [vmem:[#allocation33_spill] sm:$0xff] }
 0x180   : > { %7205 = vst [vmem:[#allocation37_spill] sm:$0xff] %v5660_v57  ;;  %v7206_v17 = vmax.f32 %v5576_v21, %v5499_v53  ;;  %v5681_v62 = vmax.f32 %v896_v43, %v1001_v46  ;;  %v1184_v38 = vmax.f32 %v1139_v9, %v5156_v30  ;;  %v1185_v31 = vmax.f32 %v1140_v60, %v5158_v41 }
 0x181   : > { %2949 = vst.msk [vmem:[%s4339_s17 + $0x60] sm:$0xff] %vm2936_vm4, %v2920_v1  ;;  %v1186_v22 = vmax.f32 %v1141_v45, %v5162_v11  ;;  %v5687_v36 = vmax.f32 %v2053_v37, %v5254_v33  ;;  %v5690_v35 = vmax.f32 %v2054_v55, %v5258_v2  ;;  %v5693_v15 = vmax.f32 %v2834_v24, %v5307_v16 }
 0x182   : > { %v2921_v12 = vmax.f32 %v7206_v17, %v5660_v57  ;;  %v1229_v21 = vmax.f32 %v1184_v38, %v5495_v49  ;;  %v1230_v32 = vmax.f32 %v1185_v31, %v5497_v58  ;;  %v2055_v13 = vmax.f32 %v7199_v5, %v7173_v19 }
 0x183   : > { %v2835_v25 = vmax.f32 %v5499_v53, %v7200_v3  ;;  %v1231_v29 = vmax.f32 %v1186_v22, %v5501_v51  ;;  %v2143_v47 = vmax.f32 %v5687_v36, %v5593_v27  ;;  %v2144_v59 = vmax.f32 %v5690_v35, %v5597_v56 }
 0x184   : > { %2950 = vst.msk [vmem:[%s4339_s17 + $0x68] sm:$0xff] %vm2936_vm4, %v2921_v12  ;;  %v5720_v3 = vmax.f32 %v1229_v21, %v5656_v10  ;;  %v1272_v7 = vmax.f32 %v1230_v32, %v5658_v40  ;;  %v5724_v44 = vmax.f32 %v2055_v13, %v7208_v39  ;;  %v375_v43 = vrot.slane %v5704_v26, 1 }
 0x185   : > { %v5727_v4 = vmax.f32 %v2835_v25, %v7209_v6  ;;  %v5730_v61 = vmax.f32 %v1231_v29, %v5681_v62  ;;  %v376_v52 = vrot.slane %v5707_v50, 1  ;;  %v378_v18 = vrot.slane %v5710_v48, 1  ;;  %v5753_v25 = vld [vmem:[%s3442_s13 + $0x1d8] sm:$0xf] }
 0x186   : > { %7207 = vst [vmem:[#allocation47_spill] sm:$0xff] %v5720_v3  ;;  %v1383_v28 = vrot.slane %v5720_v3, 1  ;;  %v1384_v1 = vrot.slane %v1272_v7, 1  ;;  %v1559_v8 = vrot.slane %v5720_v3, 2  ;;  %v1560_v9 = vrot.slane %v1272_v7, 2 }
 0x187   : > { %7210 = vst [vmem:[#allocation33_spill] sm:$0xff] %v5730_v61  ;;  %v1386_v60 = vrot.slane %v5730_v61, 1  ;;  %v1562_v45 = vrot.slane %v5730_v61, 2  ;;  %v1735_v46 = vrot.slane %v5720_v3, 3  ;;  %v1736_v37 = vrot.slane %v1272_v7, 3 }
 0x188   : > { %3310 = vst.msk [vmem:[%s4339_s17 + $0x2b4] sm:$0xff] %vm2936_vm4, %v1272_v7  ;;  %v1385_v55 = vsel %vm276_vm0, %v1383_v28, %v1384_v1  ;;  %v1561_v24 = vsel %vm485_vm1, %v1559_v8, %v1560_v9  ;;  %v1738_v17 = vrot.slane %v5730_v61, 3  ;;  %v1911_v12 = vrot.slane %v5720_v3, 4  ;;  %v7211_v8 = vld [vmem:[#allocation41_spill] sm:$0xff] }
 0x189   : > { %v1387_v38 = vsel %vm276_vm0, %v1384_v1, %v1386_v60  ;;  %v1489_v31 = vmax.f32 %v5720_v3, %v1385_v55  ;;  %v1563_v22 = vsel %vm485_vm1, %v1560_v9, %v1562_v45  ;;  %v1737_v36 = vsel %vm694_vm2, %v1735_v46, %v1736_v37 }
 0x18a   : > { %v1490_v35 = vmax.f32 %v1272_v7, %v1387_v38  ;;  %v1739_v21 = vsel %vm694_vm2, %v1736_v37, %v1738_v17  ;;  %v1912_v32 = vrot.slane %v1272_v7, 4  ;;  %v1914_v13 = vrot.slane %v5730_v61, 4 }
 0x18b   : > { %v1665_v29 = vmax.f32 %v1489_v31, %v1561_v24  ;;  %v1491_v28 = vmax.f32 %v5730_v61, %v1386_v60  ;;  %v2145_v1 = vmax.f32 %v5724_v44, %v7211_v8  ;;  %v377_v7 = vsel %vm276_vm0, %v375_v43, %v376_v52 }
 0x18c   : > { %v1666_v9 = vmax.f32 %v1490_v35, %v1563_v22  ;;  %v1913_v46 = vsel %vm903_vm3, %v1911_v12, %v1912_v32  ;;  %v1915_v38 = vsel %vm903_vm3, %v1912_v32, %v1914_v13  ;;  %v379_v3 = vsel %vm276_vm0, %v376_v52, %v378_v18 }
 0x18d   : > { %v1841_v37 = vmax.f32 %v1665_v29, %v1737_v36  ;;  %v1667_v19 = vmax.f32 %v1491_v28, %v1562_v45  ;;  %v380_v24 = vrot.slane %v5753_v25, 1  ;;  %v479_v31 = vmax.f32 %v5704_v26, %v377_v7 }
 0x18e   : > { %v1842_v60 = vmax.f32 %v1666_v9, %v1739_v21  ;;  %v480_v44 = vmax.f32 %v5707_v50, %v379_v3  ;;  %v584_v55 = vrot.slane %v5704_v26, 2  ;;  %v585_v43 = vrot.slane %v5707_v50, 2 }
 0x18f   : > { %v5768_v22 = vmax.f32 %v1841_v37, %v1913_v46  ;;  %v1843_v12 = vmax.f32 %v1667_v19, %v1738_v17  ;;  %v381_v35 = vsel %vm276_vm0, %v378_v18, %v380_v24  ;;  %v587_v45 = vrot.slane %v5710_v48, 2 }
 0x190   : > { %v5772_v36 = vmax.f32 %v1842_v60, %v1915_v38  ;;  %v481_v52 = vmax.f32 %v5710_v48, %v381_v35  ;;  %v589_v21 = vrot.slane %v5753_v25, 2  ;;  %v586_v19 = vsel %vm485_vm1, %v584_v55, %v585_v43 }
 0x191   : > { %7212 = vst [vmem:[#allocation48_spill] sm:$0xff] %v5768_v22  ;;  %v5778_v32 = vmax.f32 %v2143_v47, %v5768_v22  ;;  %v5780_v3 = vmax.f32 %v1843_v12, %v1914_v13  ;;  %v793_v18 = vrot.slane %v5704_v26, 3  ;;  %v588_v29 = vsel %vm485_vm1, %v585_v43, %v587_v45 }
 0x192   : > { %7213 = vst [vmem:[#allocation49_spill] sm:$0xff] %v5772_v36  ;;  %v2186_v17 = vmax.f32 %v2144_v59, %v5772_v36  ;;  %v590_v28 = vsel %vm485_vm1, %v587_v45, %v589_v21  ;;  %v688_v9 = vmax.f32 %v479_v31, %v586_v19  ;;  %v689_v60 = vmax.f32 %v480_v44, %v588_v29 }
 0x193   : > { %7214 = vst [vmem:[#allocation50_spill] sm:$0xff] %v5778_v32  ;;  %v2293_v46 = vrot.slane %v5778_v32, 1  ;;  %v2437_v38 = vrot.slane %v5778_v32, 2  ;;  %v2581_v47 = vrot.slane %v5778_v32, 3  ;;  %v2725_v13 = vrot.slane %v5778_v32, 4 }
 0x194   : > { %7215 = vst [vmem:[#allocation51_spill] sm:$0xff] %v5780_v3  ;;  %v2294_v7 = vrot.slane %v2186_v17, 1  ;;  %v2438_v37 = vrot.slane %v2186_v17, 2  ;;  %v2582_v55 = vrot.slane %v2186_v17, 3  ;;  %v2726_v24 = vrot.slane %v2186_v17, 4 }
 0x195   : > { %3256 = vst.msk [vmem:[%s4339_s17 + $0x196] sm:$0xff] %vm2936_vm4, %v2186_v17  ;;  %v5794_v59 = vmax.f32 %v2145_v1, %v5780_v3  ;;  %v690_v12 = vmax.f32 %v481_v52, %v590_v28  ;;  %v794_v31 = vrot.slane %v5707_v50, 3  ;;  %v796_v29 = vrot.slane %v5710_v48, 3 }
 0x196   : > { %v2295_v35 = vsel %vm276_vm0, %v2293_v46, %v2294_v7  ;;  %v2439_v43 = vsel %vm485_vm1, %v2437_v38, %v2438_v37  ;;  %v2583_v45 = vsel %vm694_vm2, %v2581_v47, %v2582_v55  ;;  %v2727_v21 = vsel %vm903_vm3, %v2725_v13, %v2726_v24 }
 0x197   : > { %7216 = vst [vmem:[#allocation52_spill] sm:$0xff] %v5794_v59  ;;  %v2378_v19 = vmax.f32 %v5778_v32, %v2295_v35  ;;  %v2296_v61 = vrot.slane %v5794_v59, 1  ;;  %v2440_v63 = vrot.slane %v5794_v59, 2  ;;  %v2584_v1 = vrot.slane %v5794_v59, 3 }
 0x198   : > { %v2728_v44 = vrot.slane %v5794_v59, 4  ;;  %v795_v52 = vsel %vm694_vm2, %v793_v18, %v794_v31  ;;  %v798_v28 = vrot.slane %v5753_v25, 3  ;;  %v797_v53 = vsel %vm694_vm2, %v794_v31, %v796_v29 }
 0x199   : > { %v2522_v46 = vmax.f32 %v2378_v19, %v2439_v43  ;;  %v2297_v38 = vsel %vm276_vm0, %v2294_v7, %v2296_v61  ;;  %v2441_v47 = vsel %vm485_vm1, %v2438_v37, %v2440_v63  ;;  %v2585_v13 = vsel %vm694_vm2, %v2582_v55, %v2584_v1 }
 0x19a   : > { %v2379_v35 = vmax.f32 %v2186_v17, %v2297_v38  ;;  %v2729_v32 = vsel %vm903_vm3, %v2726_v24, %v2728_v44  ;;  %v799_v59 = vsel %vm694_vm2, %v796_v29, %v798_v28  ;;  %v897_v18 = vmax.f32 %v688_v9, %v795_v52  ;;  %v7221_v44 = vld [vmem:[#allocation28_spill] sm:$0xff]  ;;  %v7224_v38 = vld [vmem:[#allocation49_spill] sm:$0xff] }
 0x19b   : > { %v2666_v3 = vmax.f32 %v2522_v46, %v2583_v45  ;;  %v898_v36 = vmax.f32 %v689_v60, %v797_v53  ;;  %v899_v22 = vmax.f32 %v690_v12, %v799_v59  ;;  %v1002_v43 = vrot.slane %v5704_v26, 4  ;;  %v7223_v28 = vld [vmem:[#allocation48_spill] sm:$0xff] }
 0x19c   : > { %v2523_v6 = vmax.f32 %v2379_v35, %v2441_v47  ;;  %v1003_v61 = vrot.slane %v5707_v50, 4  ;;  %v1005_v63 = vrot.slane %v5710_v48, 4  ;;  %v1007_v17 = vrot.slane %v5753_v25, 4 }
 0x19d   : > { %v5818_v7 = vmax.f32 %v2666_v3, %v2727_v21  ;;  %v1142_v37 = vmax.f32 %v5495_v49, %v5156_v30  ;;  %v1143_v9 = vmax.f32 %v5497_v58, %v5158_v41  ;;  %v1144_v50 = vmax.f32 %v5501_v51, %v5162_v11 }
 0x19e   : > { %v2667_v53 = vmax.f32 %v2523_v6, %v2585_v13  ;;  %v1004_v55 = vsel %vm903_vm3, %v1002_v43, %v1003_v61  ;;  %v1006_v26 = vsel %vm903_vm3, %v1003_v61, %v1005_v63  ;;  %v7217_v48 = vmax.f32 %v5693_v15, %v5646_v54 }
 0x19f   : > { %v1008_v25 = vsel %vm903_vm3, %v1005_v63, %v1007_v17  ;;  %v5834_v24 = vmax.f32 %v897_v18, %v1004_v55  ;;  %v5836_v30 = vmax.f32 %v898_v36, %v1006_v26  ;;  %v1187_v59 = vmax.f32 %v1142_v37, %v5317_v14 }
 0x1a0   : > { %v2922_v3 = vmax.f32 %v7217_v48, %v5818_v7  ;;  %v5838_v41 = vmax.f32 %v2667_v53, %v2729_v32  ;;  %v5840_v6 = vmax.f32 %v899_v22, %v1008_v25  ;;  %v1188_v11 = vmax.f32 %v1143_v9, %v5319_v42 }
 0x1a1   : > { %v1189_v15 = vmax.f32 %v1144_v50, %v5342_v0  ;;  %v2056_v60 = vmax.f32 %v5593_v27, %v5254_v33  ;;  %v2057_v36 = vmax.f32 %v5597_v56, %v5258_v2  ;;  %v2836_v32 = vmax.f32 %v5646_v54, %v5307_v16 }
 0x1a2   : > { %7218 = vst [vmem:[#allocation53_spill] sm:$0xff] %v5840_v6  ;;  %v7219_v22 = vmax.f32 %v5727_v4, %v5660_v57  ;;  %v1232_v31 = vmax.f32 %v1187_v59, %v5656_v10  ;;  %v1233_v45 = vmax.f32 %v1188_v11, %v5658_v40  ;;  %v2058_v21 = vmax.f32 %v7211_v8, %v7208_v39  ;;  %v5904_v11 = vld [vmem:[%s3442_s13 + $0x1e0] sm:$0xff] }
 0x1a3   : > { %2951 = vst.msk [vmem:[%s4339_s17 + $0x70] sm:$0xff] %vm2936_vm4, %v2922_v3  ;;  %v1234_v33 = vmax.f32 %v1189_v15, %v5681_v62  ;;  %v2101_v19 = vmax.f32 %v2056_v60, %v7197_v20  ;;  %v5864_v2 = vmax.f32 %v2057_v36, %v7198_v34  ;;  %v5867_v16 = vmax.f32 %v2836_v32, %v5479_v23 }
 0x1a4   : > { %v2923_v12 = vmax.f32 %v7219_v22, %v5838_v41  ;;  %v5872_v4 = vmax.f32 %v1232_v31, %v5834_v24  ;;  %v1275_v1 = vmax.f32 %v1233_v45, %v5836_v30  ;;  %v5876_v39 = vmax.f32 %v2058_v21, %v7199_v5  ;;  %v5909_v22 = vld [vmem:[%s3442_s13 + $0x1e8] sm:$0xff] }
 0x1a5   : > { %v2837_v52 = vmax.f32 %v5660_v57, %v7221_v44  ;;  %v5881_v29 = vmax.f32 %v1234_v33, %v5840_v6  ;;  %v2146_v46 = vmax.f32 %v2101_v19, %v7223_v28  ;;  %v2147_v47 = vmax.f32 %v5864_v2, %v7224_v38  ;;  %v7225_v45 = vld [vmem:[#allocation51_spill] sm:$0xff]  ;;  %v7226_v33 = vld [vmem:[#allocation45_spill] sm:$0xff]  ;;  %v5918_v2 = vld [vmem:[%s3442_s13 + $0x1f0] sm:$0xff] }
 0x1a6   : > { %2952 = vst.msk [vmem:[%s4339_s17 + $0x78] sm:$0xff] %vm2936_vm4, %v2923_v12  ;;  %v1388_v35 = vrot.slane %v5872_v4, 1  ;;  %v1389_v18 = vrot.slane %v1275_v1, 1  ;;  %v1564_v43 = vrot.slane %v5872_v4, 2  ;;  %v1565_v61 = vrot.slane %v1275_v1, 2 }
 0x1a7   : > { %7220 = vst [vmem:[#allocation54_spill] sm:$0xff] %v5872_v4  ;;  %v1391_v63 = vrot.slane %v5881_v29, 1  ;;  %v1567_v17 = vrot.slane %v5881_v29, 2  ;;  %v1740_v37 = vrot.slane %v5872_v4, 3  ;;  %v1741_v9 = vrot.slane %v1275_v1, 3 }
 0x1a8   : > { %7222 = vst [vmem:[#allocation28_spill] sm:$0xff] %v5881_v29  ;;  %v1390_v53 = vsel %vm276_vm0, %v1388_v35, %v1389_v18  ;;  %v1566_v55 = vsel %vm485_vm1, %v1564_v43, %v1565_v61  ;;  %v1743_v26 = vrot.slane %v5881_v29, 3  ;;  %v1916_v50 = vrot.slane %v5872_v4, 4  ;;  %v5921_v44 = vld [vmem:[%s3442_s13 + $0x1f8] sm:$0xf] }
 0x1a9   : > { %3313 = vst.msk [vmem:[%s4339_s17 + $0x2c4] sm:$0xff] %vm2936_vm4, %v1275_v1  ;;  %v1392_v48 = vsel %vm276_vm0, %v1389_v18, %v1391_v63  ;;  %v1492_v3 = vmax.f32 %v5872_v4, %v1390_v53  ;;  %v1568_v25 = vsel %vm485_vm1, %v1565_v61, %v1567_v17  ;;  %v1742_v59 = vsel %vm694_vm2, %v1740_v37, %v1741_v9 }
 0x1aa   : > { %v1493_v15 = vmax.f32 %v1275_v1, %v1392_v48  ;;  %v1744_v60 = vsel %vm694_vm2, %v1741_v9, %v1743_v26  ;;  %v1917_v36 = vrot.slane %v1275_v1, 4  ;;  %v1919_v32 = vrot.slane %v5881_v29, 4 }
 0x1ab   : > { %v1668_v12 = vmax.f32 %v1492_v3, %v1566_v55  ;;  %v1494_v31 = vmax.f32 %v5881_v29, %v1391_v63  ;;  %v2148_v21 = vmax.f32 %v5876_v39, %v7225_v45  ;;  %v5915_v19 = vmax.f32 %v2837_v52, %v7226_v33 }
 0x1ac   : > { %v1669_v35 = vmax.f32 %v1493_v15, %v1568_v25  ;;  %v1918_v1 = vsel %vm903_vm3, %v1916_v50, %v1917_v36  ;;  %v1920_v18 = vsel %vm903_vm3, %v1917_v36, %v1919_v32  ;;  %v382_v43 = vrot.slane %v5904_v11, 1 }
 0x1ad   : > { %v1844_v61 = vmax.f32 %v1668_v12, %v1742_v59  ;;  %v1670_v37 = vmax.f32 %v1494_v31, %v1567_v17  ;;  %v383_v39 = vrot.slane %v5909_v22, 1  ;;  %v385_v9 = vrot.slane %v5918_v2, 1 }
 0x1ae   : > { %v1845_v52 = vmax.f32 %v1669_v35, %v1744_v60  ;;  %v387_v53 = vrot.slane %v5921_v44, 1  ;;  %v591_v55 = vrot.slane %v5904_v11, 2  ;;  %v592_v25 = vrot.slane %v5909_v22, 2 }
 0x1af   : > { %v5932_v48 = vmax.f32 %v1844_v61, %v1918_v1  ;;  %v1846_v50 = vmax.f32 %v1670_v37, %v1743_v26  ;;  %v384_v3 = vsel %vm276_vm0, %v382_v43, %v383_v39  ;;  %v386_v59 = vsel %vm276_vm0, %v383_v39, %v385_v9 }
 0x1b0   : > { %v5936_v17 = vmax.f32 %v1845_v52, %v1920_v18  ;;  %v388_v15 = vsel %vm276_vm0, %v385_v9, %v387_v53  ;;  %v482_v60 = vmax.f32 %v5904_v11, %v384_v3  ;;  %v483_v26 = vmax.f32 %v5909_v22, %v386_v59 }
 0x1b1   : > { %v5942_v36 = vmax.f32 %v2146_v46, %v5932_v48  ;;  %v5944_v12 = vmax.f32 %v1846_v50, %v1919_v32  ;;  %v484_v31 = vmax.f32 %v5918_v2, %v388_v15  ;;  %v593_v1 = vsel %vm485_vm1, %v591_v55, %v592_v25 }
 0x1b2   : > { %7227 = vst [vmem:[#allocation48_spill] sm:$0xff] %v5936_v17  ;;  %v2189_v35 = vmax.f32 %v2147_v47, %v5936_v17  ;;  %v594_v18 = vrot.slane %v5918_v2, 2  ;;  %v596_v43 = vrot.slane %v5921_v44, 2  ;;  %v691_v3 = vmax.f32 %v482_v60, %v593_v1 }
 0x1b3   : > { %7228 = vst [vmem:[#allocation49_spill] sm:$0xff] %v5942_v36  ;;  %v2298_v61 = vrot.slane %v5942_v36, 1  ;;  %v2442_v46 = vrot.slane %v5942_v36, 2  ;;  %v2586_v37 = vrot.slane %v5942_v36, 3  ;;  %v2730_v32 = vrot.slane %v5942_v36, 4 }
 0x1b4   : > { %7229 = vst [vmem:[#allocation51_spill] sm:$0xff] %v5944_v12  ;;  %v2299_v39 = vrot.slane %v2189_v35, 1  ;;  %v2443_v52 = vrot.slane %v2189_v35, 2  ;;  %v2587_v9 = vrot.slane %v2189_v35, 3  ;;  %v2731_v53 = vrot.slane %v2189_v35, 4 }
 0x1b5   : > { %3259 = vst.msk [vmem:[%s4339_s17 + $0x1a6] sm:$0xff] %vm2936_vm4, %v2189_v35  ;;  %v5959_v47 = vmax.f32 %v2148_v21, %v5944_v12  ;;  %v595_v55 = vsel %vm485_vm1, %v592_v25, %v594_v18  ;;  %v597_v50 = vsel %vm485_vm1, %v594_v18, %v596_v43  ;;  %v800_v1 = vrot.slane %v5904_v11, 3 }
 0x1b6   : > { %v2300_v59 = vsel %vm276_vm0, %v2298_v61, %v2299_v39  ;;  %v2444_v15 = vsel %vm485_vm1, %v2442_v46, %v2443_v52  ;;  %v2588_v63 = vsel %vm694_vm2, %v2586_v37, %v2587_v9  ;;  %v2732_v13 = vsel %vm903_vm3, %v2730_v32, %v2731_v53 }
 0x1b7   : > { %7230 = vst [vmem:[#allocation45_spill] sm:$0xff] %v5959_v47  ;;  %v2380_v29 = vmax.f32 %v5942_v36, %v2300_v59  ;;  %v2301_v4 = vrot.slane %v5959_v47, 1  ;;  %v2445_v21 = vrot.slane %v5959_v47, 2  ;;  %v2589_v12 = vrot.slane %v5959_v47, 3 }
 0x1b8   : > { %v2733_v25 = vrot.slane %v5959_v47, 4  ;;  %v692_v18 = vmax.f32 %v483_v26, %v595_v55  ;;  %v693_v60 = vmax.f32 %v484_v31, %v597_v50  ;;  %v801_v36 = vrot.slane %v5909_v22, 3 }
 0x1b9   : > { %v2524_v43 = vmax.f32 %v2380_v29, %v2444_v15  ;;  %v2302_v61 = vsel %vm276_vm0, %v2299_v39, %v2301_v4  ;;  %v2446_v46 = vsel %vm485_vm1, %v2443_v52, %v2445_v21  ;;  %v2590_v37 = vsel %vm694_vm2, %v2587_v9, %v2589_v12 }
 0x1ba   : > { %v2381_v32 = vmax.f32 %v2189_v35, %v2302_v61  ;;  %v2734_v59 = vsel %vm903_vm3, %v2731_v53, %v2733_v25  ;;  %v803_v57 = vrot.slane %v5918_v2, 3  ;;  %v805_v26 = vrot.slane %v5921_v44, 3 }
 0x1bb   : > { %v2668_v8 = vmax.f32 %v2524_v43, %v2588_v63  ;;  %v1009_v31 = vrot.slane %v5904_v11, 4  ;;  %v1010_v29 = vrot.slane %v5909_v22, 4  ;;  %v802_v4 = vsel %vm694_vm2, %v800_v1, %v801_v36 }
 0x1bc   : > { %v2525_v55 = vmax.f32 %v2381_v32, %v2446_v46  ;;  %v804_v39 = vsel %vm694_vm2, %v801_v36, %v803_v57  ;;  %v1012_v12 = vrot.slane %v5918_v2, 4  ;;  %v806_v52 = vsel %vm694_vm2, %v803_v57, %v805_v26 }
 0x1bd   : > { %v5985_v35 = vmax.f32 %v2668_v8, %v2732_v13  ;;  %v900_v9 = vmax.f32 %v691_v3, %v802_v4  ;;  %v901_v63 = vmax.f32 %v692_v18, %v804_v39  ;;  %v902_v50 = vmax.f32 %v693_v60, %v806_v52  ;;  %v7234_v4 = vld [vmem:[#allocation41_spill] sm:$0xff] }
 0x1be   : > { %v2669_v53 = vmax.f32 %v2525_v55, %v2590_v37  ;;  %v1011_v11 = vsel %vm903_vm3, %v1009_v31, %v1010_v29  ;;  %v1013_v22 = vsel %vm903_vm3, %v1010_v29, %v1012_v12  ;;  %v7231_v15 = vmax.f32 %v5867_v16, %v5818_v7 }
 0x1bf   : > { %v1014_v2 = vrot.slane %v5921_v44, 4  ;;  %v5995_v8 = vmax.f32 %v900_v9, %v1011_v11  ;;  %v5997_v13 = vmax.f32 %v901_v63, %v1013_v22  ;;  %v1145_v3 = vmax.f32 %v5656_v10, %v5317_v14 }
 0x1c0   : > { %v2924_v36 = vmax.f32 %v7231_v15, %v5985_v35  ;;  %v5999_v57 = vmax.f32 %v2669_v53, %v2734_v59  ;;  %v1146_v21 = vmax.f32 %v5658_v40, %v5319_v42  ;;  %v1147_v25 = vmax.f32 %v5681_v62, %v5342_v0 }
 0x1c1   : > { %v1015_v16 = vsel %vm903_vm3, %v1012_v12, %v1014_v2  ;;  %v2059_v44 = vmax.f32 %v7223_v28, %v7197_v20  ;;  %v2060_v18 = vmax.f32 %v7224_v38, %v7198_v34  ;;  %v2838_v14 = vmax.f32 %v5818_v7, %v5479_v23 }
 0x1c2   : > { %2953 = vst.msk [vmem:[%s4339_s17 + $0x80] sm:$0xff] %vm2936_vm4, %v2924_v36  ;;  %v7232_v42 = vmax.f32 %v5915_v19, %v5838_v41  ;;  %v6020_v1 = vmax.f32 %v902_v50, %v1015_v16  ;;  %v1190_v0 = vmax.f32 %v1145_v3, %v5495_v49  ;;  %v1191_v43 = vmax.f32 %v1146_v21, %v5497_v58 }
 0x1c3   : > { %v1192_v61 = vmax.f32 %v1147_v25, %v5501_v51  ;;  %v6026_v20 = vmax.f32 %v2059_v44, %v5593_v27  ;;  %v6029_v34 = vmax.f32 %v2060_v18, %v5597_v56  ;;  %v6032_v23 = vmax.f32 %v2838_v14, %v5646_v54 }
 0x1c4   : > { %v2925_v60 = vmax.f32 %v7232_v42, %v5999_v57  ;;  %v1235_v19 = vmax.f32 %v1190_v0, %v5834_v24  ;;  %v1236_v46 = vmax.f32 %v1191_v43, %v5836_v30  ;;  %v2061_v37 = vmax.f32 %v7225_v45, %v7199_v5 }
 0x1c5   : > { %v2839_v32 = vmax.f32 %v5838_v41, %v7226_v33  ;;  %v1237_v59 = vmax.f32 %v1192_v61, %v5840_v6  ;;  %v2149_v26 = vmax.f32 %v6026_v20, %v5932_v48  ;;  %v2150_v31 = vmax.f32 %v6029_v34, %v5936_v17  ;;  %v7235_v33 = vld [vmem:[#allocation37_spill] sm:$0xff]  ;;  %v7237_v34 = vld [vmem:[#allocation51_spill] sm:$0xff] }
 0x1c6   : > { %2954 = vst.msk [vmem:[%s4339_s17 + $0x88] sm:$0xff] %vm2936_vm4, %v2925_v60  ;;  %v6050_v55 = vmax.f32 %v1235_v19, %v5995_v8  ;;  %v1278_v5 = vmax.f32 %v1236_v46, %v5997_v13  ;;  %v6054_v39 = vmax.f32 %v2061_v37, %v7234_v4  ;;  %v1148_v9 = vmax.f32 %v5834_v24, %v5495_v49 }
 0x1c7   : > { %v6057_v12 = vmax.f32 %v2839_v32, %v7235_v33  ;;  %v6060_v52 = vmax.f32 %v1237_v59, %v6020_v1  ;;  %v1149_v63 = vmax.f32 %v5836_v30, %v5497_v58  ;;  %v1150_v53 = vmax.f32 %v5840_v6, %v5501_v51 }
 0x1c8   : > { %7233 = vst [vmem:[#allocation55_spill] sm:$0xff] %v6050_v55  ;;  %v1393_v50 = vrot.slane %v6050_v55, 1  ;;  %v1394_v11 = vrot.slane %v1278_v5, 1  ;;  %v1569_v22 = vrot.slane %v6050_v55, 2  ;;  %v1570_v15 = vrot.slane %v1278_v5, 2 }
 0x1c9   : > { %7236 = vst [vmem:[#allocation41_spill] sm:$0xff] %v6060_v52  ;;  %v1396_v36 = vrot.slane %v6060_v52, 1  ;;  %v1572_v2 = vrot.slane %v6060_v52, 2  ;;  %v1745_v49 = vrot.slane %v6050_v55, 3  ;;  %v1746_v3 = vrot.slane %v1278_v5, 3 }
 0x1ca   : > { %3316 = vst.msk [vmem:[%s4339_s17 + $0x2d4] sm:$0xff] %vm2936_vm4, %v1278_v5  ;;  %v1395_v58 = vsel %vm276_vm0, %v1393_v50, %v1394_v11  ;;  %v1571_v21 = vsel %vm485_vm1, %v1569_v22, %v1570_v15  ;;  %v1748_v51 = vrot.slane %v6060_v52, 3  ;;  %v1921_v25 = vrot.slane %v6050_v55, 4 }
 0x1cb   : > { %v1397_v16 = vsel %vm276_vm0, %v1394_v11, %v1396_v36  ;;  %v1495_v44 = vmax.f32 %v6050_v55, %v1395_v58  ;;  %v1573_v18 = vsel %vm485_vm1, %v1570_v15, %v1572_v2  ;;  %v1747_v14 = vsel %vm694_vm2, %v1745_v49, %v1746_v3 }
 0x1cc   : > { %v1496_v42 = vmax.f32 %v1278_v5, %v1397_v16  ;;  %v1749_v60 = vsel %vm694_vm2, %v1746_v3, %v1748_v51  ;;  %v1922_v0 = vrot.slane %v1278_v5, 4  ;;  %v1924_v43 = vrot.slane %v6060_v52, 4 }
 0x1cd   : > { %v1671_v61 = vmax.f32 %v1495_v44, %v1571_v21  ;;  %v1497_v20 = vmax.f32 %v6060_v52, %v1396_v36  ;;  %v2151_v19 = vmax.f32 %v6054_v39, %v7237_v34  ;;  %v1193_v50 = vmax.f32 %v1148_v9, %v5656_v10 }
 0x1ce   : > { %v1672_v37 = vmax.f32 %v1496_v42, %v1573_v18  ;;  %v1923_v32 = vsel %vm903_vm3, %v1921_v25, %v1922_v0  ;;  %v1925_v59 = vsel %vm903_vm3, %v1922_v0, %v1924_v43  ;;  %v1194_v22 = vmax.f32 %v1149_v63, %v5658_v40 }
 0x1cf   : > { %v1847_v11 = vmax.f32 %v1671_v61, %v1747_v14  ;;  %v1673_v5 = vmax.f32 %v1497_v20, %v1572_v2  ;;  %v1195_v15 = vmax.f32 %v1150_v53, %v5681_v62  ;;  %v6096_v39 = vmax.f32 %v1193_v50, %v5995_v8 }
 0x1d0   : > { %v1848_v36 = vmax.f32 %v1672_v37, %v1749_v60  ;;  %v2063_v3 = vmax.f32 %v5936_v17, %v5597_v56  ;;  %v6105_v2 = vmax.f32 %v1194_v22, %v5997_v13 }
 0x1d1   : > { %v6102_v58 = vmax.f32 %v1847_v11, %v1923_v32  ;;  %v1849_v9 = vmax.f32 %v1673_v5, %v1748_v51  ;;  %v6108_v63 = vmax.f32 %v1195_v15, %v6020_v1  ;;  %v1398_v21 = vrot.slane %v6096_v39, 1  ;;  %3318 = vst.msk [vmem:[%s4339_s17 + $0x2dc] sm:$0xf0] %vm3021_vm7, %v6096_v39 }
 0x1d2   : > { %v6110_v53 = vmax.f32 %v1848_v36, %v1925_v59  ;;  %v1574_v25 = vrot.slane %v6096_v39, 2  ;;  %v1750_v16 = vrot.slane %v6096_v39, 3  ;;  %v1399_v51 = vrot.slane %v6105_v2, 1  ;;  %3319 = vst.msk [vmem:[%s4339_s17 + $0x2e4] sm:$0xff] %vm2936_vm4, %v6105_v2 }
 0x1d3   : > { %v6116_v44 = vmax.f32 %v2149_v26, %v6102_v58  ;;  %v6118_v56 = vmax.f32 %v1849_v9, %v1924_v43  ;;  %v1401_v18 = vrot.slane %v6108_v63, 1  ;;  %v1575_v42 = vrot.slane %v6105_v2, 2  ;;  %3320 = vst.msk [vmem:[%s4339_s17 + $0x2ec] sm:$0xf] %vm3024_vm8, %v6108_v63 }
 0x1d4   : > { %v2192_v14 = vmax.f32 %v2150_v31, %v6110_v53  ;;  %v1577_v60 = vrot.slane %v6108_v63, 2  ;;  %v1751_v0 = vrot.slane %v6105_v2, 3  ;;  %v1400_v11 = vsel %vm276_vm0, %v1398_v21, %v1399_v51 }
 0x1d5   : > { %7238 = vst [vmem:[#allocation37_spill] sm:$0xff] %v6116_v44  ;;  %v2303_v26 = vrot.slane %v6116_v44, 1  ;;  %v2447_v43 = vrot.slane %v6116_v44, 2  ;;  %v2591_v61 = vrot.slane %v6116_v44, 3  ;;  %v2735_v20 = vrot.slane %v6116_v44, 4 }
 0x1d6   : > { %v2304_v37 = vrot.slane %v2192_v14, 1  ;;  %v2448_v32 = vrot.slane %v2192_v14, 2  ;;  %v2592_v59 = vrot.slane %v2192_v14, 3  ;;  %v2736_v50 = vrot.slane %v2192_v14, 4  ;;  %3262 = vst.msk [vmem:[%s4339_s17 + $0x1b6] sm:$0xff] %vm2936_vm4, %v2192_v14 }
 0x1d7   : > { %v6136_v31 = vmax.f32 %v2151_v19, %v6118_v56  ;;  %v1402_v5 = vsel %vm276_vm0, %v1399_v51, %v1401_v18  ;;  %v1576_v22 = vsel %vm485_vm1, %v1574_v25, %v1575_v42  ;;  %v1498_v25 = vmax.f32 %v6096_v39, %v1400_v11 }
 0x1d8   : > { %v2305_v15 = vsel %vm276_vm0, %v2303_v26, %v2304_v37  ;;  %v2449_v36 = vsel %vm485_vm1, %v2447_v43, %v2448_v32  ;;  %v2593_v9 = vsel %vm694_vm2, %v2591_v61, %v2592_v59  ;;  %v2737_v46 = vsel %vm903_vm3, %v2735_v20, %v2736_v50 }
 0x1d9   : > { %7239 = vst [vmem:[#allocation51_spill] sm:$0xff] %v6136_v31  ;;  %v2382_v29 = vmax.f32 %v6116_v44, %v2305_v15  ;;  %v2306_v49 = vrot.slane %v6136_v31, 1  ;;  %v2450_v19 = vrot.slane %v6136_v31, 2  ;;  %v2594_v21 = vrot.slane %v6136_v31, 3 }
 0x1da   : > { %v2738_v51 = vrot.slane %v6136_v31, 4  ;;  %v1499_v26 = vmax.f32 %v6105_v2, %v1402_v5  ;;  %v1578_v43 = vsel %vm485_vm1, %v1575_v42, %v1577_v60  ;;  %v1674_v44 = vmax.f32 %v1498_v25, %v1576_v22 }
 0x1db   : > { %v2526_v61 = vmax.f32 %v2382_v29, %v2449_v36  ;;  %v2307_v20 = vsel %vm276_vm0, %v2304_v37, %v2306_v49  ;;  %v2451_v15 = vsel %vm485_vm1, %v2448_v32, %v2450_v19  ;;  %v2595_v52 = vsel %vm694_vm2, %v2592_v59, %v2594_v21 }
 0x1dc   : > { %v2383_v55 = vmax.f32 %v2192_v14, %v2307_v20  ;;  %v2739_v47 = vsel %vm903_vm3, %v2736_v50, %v2738_v51  ;;  %v1675_v31 = vmax.f32 %v1499_v26, %v1578_v43  ;;  %v1752_v11 = vsel %vm694_vm2, %v1750_v16, %v1751_v0 }
 0x1dd   : > { %v2670_v17 = vmax.f32 %v2526_v61, %v2593_v9  ;;  %v1753_v5 = vrot.slane %v6108_v63, 3  ;;  %v1926_v6 = vrot.slane %v6096_v39, 4  ;;  %v1850_v29 = vmax.f32 %v1674_v44, %v1752_v11  ;;  %v7287_v39 = vld [vmem:[#allocation14_spill] sm:$0xff] }
 0x1de   : > { %v2527_v42 = vmax.f32 %v2383_v55, %v2451_v15  ;;  %v1927_v49 = vrot.slane %v6105_v2, 4  ;;  %v1929_v37 = vrot.slane %v6108_v63, 4  ;;  %v7240_v59 = vmax.f32 %v5932_v48, %v5593_v27  ;;  %3290 = vst.msk [vmem:[%s4339_s17 + $0x24c] sm:$0xf] %vm3024_vm8, %v7287_v39 }
 0x1df   : > { %v6164_v32 = vmax.f32 %v2670_v17, %v2737_v46  ;;  %v1754_v14 = vsel %vm694_vm2, %v1751_v0, %v1753_v5  ;;  %v2108_v50 = vmax.f32 %v2063_v3, %v7224_v38  ;;  %v7241_v17 = vmax.f32 %v6032_v23, %v5985_v35 }
 0x1e0   : > { %v2107_v16 = vmax.f32 %v7240_v59, %v7223_v28  ;;  %v2671_v22 = vmax.f32 %v2527_v42, %v2595_v52  ;;  %v1851_v36 = vmax.f32 %v1675_v31, %v1754_v14  ;;  %v1928_v55 = vsel %vm903_vm3, %v1926_v6, %v1927_v49 }
 0x1e1   : > { %v1930_v2 = vsel %vm903_vm3, %v1927_v49, %v1929_v37  ;;  %v2926_v46 = vmax.f32 %v7241_v17, %v6164_v32  ;;  %v6178_v44 = vmax.f32 %v1850_v29, %v1928_v55  ;;  %v2153_v27 = vmax.f32 %v2108_v50, %v6110_v53 }
 0x1e2   : > { %v2152_v0 = vmax.f32 %v2107_v16, %v6102_v58  ;;  %v6182_v9 = vmax.f32 %v2671_v22, %v2739_v47  ;;  %v6184_v3 = vmax.f32 %v1851_v36, %v1930_v2  ;;  %v2840_v6 = vmax.f32 %v5985_v35, %v5646_v54 }
 0x1e3   : > { %v1500_v52 = vmax.f32 %v6108_v63, %v1401_v18  ;;  %2955 = vst.msk [vmem:[%s4339_s17 + $0x90] sm:$0xff] %vm2936_vm4, %v2926_v46  ;;  %v2064_v31 = vmax.f32 %v7237_v34, %v7234_v4  ;;  %v2841_v47 = vmax.f32 %v5999_v57, %v7235_v33  ;;  %v1151_v19 = vmax.f32 %v5995_v8, %v5656_v10  ;;  %v3076_v63 = vld [vmem:[%s3442_s13 + $0x4e] sm:$0xff] }
 0x1e4   : > { %v6192_v23 = vmax.f32 %v2152_v0, %v6178_v44  ;;  %v7242_v54 = vmax.f32 %v6057_v12, %v5999_v57  ;;  %v2195_v21 = vmax.f32 %v2153_v27, %v6184_v3  ;;  %v2870_v51 = vmax.f32 %v2840_v6, %v5818_v7  ;;  %3329 = vst.msk [vmem:[%s4339_s17 + $0x328] sm:$0xff] %vm2936_vm4, %v3076_v63 }
 0x1e5   : > { %v1676_v25 = vmax.f32 %v1500_v52, %v1577_v60  ;;  %v2109_v60 = vmax.f32 %v2064_v31, %v7225_v45  ;;  %v6219_v11 = vmax.f32 %v2841_v47, %v5838_v41  ;;  %v1152_v22 = vmax.f32 %v5997_v13, %v5658_v40 }
 0x1e6   : > { %v2927_v18 = vmax.f32 %v7242_v54, %v6182_v9  ;;  %v2308_v4 = vrot.slane %v6192_v23, 1  ;;  %v2452_v33 = vrot.slane %v6192_v23, 2  ;;  %v2596_v26 = vrot.slane %v6192_v23, 3  ;;  %3265 = vst.msk [vmem:[%s4339_s17 + $0x1c6] sm:$0xff] %vm2936_vm4, %v2195_v21 }
 0x1e7   : > { %v2740_v10 = vrot.slane %v6192_v23, 4  ;;  %v2309_v8 = vrot.slane %v2195_v21, 1  ;;  %v2453_v12 = vrot.slane %v2195_v21, 2  ;;  %v2597_v43 = vrot.slane %v2195_v21, 3  ;;  %3264 = vst.msk [vmem:[%s4339_s17 + $0x1be] sm:$0xfc] %vm2970_vm5, %v6192_v23 }
 0x1e8   : > { %2956 = vst.msk [vmem:[%s4339_s17 + $0x98] sm:$0xff] %vm2936_vm4, %v2927_v18  ;;  %v2741_v61 = vrot.slane %v2195_v21, 4  ;;  %v2900_v20 = vmax.f32 %v2870_v51, %v6164_v32  ;;  %v1852_v15 = vmax.f32 %v1676_v25, %v1753_v5  ;;  %v2154_v50 = vmax.f32 %v2109_v60, %v6118_v56 }
 0x1e9   : > { %v2310_v42 = vsel %vm276_vm0, %v2308_v4, %v2309_v8  ;;  %v2454_v29 = vsel %vm485_vm1, %v2452_v33, %v2453_v12  ;;  %v2598_v49 = vsel %vm694_vm2, %v2596_v26, %v2597_v43  ;;  %v2901_v5 = vmax.f32 %v6219_v11, %v6182_v9 }
 0x1ea   : > { %v2742_v14 = vsel %vm903_vm3, %v2740_v10, %v2741_v61  ;;  %v2384_v59 = vmax.f32 %v6192_v23, %v2310_v42  ;;  %v6226_v16 = vmax.f32 %v1852_v15, %v1929_v37  ;;  %v1153_v36 = vmax.f32 %v6020_v1, %v5681_v62  ;;  %v7243_v62 = vld [vmem:[#allocation53_spill] sm:$0xff] }
 0x1eb   : > { %v6236_v55 = vmax.f32 %v1151_v19, %v5834_v24  ;;  %v2065_v2 = vmax.f32 %v6102_v58, %v7223_v28  ;;  %v2066_v46 = vmax.f32 %v6110_v53, %v7224_v38  ;;  %v2842_v40 = vmax.f32 %v6164_v32, %v5818_v7 }
 0x1ec   : > { %v2528_v17 = vmax.f32 %v2384_v59, %v2454_v29  ;;  %v6241_v37 = vmax.f32 %v2154_v50, %v6226_v16  ;;  %v1197_v13 = vmax.f32 %v1152_v22, %v5836_v30  ;;  %v6249_v1 = vmax.f32 %v1153_v36, %v7243_v62 }
 0x1ed   : > { %v1403_v24 = vrot.slane %v6236_v55, 1  ;;  %v1579_v28 = vrot.slane %v6236_v55, 2  ;;  %v1931_v42 = vrot.slane %v6236_v55, 4  ;;  %3321 = vst.msk [vmem:[%s4339_s17 + $0x2ec] sm:$0xf0] %vm3021_vm7, %v6236_v55 }
 0x1ee   : > { %v2672_v0 = vmax.f32 %v2528_v17, %v2598_v49  ;;  %v2311_v27 = vrot.slane %v6241_v37, 1  ;;  %v2455_v6 = vrot.slane %v6241_v37, 2  ;;  %v2599_v52 = vrot.slane %v6241_v37, 3  ;;  %3322 = vst.msk [vmem:[%s4339_s17 + $0x2f4] sm:$0xff] %vm2936_vm4, %v1197_v13 }
 0x1ef   : > { %v2743_v38 = vrot.slane %v6241_v37, 4  ;;  %v1404_v31 = vrot.slane %v1197_v13, 1  ;;  %v1406_v7 = vrot.slane %v6249_v1, 1  ;;  %v1580_v30 = vrot.slane %v1197_v13, 2  ;;  %3266 = vst.msk [vmem:[%s4339_s17 + $0x1ce] sm:$0x3] %vm2973_vm6, %v6241_v37 }
 0x1f0   : > { %v6260_v47 = vmax.f32 %v2672_v0, %v2742_v14  ;;  %v2312_v19 = vsel %vm276_vm0, %v2309_v8, %v2311_v27  ;;  %v2456_v54 = vsel %vm485_vm1, %v2453_v12, %v2455_v6  ;;  %v2600_v18 = vsel %vm694_vm2, %v2597_v43, %v2599_v52  ;;  %v7271_v37 = vld [vmem:[#allocation8_spill] sm:$0xff]  ;;  %3323 = vst.msk [vmem:[%s4339_s17 + $0x2fc] sm:$0xf] %vm3024_vm8, %v6249_v1 }
 0x1f1   : > { %v2385_v51 = vmax.f32 %v2195_v21, %v2312_v19  ;;  %v2744_v25 = vsel %vm903_vm3, %v2741_v61, %v2743_v38  ;;  %v1405_v4 = vsel %vm276_vm0, %v1403_v24, %v1404_v31  ;;  %v1407_v33 = vsel %vm276_vm0, %v1404_v31, %v1406_v7  ;;  %3282 = vst.msk [vmem:[%s4339_s17 + $0x21c] sm:$0xf0] %vm3021_vm7, %v7271_v37 }
 0x1f2   : > { %v2928_v26 = vmax.f32 %v2900_v20, %v6260_v47  ;;  %v1501_v10 = vmax.f32 %v6236_v55, %v1405_v4  ;;  %v1502_v15 = vmax.f32 %v1197_v13, %v1407_v33  ;;  %v1581_v60 = vsel %vm485_vm1, %v1579_v28, %v1580_v30  ;;  %v7244_v28 = vld [vmem:[#allocation48_spill] sm:$0xff] }
 0x1f3   : > { %v2529_v11 = vmax.f32 %v2385_v51, %v2456_v54  ;;  %v1582_v8 = vrot.slane %v6249_v1, 2  ;;  %v1755_v12 = vrot.slane %v6236_v55, 3  ;;  %v1756_v43 = vrot.slane %v1197_v13, 3  ;;  %v7288_v55 = vld [vmem:[#allocation19_spill] sm:$0xff] }
 0x1f4   : > { %2957 = vst.msk [vmem:[%s4339_s17 + $0xa0] sm:$0xff] %vm2936_vm4, %v2928_v26  ;;  %v1677_v21 = vmax.f32 %v1501_v10, %v1581_v60  ;;  %v1758_v61 = vrot.slane %v6249_v1, 3  ;;  %v1932_v29 = vrot.slane %v1197_v13, 4  ;;  %v1934_v59 = vrot.slane %v6249_v1, 4 }
 0x1f5   : > { %v2673_v20 = vmax.f32 %v2529_v11, %v2600_v18  ;;  %v1583_v49 = vsel %vm485_vm1, %v1580_v30, %v1582_v8  ;;  %v1757_v14 = vsel %vm694_vm2, %v1755_v12, %v1756_v43  ;;  %v2110_v13 = vmax.f32 %v2065_v2, %v5932_v48  ;;  %3293 = vst.msk [vmem:[%s4339_s17 + $0x25c] sm:$0xf] %vm3024_vm8, %v7288_v55 }
 0x1f6   : > { %v1678_v50 = vmax.f32 %v1502_v15, %v1583_v49  ;;  %v1759_v22 = vsel %vm694_vm2, %v1756_v43, %v1758_v61  ;;  %v1853_v36 = vmax.f32 %v1677_v21, %v1757_v14  ;;  %v1933_v17 = vsel %vm903_vm3, %v1931_v42, %v1932_v29 }
 0x1f7   : > { %v6282_v62 = vmax.f32 %v2673_v20, %v2744_v25  ;;  %v1935_v24 = vsel %vm903_vm3, %v1932_v29, %v1934_v59  ;;  %v2111_v0 = vmax.f32 %v2066_v46, %v7244_v28  ;;  %v6290_v52 = vmax.f32 %v2842_v40, %v5985_v35 }
 0x1f8   : > { %v1854_v27 = vmax.f32 %v1678_v50, %v1759_v22  ;;  %v6287_v6 = vmax.f32 %v1853_v36, %v1933_v17  ;;  %v1503_v38 = vmax.f32 %v6249_v1, %v1406_v7  ;;  %v2155_v30 = vmax.f32 %v2110_v13, %v6178_v44  ;;  %v3077_v1 = vld [vmem:[%s3442_s13 + $0x66] sm:$0xff] }
 0x1f9   : > { %v2929_v31 = vmax.f32 %v2901_v5, %v6282_v62  ;;  %v2156_v19 = vmax.f32 %v2111_v0, %v6184_v3  ;;  %v2067_v54 = vmax.f32 %v6118_v56, %v7225_v45  ;;  %v2902_v46 = vmax.f32 %v6290_v52, %v6260_v47  ;;  %3330 = vst.msk [vmem:[%s4339_s17 + $0x330] sm:$0xff] %vm2936_vm4, %v3077_v1 }
 0x1fa   : > { %v6298_v2 = vmax.f32 %v1854_v27, %v1935_v24  ;;  %v1679_v18 = vmax.f32 %v1503_v38, %v1582_v8  ;;  %v2843_v40 = vmax.f32 %v6182_v9, %v5838_v41  ;;  %v6307_v5 = vmax.f32 %v2155_v30, %v6287_v6 }
 0x1fb   : > { %2958 = vst.msk [vmem:[%s4339_s17 + $0xa8] sm:$0xff] %vm2936_vm4, %v2929_v31  ;;  %v2112_v7 = vmax.f32 %v2067_v54, %v7237_v34  ;;  %v2068_v45 = vmax.f32 %v6178_v44, %v5932_v48  ;;  %v2069_v51 = vmax.f32 %v6184_v3, %v7244_v28  ;;  %v2844_v41 = vmax.f32 %v6260_v47, %v5985_v35 }
 0x1fc   : > { %v2198_v25 = vmax.f32 %v2156_v19, %v6298_v2  ;;  %v1855_v4 = vmax.f32 %v1679_v18, %v1758_v61  ;;  %v6316_v33 = vmax.f32 %v2843_v40, %v5999_v57  ;;  %v2313_v26 = vrot.slane %v6307_v5, 1  ;;  %3267 = vst.msk [vmem:[%s4339_s17 + $0x1ce] sm:$0xfc] %vm2970_vm5, %v6307_v5 }
 0x1fd   : > { %v2457_v10 = vrot.slane %v6307_v5, 2  ;;  %v2601_v15 = vrot.slane %v6307_v5, 3  ;;  %v2745_v48 = vrot.slane %v6307_v5, 4  ;;  %v2157_v21 = vmax.f32 %v2112_v7, %v6226_v16 }
 0x1fe   : > { %v2314_v60 = vrot.slane %v2198_v25, 1  ;;  %v2458_v11 = vrot.slane %v2198_v25, 2  ;;  %v2602_v8 = vrot.slane %v2198_v25, 3  ;;  %v2746_v12 = vrot.slane %v2198_v25, 4  ;;  %3268 = vst.msk [vmem:[%s4339_s17 + $0x1d6] sm:$0xff] %vm2936_vm4, %v2198_v25 }
 0x1ff   : > { %v6326_v43 = vmax.f32 %v1855_v4, %v1934_v59  ;;  %v2903_v35 = vmax.f32 %v6316_v33, %v6282_v62  ;;  %v2113_v61 = vmax.f32 %v2068_v45, %v6102_v58  ;;  %v2114_v50 = vmax.f32 %v2069_v51, %v6110_v53 }
 0x200   : > { %v2315_v42 = vsel %vm276_vm0, %v2313_v26, %v2314_v60  ;;  %v2459_v29 = vsel %vm485_vm1, %v2457_v10, %v2458_v11  ;;  %v2603_v20 = vsel %vm694_vm2, %v2601_v15, %v2602_v8  ;;  %v2747_v49 = vsel %vm903_vm3, %v2745_v48, %v2746_v12 }
 0x201   : > { %v2386_v14 = vmax.f32 %v6307_v5, %v2315_v42  ;;  %v6338_v59 = vmax.f32 %v2157_v21, %v6326_v43  ;;  %v6342_v22 = vmax.f32 %v2113_v61, %v6287_v6  ;;  %v6345_v36 = vmax.f32 %v2844_v41, %v6164_v32  ;;  %v7257_v5 = vld [vmem:[#allocation2_spill] sm:$0xff] }
 0x202   : > { %v2070_v17 = vmax.f32 %v6226_v16, %v7237_v34  ;;  %v2845_v24 = vmax.f32 %v6282_v62, %v5999_v57  ;;  %v2071_v13 = vmax.f32 %v6287_v6, %v6102_v58  ;;  %v6358_v31 = vmax.f32 %v2114_v50, %v6298_v2  ;;  %3230 = vst.msk [vmem:[%s4339_s17 + $0x10e] sm:$0x3] %vm2973_vm6, %v7257_v5  ;;  %v3095_v5 = vld [vmem:[%s3442_s13 + $0x186] sm:$0xff] }
 0x203   : > { %v2530_v28 = vmax.f32 %v2386_v14, %v2459_v29  ;;  %v2316_v0 = vrot.slane %v6338_v59, 1  ;;  %v2460_v27 = vrot.slane %v6338_v59, 2  ;;  %v2604_v52 = vrot.slane %v6338_v59, 3  ;;  %3270 = vst.msk [vmem:[%s4339_s17 + $0x1de] sm:$0xfc] %vm2970_vm5, %v6342_v22 }
 0x204   : > { %v2748_v38 = vrot.slane %v6338_v59, 4  ;;  %v2318_v34 = vrot.slane %v6342_v22, 1  ;;  %v2462_v57 = vrot.slane %v6342_v22, 2  ;;  %v2319_v40 = vrot.slane %v6358_v31, 1  ;;  %3271 = vst.msk [vmem:[%s4339_s17 + $0x1e6] sm:$0xff] %vm2936_vm4, %v6358_v31 }
 0x205   : > { %v2674_v30 = vmax.f32 %v2530_v28, %v2603_v20  ;;  %v2317_v58 = vsel %vm276_vm0, %v2314_v60, %v2316_v0  ;;  %v2461_v6 = vsel %vm485_vm1, %v2458_v11, %v2460_v27  ;;  %v2605_v19 = vsel %vm694_vm2, %v2602_v8, %v2604_v52  ;;  %3269 = vst.msk [vmem:[%s4339_s17 + $0x1de] sm:$0x3] %vm2973_vm6, %v6338_v59  ;;  %v7272_v59 = vld [vmem:[#allocation10_spill] sm:$0xff] }
 0x206   : > { %v2387_v54 = vmax.f32 %v2198_v25, %v2317_v58  ;;  %v2749_v18 = vsel %vm903_vm3, %v2746_v12, %v2748_v38  ;;  %v2463_v7 = vrot.slane %v6358_v31, 2  ;;  %v2606_v51 = vrot.slane %v6342_v22, 3  ;;  %3285 = vst.msk [vmem:[%s4339_s17 + $0x22c] sm:$0xf0] %vm3021_vm7, %v7272_v59 }
 0x207   : > { %v6371_v45 = vmax.f32 %v2674_v30, %v2747_v49  ;;  %v2607_v4 = vrot.slane %v6358_v31, 3  ;;  %v2750_v33 = vrot.slane %v6342_v22, 4  ;;  %v2320_v25 = vsel %vm276_vm0, %v2318_v34, %v2319_v40  ;;  %3348 = vst.msk [vmem:[%s4339_s17 + $0x3c0] sm:$0xff] %vm2936_vm4, %v3095_v5 }
 0x208   : > { %v2531_v41 = vmax.f32 %v2387_v54, %v2461_v6  ;;  %v2464_v26 = vsel %vm485_vm1, %v2462_v57, %v2463_v7  ;;  %v2751_v10 = vrot.slane %v6358_v31, 4  ;;  %v2388_v48 = vmax.f32 %v6342_v22, %v2320_v25  ;;  %v7258_v22 = vld [vmem:[#allocation22_spill] sm:$0xff] }
 0x209   : > { %v2930_v15 = vmax.f32 %v2902_v46, %v6371_v45  ;;  %v2608_v60 = vsel %vm694_vm2, %v2606_v51, %v2607_v4  ;;  %v2904_v11 = vmax.f32 %v6345_v36, %v6371_v45  ;;  %v2115_v21 = vmax.f32 %v2070_v17, %v6118_v56  ;;  %v7248_v51 = vld [vmem:[#allocation25_spill] sm:$0xff]  ;;  %3233 = vst.msk [vmem:[%s4339_s17 + $0x11e] sm:$0x3] %vm2973_vm6, %v7258_v22  ;;  %v3096_v22 = vld [vmem:[%s3442_s13 + $0x18e] sm:$0xff] }
 0x20a   : > { %v2675_v8 = vmax.f32 %v2531_v41, %v2605_v19  ;;  %v2752_v12 = vsel %vm903_vm3, %v2750_v33, %v2751_v10  ;;  %v6387_v61 = vmax.f32 %v2845_v24, %v6182_v9  ;;  %v2532_v42 = vmax.f32 %v2388_v48, %v2464_v26  ;;  %v7247_v19 = vld [vmem:[#allocation17_spill] sm:$0xff]  ;;  %3237 = vst.msk [vmem:[%s4339_s17 + $0x12e] sm:$0xfc] %vm2970_vm5, %v7248_v51  ;;  %v7264_v51 = vld [vmem:[#allocation44_spill] sm:$0xff] }
 0x20b   : > { %2959 = vst.msk [vmem:[%s4339_s17 + $0xb0] sm:$0xff] %vm2936_vm4, %v2930_v15  ;;  %v2072_v46 = vmax.f32 %v6298_v2, %v6110_v53  ;;  %v6394_v29 = vmax.f32 %v2071_v13, %v6178_v44  ;;  %v2846_v20 = vmax.f32 %v6371_v45, %v6164_v32  ;;  %v6401_v14 = vmax.f32 %v2115_v21, %v6326_v43  ;;  %v7245_v32 = vld [vmem:[#allocation15_spill] sm:$0xff]  ;;  %v7246_v13 = vld [vmem:[#allocation16_spill] sm:$0xff]  ;;  %v7249_v48 = vld [vmem:[#allocation29_spill] sm:$0xff] }
 0x20c   : > { %v6398_v49 = vmax.f32 %v2675_v8, %v2749_v18  ;;  %v2073_v50 = vmax.f32 %v6326_v43, %v6118_v56  ;;  %v2676_v36 = vmax.f32 %v2532_v42, %v2608_v60  ;;  %3228 = vst.msk [vmem:[%s4339_s17 + $0xfe] sm:$0xfc] %vm2970_vm5, %v7245_v32  ;;  %v7250_v21 = vld [vmem:[#allocation34_spill] sm:$0xff] }
 0x20d   : > { %v6406_v53 = vmax.f32 %v2072_v46, %v6184_v3  ;;  %v2323_v44 = vrot.slane %v6394_v29, 1  ;;  %v2467_v2 = vrot.slane %v6394_v29, 2  ;;  %v2321_v24 = vrot.slane %v6401_v14, 1  ;;  %3231 = vst.msk [vmem:[%s4339_s17 + $0x10e] sm:$0xfc] %vm2970_vm5, %v7246_v13  ;;  %v7251_v46 = vld [vmem:[#allocation21_spill] sm:$0xff] }
 0x20e   : > { %v2931_v17 = vmax.f32 %v2903_v35, %v6398_v49  ;;  %v2465_v56 = vrot.slane %v6401_v14, 2  ;;  %v2609_v43 = vrot.slane %v6401_v14, 3  ;;  %v6420_v3 = vmax.f32 %v2676_v36, %v2752_v12  ;;  %3234 = vst.msk [vmem:[%s4339_s17 + $0x11e] sm:$0xfc] %vm2970_vm5, %v7247_v19  ;;  %v7252_v36 = vld [vmem:[#allocation42_spill] sm:$0xff] }
 0x20f   : > { %v2753_v28 = vrot.slane %v6401_v14, 4  ;;  %v2905_v0 = vmax.f32 %v6387_v61, %v6398_v49  ;;  %v2324_v27 = vrot.slane %v6406_v53, 1  ;;  %3274 = vst.msk [vmem:[%s4339_s17 + $0x1f6] sm:$0xff] %vm2936_vm4, %v6406_v53  ;;  %v2322_v35 = vsel %vm276_vm0, %v2319_v40, %v2321_v24 }
 0x210   : > { %2960 = vst.msk [vmem:[%s4339_s17 + $0xb8] sm:$0xff] %vm2936_vm4, %v2931_v17  ;;  %v2466_v52 = vsel %vm485_vm1, %v2463_v7, %v2465_v56  ;;  %v2610_v38 = vsel %vm694_vm2, %v2607_v4, %v2609_v43  ;;  %v2468_v34 = vrot.slane %v6406_v53, 2  ;;  %v2932_v57 = vmax.f32 %v2904_v11, %v6420_v3  ;;  %v7253_v17 = vld [vmem:[#allocation40_spill] sm:$0xff] }
 0x211   : > { %v2389_v30 = vmax.f32 %v6358_v31, %v2322_v35  ;;  %v2754_v58 = vsel %vm903_vm3, %v2751_v10, %v2753_v28  ;;  %v2325_v6 = vsel %vm276_vm0, %v2323_v44, %v2324_v27  ;;  %v2611_v40 = vrot.slane %v6394_v29, 3  ;;  %3240 = vst.msk [vmem:[%s4339_s17 + $0x13e] sm:$0xfc] %vm2970_vm5, %v7249_v48  ;;  %v7254_v28 = vld [vmem:[#allocation50_spill] sm:$0xff]  ;;  %v7276_v48 = vld [vmem:[#allocation20_spill] sm:$0xff] }
 0x212   : > { %v2390_v54 = vmax.f32 %v6394_v29, %v2325_v6  ;;  %v2469_v18 = vsel %vm485_vm1, %v2467_v2, %v2468_v34  ;;  %v2612_v7 = vrot.slane %v6406_v53, 3  ;;  %2961 = vst.msk [vmem:[%s4339_s17 + $0xc0] sm:$0xff] %vm2936_vm4, %v2932_v57  ;;  %v2755_v4 = vrot.slane %v6394_v29, 4  ;;  %v7256_v6 = vld [vmem:[#allocation37_spill] sm:$0xff] }
 0x213   : > { %v2533_v31 = vmax.f32 %v2389_v30, %v2466_v52  ;;  %v2756_v33 = vrot.slane %v6406_v53, 4  ;;  %v2876_v41 = vmax.f32 %v2846_v20, %v6260_v47  ;;  %v6456_v10 = vmax.f32 %v2073_v50, %v6226_v16  ;;  %3243 = vst.msk [vmem:[%s4339_s17 + $0x14e] sm:$0xfc] %vm2970_vm5, %v7250_v21  ;;  %v7281_v21 = vld [vmem:[#allocation54_spill] sm:$0xff] }
 0x214   : > { %v2534_v25 = vmax.f32 %v2390_v54, %v2469_v18  ;;  %v2613_v26 = vsel %vm694_vm2, %v2611_v40, %v2612_v7  ;;  %v2847_v15 = vmax.f32 %v6398_v49, %v6182_v9  ;;  %v2848_v12 = vmax.f32 %v6420_v3, %v6260_v47  ;;  %3246 = vst.msk [vmem:[%s4339_s17 + $0x15e] sm:$0xfc] %vm2970_vm5, %v7251_v46  ;;  %v7260_v18 = vld [vmem:[#allocation27_spill] sm:$0xff] }
 0x215   : > { %v2677_v60 = vmax.f32 %v2533_v31, %v2610_v38  ;;  %v2757_v11 = vsel %vm903_vm3, %v2755_v4, %v2756_v33  ;;  %v2906_v8 = vmax.f32 %v2876_v41, %v6420_v3  ;;  %v2326_v61 = vrot.slane %v6456_v10, 1  ;;  %3249 = vst.msk [vmem:[%s4339_s17 + $0x16e] sm:$0xfc] %vm2970_vm5, %v7252_v36  ;;  %v7261_v40 = vld [vmem:[#allocation31_spill] sm:$0xff]  ;;  %v7266_v4 = vld [vmem:[#allocation52_spill] sm:$0xff]  ;;  %v7291_v36 = vld [vmem:[#allocation13_spill] sm:$0xff] }
 0x216   : > { %v2678_v16 = vmax.f32 %v2534_v25, %v2613_v26  ;;  %v2470_v9 = vrot.slane %v6456_v10, 2  ;;  %v2614_v42 = vrot.slane %v6456_v10, 3  ;;  %v2878_v50 = vmax.f32 %v2848_v12, %v6371_v45  ;;  %3252 = vst.msk [vmem:[%s4339_s17 + $0x17e] sm:$0xfc] %vm2970_vm5, %v7253_v17  ;;  %v7265_v31 = vld [vmem:[#allocation43_spill] sm:$0xff]  ;;  %v7269_v25 = vld [vmem:[#allocation4_spill] sm:$0xff] }
 0x217   : > { %v2821_v20 = vmax.f32 %v2677_v60, %v2754_v58  ;;  %v2327_v44 = vsel %vm276_vm0, %v2324_v27, %v2326_v61  ;;  %v2758_v32 = vrot.slane %v6456_v10, 4  ;;  %v2877_v13 = vmax.f32 %v2847_v15, %v6282_v62  ;;  %3255 = vst.msk [vmem:[%s4339_s17 + $0x18e] sm:$0xfc] %vm2970_vm5, %v7254_v28  ;;  %v7268_v41 = vld [vmem:[#allocation51_spill] sm:$0xff]  ;;  %v7270_v26 = vld [vmem:[#allocation6_spill] sm:$0xff]  ;;  %v7283_v61 = vld [vmem:[#allocation5_spill] sm:$0xff] }
 0x218   : > { %v2822_v47 = vmax.f32 %v2678_v16, %v2757_v11  ;;  %v2471_v2 = vsel %vm485_vm1, %v2468_v34, %v2470_v9  ;;  %v2391_v56 = vmax.f32 %v6406_v53, %v2327_v44  ;;  %v2615_v43 = vsel %vm694_vm2, %v2612_v7, %v2614_v42  ;;  %3261 = vst.msk [vmem:[%s4339_s17 + $0x1ae] sm:$0xfc] %vm2970_vm5, %v7256_v6  ;;  %v7263_v7 = vld [vmem:[#allocation35_spill] sm:$0xff]  ;;  %v7275_v15 = vld [vmem:[#allocation18_spill] sm:$0xff]  ;;  %v7285_v42 = vld [vmem:[#allocation9_spill] sm:$0xff] }
 0x219   : > { %v2933_v24 = vmax.f32 %v2905_v0, %v2821_v20  ;;  %v2849_v52 = vmax.f32 %v2821_v20, %v6282_v62  ;;  %v7255_v0 = vld [vmem:[#allocation49_spill] sm:$0xff]  ;;  %v2759_v34 = vsel %vm903_vm3, %v2756_v33, %v2758_v32  ;;  %v2907_v62 = vmax.f32 %v2877_v13, %v2821_v20  ;;  %3273 = vst.msk [vmem:[%s4339_s17 + $0x1ee] sm:$0xfc] %vm2970_vm5, %v6394_v29  ;;  %v7262_v29 = vld [vmem:[#allocation36_spill] sm:$0xff]  ;;  %v7277_v60 = vld [vmem:[#allocation38_spill] sm:$0xff] }
 0x21a   : > { %v2934_v27 = vmax.f32 %v2906_v8, %v2822_v47  ;;  %v2908_v35 = vmax.f32 %v2878_v50, %v2822_v47  ;;  %v2850_v38 = vmax.f32 %v2822_v47, %v6371_v45  ;;  %3258 = vst.msk [vmem:[%s4339_s17 + $0x19e] sm:$0xfc] %vm2970_vm5, %v7255_v0  ;;  %v2535_v53 = vmax.f32 %v2391_v56, %v2471_v2  ;;  %v7267_v33 = vld [vmem:[#allocation45_spill] sm:$0xff]  ;;  %v7278_v11 = vld [vmem:[#allocation39_spill] sm:$0xff]  ;;  %v7279_v8 = vld [vmem:[#allocation46_spill] sm:$0xff] }
 0x21b   : > { %2962 = vst.msk [vmem:[%s4339_s17 + $0xc8] sm:$0xff] %vm2936_vm4, %v2933_v24  ;;  %v2879_v45 = vmax.f32 %v2849_v52, %v6398_v49  ;;  %v7280_v12 = vld [vmem:[#allocation47_spill] sm:$0xff]  ;;  %v7292_v47 = vld [vmem:[#allocation30_spill] sm:$0xff]  ;;  %v7293_v44 = vld [vmem:[#allocation32_spill] sm:$0xff] }
 0x21c   : > { %2963 = vst.msk [vmem:[%s4339_s17 + $0xd0] sm:$0xff] %vm2936_vm4, %v2934_v27  ;;  %v2880_v57 = vmax.f32 %v2850_v38, %v6420_v3  ;;  %v2679_v30 = vmax.f32 %v2535_v53, %v2615_v43  ;;  %v7282_v16 = vld [vmem:[#allocation55_spill] sm:$0xff]  ;;  %v7294_v2 = vld [vmem:[#allocation33_spill] sm:$0xff]  ;;  %v7295_v32 = vld [vmem:[#allocation28_spill] sm:$0xff] }
 0x21d   : > { %2965 = vst.msk [vmem:[%s4339_s17 + $0xe0] sm:$0xff] %vm2936_vm4, %v2908_v35  ;;  %v7284_v9 = vld [vmem:[#allocation7_spill] sm:$0xff]  ;;  %v7296_v17 = vld [vmem:[#allocation41_spill] sm:$0xff] }
 0x21e   : > { %2967 = vst.msk [vmem:[%s4339_s17 + $0xf0] sm:$0xff] %vm2936_vm4, %v2880_v57  ;;  %v2823_v58 = vmax.f32 %v2679_v30, %v2759_v34  ;;  %v7286_v46 = vld [vmem:[#allocation11_spill] sm:$0xff] }
 0x21f   : > { %3239 = vst.msk [vmem:[%s4339_s17 + $0x13e] sm:$0x3] %vm2973_vm6, %v7260_v18  ;;  %v7290_v50 = vld [vmem:[#allocation23_spill] sm:$0xff] }
 0x220   : > { %v2935_v3 = vmax.f32 %v2907_v62, %v2823_v58  ;;  %v2909_v19 = vmax.f32 %v2879_v45, %v2823_v58  ;;  %v2851_v54 = vmax.f32 %v2823_v58, %v6398_v49  ;;  %v7259_v49 = vld [vmem:[#allocation3_spill] sm:$0xff]  ;;  %3242 = vst.msk [vmem:[%s4339_s17 + $0x14e] sm:$0x3] %vm2973_vm6, %v7261_v40 }
 0x221   : > { %3236 = vst.msk [vmem:[%s4339_s17 + $0x12e] sm:$0x3] %vm2973_vm6, %v7259_v49  ;;  %v3071_v24 = vld [vmem:[%s3442_s13 + $0x6] sm:$0xff]  ;;  %v3072_v56 = vld [vmem:[%s3442_s13 + $0xe] sm:$0xff] }
 0x222   : > { %2964 = vst.msk [vmem:[%s4339_s17 + $0xd8] sm:$0xff] %vm2936_vm4, %v2935_v3  ;;  %v2881_v23 = vmax.f32 %v2851_v54, %v2821_v20  ;;  %v7289_v20 = vld [vmem:[#allocation26_spill] sm:$0xff]  ;;  %v3074_v13 = vld [vmem:[%s3442_s13 + $0x2e] sm:$0xff] }
 0x223   : > { %2966 = vst.msk [vmem:[%s4339_s17 + $0xe8] sm:$0xff] %vm2936_vm4, %v2909_v19  ;;  %v3073_v43 = vld [vmem:[%s3442_s13 + $0x26] sm:$0xff]  ;;  %v3078_v27 = vld [vmem:[%s3442_s13 + $0x6e] sm:$0xff] }
 0x224   : > { %2968 = vst.msk [vmem:[%s4339_s17 + $0xf8] sm:$0xff] %vm2936_vm4, %v2881_v23  ;;  %v3075_v28 = vld [vmem:[%s3442_s13 + $0x46] sm:$0xff]  ;;  %v3080_v52 = vld [vmem:[%s3442_s13 + $0x8e] sm:$0xff] }
 0x225   : > { %3245 = vst.msk [vmem:[%s4339_s17 + $0x15e] sm:$0x3] %vm2973_vm6, %v7262_v29  ;;  %v3079_v35 = vld [vmem:[%s3442_s13 + $0x86] sm:$0xff]  ;;  %v3082_v0 = vld [vmem:[%s3442_s13 + $0xae] sm:$0xff] }
 0x226   : > { %3248 = vst.msk [vmem:[%s4339_s17 + $0x16e] sm:$0x3] %vm2973_vm6, %v7263_v7  ;;  %v3081_v38 = vld [vmem:[%s3442_s13 + $0xa6] sm:$0xff]  ;;  %v3084_v34 = vld [vmem:[%s3442_s13 + $0xce] sm:$0xff] }
 0x227   : > { %3251 = vst.msk [vmem:[%s4339_s17 + $0x17e] sm:$0x3] %vm2973_vm6, %v7264_v51  ;;  %v3083_v53 = vld [vmem:[%s3442_s13 + $0xc6] sm:$0xff]  ;;  %v3086_v30 = vld [vmem:[%s3442_s13 + $0xee] sm:$0xff] }
 0x228   : > { %3254 = vst.msk [vmem:[%s4339_s17 + $0x18e] sm:$0x3] %vm2973_vm6, %v7265_v31  ;;  %v3085_v57 = vld [vmem:[%s3442_s13 + $0xe6] sm:$0xff]  ;;  %v3088_v45 = vld [vmem:[%s3442_s13 + $0x10e] sm:$0xff] }
 0x229   : > { %3257 = vst.msk [vmem:[%s4339_s17 + $0x19e] sm:$0x3] %vm2973_vm6, %v7266_v4  ;;  %v3087_v62 = vld [vmem:[%s3442_s13 + $0x106] sm:$0xff]  ;;  %v3090_v6 = vld [vmem:[%s3442_s13 + $0x12e] sm:$0xff] }
 0x22a   : > { %3260 = vst.msk [vmem:[%s4339_s17 + $0x1ae] sm:$0x3] %vm2973_vm6, %v7267_v33  ;;  %v3089_v58 = vld [vmem:[%s3442_s13 + $0x126] sm:$0xff]  ;;  %v3092_v19 = vld [vmem:[%s3442_s13 + $0x14e] sm:$0xff] }
 0x22b   : > { %3263 = vst.msk [vmem:[%s4339_s17 + $0x1be] sm:$0x3] %vm2973_vm6, %v7268_v41  ;;  %v3091_v3 = vld [vmem:[%s3442_s13 + $0x146] sm:$0xff]  ;;  %v3094_v23 = vld [vmem:[%s3442_s13 + $0x16e] sm:$0xff] }
 0x22c   : > { %3272 = vst.msk [vmem:[%s4339_s17 + $0x1ee] sm:$0x3] %vm2973_vm6, %v6401_v14  ;;  %v7273_v14 = vld [vmem:[#allocation12_spill] sm:$0xff]  ;;  %v3093_v54 = vld [vmem:[%s3442_s13 + $0x166] sm:$0xff] }
 0x22d   : > { %3275 = vst.msk [vmem:[%s4339_s17 + $0x1fe] sm:$0x3] %vm2973_vm6, %v6456_v10  ;;  %v7274_v10 = vld [vmem:[#allocation24_spill] sm:$0xff]  ;;  %v3097_v49 = vld [vmem:[%s3442_s13 + $0x1a6] sm:$0xff] }
 0x22e   : > { %3276 = vst.msk [vmem:[%s4339_s17 + $0x1fc] sm:$0xf0] %vm3021_vm7, %v7269_v25  ;;  %v3098_v18 = vld [vmem:[%s3442_s13 + $0x1ae] sm:$0xff]  ;;  %v3099_v40 = vld [vmem:[%s3442_s13 + $0x1c6] sm:$0xff] }
 0x22f   : > { %3279 = vst.msk [vmem:[%s4339_s17 + $0x20c] sm:$0xf0] %vm3021_vm7, %v7270_v26  ;;  %v3100_v29 = vld [vmem:[%s3442_s13 + $0x1ce] sm:$0xff]  ;;  %v3101_v7 = vld [vmem:[%s3442_s13 + $0x1e6] sm:$0xff] }
 0x230   : > { %3288 = vst.msk [vmem:[%s4339_s17 + $0x23c] sm:$0xf0] %vm3021_vm7, %v7273_v14  ;;  %v3102_v51 = vld [vmem:[%s3442_s13 + $0x1ee] sm:$0xff] }
 0x231   : > { %3291 = vst.msk [vmem:[%s4339_s17 + $0x24c] sm:$0xf0] %vm3021_vm7, %v7274_v10 }
 0x232   : > { %3294 = vst.msk [vmem:[%s4339_s17 + $0x25c] sm:$0xf0] %vm3021_vm7, %v7275_v15 }
 0x233   : > { %3297 = vst.msk [vmem:[%s4339_s17 + $0x26c] sm:$0xf0] %vm3021_vm7, %v7276_v48 }
 0x234   : > { %3300 = vst.msk [vmem:[%s4339_s17 + $0x27c] sm:$0xf0] %vm3021_vm7, %v7277_v60 }
 0x235   : > { %3303 = vst.msk [vmem:[%s4339_s17 + $0x28c] sm:$0xf0] %vm3021_vm7, %v7278_v11 }
 0x236   : > { %3306 = vst.msk [vmem:[%s4339_s17 + $0x29c] sm:$0xf0] %vm3021_vm7, %v7279_v8 }
 0x237   : > { %3309 = vst.msk [vmem:[%s4339_s17 + $0x2ac] sm:$0xf0] %vm3021_vm7, %v7280_v12 }
 0x238   : > { %3312 = vst.msk [vmem:[%s4339_s17 + $0x2bc] sm:$0xf0] %vm3021_vm7, %v7281_v21 }
 0x239   : > { %3315 = vst.msk [vmem:[%s4339_s17 + $0x2cc] sm:$0xf0] %vm3021_vm7, %v7282_v16 }
 0x23a   : > { %3278 = vst.msk [vmem:[%s4339_s17 + $0x20c] sm:$0xf] %vm3024_vm8, %v7283_v61 }
 0x23b   : > { %3281 = vst.msk [vmem:[%s4339_s17 + $0x21c] sm:$0xf] %vm3024_vm8, %v7284_v9 }
 0x23c   : > { %3284 = vst.msk [vmem:[%s4339_s17 + $0x22c] sm:$0xf] %vm3024_vm8, %v7285_v42 }
 0x23d   : > { %3287 = vst.msk [vmem:[%s4339_s17 + $0x23c] sm:$0xf] %vm3024_vm8, %v7286_v46 }
 0x23e   : > { %3296 = vst.msk [vmem:[%s4339_s17 + $0x26c] sm:$0xf] %vm3024_vm8, %v7289_v20 }
 0x23f   : > { %3299 = vst.msk [vmem:[%s4339_s17 + $0x27c] sm:$0xf] %vm3024_vm8, %v7290_v50 }
 0x240   : > { %3302 = vst.msk [vmem:[%s4339_s17 + $0x28c] sm:$0xf] %vm3024_vm8, %v7291_v36 }
 0x241   : > { %3305 = vst.msk [vmem:[%s4339_s17 + $0x29c] sm:$0xf] %vm3024_vm8, %v7292_v47 }
 0x242   : > { %3308 = vst.msk [vmem:[%s4339_s17 + $0x2ac] sm:$0xf] %vm3024_vm8, %v7293_v44 }
 0x243   : > { %3311 = vst.msk [vmem:[%s4339_s17 + $0x2bc] sm:$0xf] %vm3024_vm8, %v7294_v2 }
 0x244   : > { %3314 = vst.msk [vmem:[%s4339_s17 + $0x2cc] sm:$0xf] %vm3024_vm8, %v7295_v32 }
 0x245   : > { %3317 = vst.msk [vmem:[%s4339_s17 + $0x2dc] sm:$0xf] %vm3024_vm8, %v7296_v17 }
 0x246   : > { %3324 = vst.msk [vmem:[%s4339_s17 + $0x300] sm:$0xff] %vm2936_vm4, %v3071_v24 }
 0x247   : > { %3325 = vst.msk [vmem:[%s4339_s17 + $0x308] sm:$0xff] %vm2936_vm4, %v3072_v56 }
 0x248   : > { %3326 = vst.msk [vmem:[%s4339_s17 + $0x310] sm:$0xff] %vm2936_vm4, %v3073_v43 }
 0x249   : > { %3327 = vst.msk [vmem:[%s4339_s17 + $0x318] sm:$0xff] %vm2936_vm4, %v3074_v13 }
 0x24a   : > { %3328 = vst.msk [vmem:[%s4339_s17 + $0x320] sm:$0xff] %vm2936_vm4, %v3075_v28 }
 0x24b   : > { %3331 = vst.msk [vmem:[%s4339_s17 + $0x338] sm:$0xff] %vm2936_vm4, %v3078_v27 }
 0x24c   : > { %3332 = vst.msk [vmem:[%s4339_s17 + $0x340] sm:$0xff] %vm2936_vm4, %v3079_v35 }
 0x24d   : > { %3333 = vst.msk [vmem:[%s4339_s17 + $0x348] sm:$0xff] %vm2936_vm4, %v3080_v52 }
 0x24e   : > { %3334 = vst.msk [vmem:[%s4339_s17 + $0x350] sm:$0xff] %vm2936_vm4, %v3081_v38 }
 0x24f   : > { %3335 = vst.msk [vmem:[%s4339_s17 + $0x358] sm:$0xff] %vm2936_vm4, %v3082_v0 }
 0x250   : > { %3336 = vst.msk [vmem:[%s4339_s17 + $0x360] sm:$0xff] %vm2936_vm4, %v3083_v53 }
 0x251   : > { %3337 = vst.msk [vmem:[%s4339_s17 + $0x368] sm:$0xff] %vm2936_vm4, %v3084_v34 }
 0x252   : > { %3338 = vst.msk [vmem:[%s4339_s17 + $0x370] sm:$0xff] %vm2936_vm4, %v3085_v57 }
 0x253   : > { %3339 = vst.msk [vmem:[%s4339_s17 + $0x378] sm:$0xff] %vm2936_vm4, %v3086_v30 }
 0x254   : > { %3340 = vst.msk [vmem:[%s4339_s17 + $0x380] sm:$0xff] %vm2936_vm4, %v3087_v62 }
 0x255   : > { %3341 = vst.msk [vmem:[%s4339_s17 + $0x388] sm:$0xff] %vm2936_vm4, %v3088_v45 }
 0x256   : > { %3342 = vst.msk [vmem:[%s4339_s17 + $0x390] sm:$0xff] %vm2936_vm4, %v3089_v58 }
 0x257   : > { %3343 = vst.msk [vmem:[%s4339_s17 + $0x398] sm:$0xff] %vm2936_vm4, %v3090_v6 }
 0x258   : > { %3344 = vst.msk [vmem:[%s4339_s17 + $0x3a0] sm:$0xff] %vm2936_vm4, %v3091_v3 }
 0x259   : > { %3345 = vst.msk [vmem:[%s4339_s17 + $0x3a8] sm:$0xff] %vm2936_vm4, %v3092_v19 }
 0x25a   : > { %3346 = vst.msk [vmem:[%s4339_s17 + $0x3b0] sm:$0xff] %vm2936_vm4, %v3093_v54 }
 0x25b   : > { %3347 = vst.msk [vmem:[%s4339_s17 + $0x3b8] sm:$0xff] %vm2936_vm4, %v3094_v23 }
 0x25c   : > { %3349 = vst.msk [vmem:[%s4339_s17 + $0x3c8] sm:$0xff] %vm2936_vm4, %v3096_v22 }
 0x25d   : > { %3350 = vst.msk [vmem:[%s4339_s17 + $0x3d0] sm:$0xff] %vm2936_vm4, %v3097_v49 }
 0x25e   : > { %3351 = vst.msk [vmem:[%s4339_s17 + $0x3d8] sm:$0xff] %vm2936_vm4, %v3098_v18 }
 0x25f   : > { %3352 = vst.msk [vmem:[%s4339_s17 + $0x3e0] sm:$0xff] %vm2936_vm4, %v3099_v40 }
 0x260   : > { %3353 = vst.msk [vmem:[%s4339_s17 + $0x3e8] sm:$0xff] %vm2936_vm4, %v3100_v29 }
 0x261   : > { %3354 = vst.msk [vmem:[%s4339_s17 + $0x3f0] sm:$0xff] %vm2936_vm4, %v3101_v7 }
 0x262   : > { %3355 = vst.msk [vmem:[%s4339_s17 + $0x3f8] sm:$0xff] %vm2936_vm4, %v3102_v51 }
 0x263 PF: > { %s11_s8 = sadd.s32 1, %s3406_s8   ;;  %s7297_s6 = smov %s3402_s7 }
 0x264   : > { %p8_p5 = scmp.ge.s32.totalorder %s11_s8, 4   ;;  %s7298_s7 = smov %s7300_s9 }
 0x266   :  { %10 = sbr.rel (!%p8_p5) target bundleno = 2 (0x2), region = 57 }

</bundles_post_ra>
